<compile_context>
chip_gen: v7x
topology: tpu7x:2x2x1
jax: 0.10.0
libtpu: 0.0.40
codegen_flags: <defaults>
</compile_context>

<pallas_src>
import functools

import jax
import jax.numpy as jnp
from jax.experimental import pallas as pl
from jax.experimental.pallas import tpu as pltpu


def burn_head_kernel(x_ref,    # [BT*HW, Cin]  bf16 trunk features (channels-last, flattened)
                     wc_ref,   # [Cin, 1280]   bf16 conv_head weight, BN2d scale folded in
                     cb_ref,   # [1, 1280]     f32 folded BN2d shift
                     w1_ref,   # [1280, 256]   bf16 Linear1 weight, 1/HW of the GAP folded in
                     b1_ref,   # [1, 256]      f32 Linear1 bias
                     w2_ref,   # [256, NCp]    bf16 Linear2 weight, BN1d scale folded, lane-padded
                     b2_ref,   # [1, NCp]      f32 Linear2 bias, BN1d shift folded, lane-padded
                     out_ref,  # [BT, NCp]     f32 logits (lane-padded)
                     *, hw, ew_dtype):
    bt = out_ref.shape[0]
    ch = wc_ref.shape[1]

    # backbone tail: 1x1 conv_head (pointwise conv == channel matmul) + folded BN + SiLU
    f = jnp.dot(x_ref[...], wc_ref[...], preferred_element_type=jnp.float32)
    f = (f + cb_ref[...]).astype(ew_dtype)
    # SiLU(x) = x * sigmoid(x) == x * (0.5*tanh(x/2) + 0.5): single EUP op per element
    f = f * (0.5 * jnp.tanh(0.5 * f) + 0.5)

    # global average pool over spatial positions: layout-preserving reshape-sum on the VPU/XLU
    # (HW is a multiple of the 8-sublane tile); the 1/HW factor is folded into w1. f32 accumulate.
    pooled = jnp.sum(f.reshape(bt, hw, ch).astype(jnp.float32), axis=1)

    # classifier head: Dropout(id) -> Linear -> ReLU -> BatchNorm1d(folded) -> Dropout(id) -> Linear
    h = jnp.dot(pooled.astype(jnp.bfloat16), w1_ref[...],
                preferred_element_type=jnp.float32) + b1_ref[...]
    h = jnp.maximum(h, 0.0)
    logits = jnp.dot(h.astype(jnp.bfloat16), w2_ref[...],
                     preferred_element_type=jnp.float32) + b2_ref[...]
    out_ref[...] = logits.astype(out_ref.dtype)


def _pick_batch_tile(B, HW):
    """BT: multiple of 8 dividing B, BT*HW near 1024 rows, >= 2 grid steps when possible."""
    candidates = [bt for bt in range(8, B + 1, 8) if B % bt == 0]
    if not candidates:
        return B          # tiny batch: single full-array block (BlockSpec full-dim exemption)
    multi = [bt for bt in candidates if B // bt >= 2]
    pool = multi if multi else candidates

    def score(bt):
        rows = bt * HW
        return (abs(rows - 1024), 0 if rows % 256 == 0 else 1)

    return min(pool, key=score)


def _default_elementwise_dtype():
    # bf16 VPU/EUP exists on v6e/v7x; v5e and older have no bf16 elementwise path -> keep f32.
    try:
        kind = jax.devices()[0].device_kind.lower()
    except Exception:
        return jnp.float32
    if any(v in kind for v in ("v2", "v3", "v4", "v5")):
        return jnp.float32
    return jnp.bfloat16


def burn_classifier_forward(x_nchw, params, num_classes, *, batch_tile=None,
                            elementwise_dtype=None):
    """x_nchw: [B, C_trunk, H, W] float32 trunk feature map (PyTorch NCHW)."""
    B, C, H, W = x_nchw.shape
    HW = H * W
    # TODO(synk): if the spatial dim is ever padded (e.g. HW=49 -> 56), padded rows would become
    # SiLU(cb) != 0 and must be masked before the reshape-sum pool; not handled here.
    assert HW % 8 == 0, "reshape-sum pooling assumes HW is a multiple of the 8-sublane tile"

    BT = _pick_batch_tile(B, HW) if batch_tile is None else batch_tile
    assert B % BT == 0, "batch_tile must divide batch"
    assert BT == B or BT % 8 == 0, "batch_tile must be a multiple of 8 when tiling the batch"
    ew_dtype = _default_elementwise_dtype() if elementwise_dtype is None else elementwise_dtype

    # layout plumbing in the wrapper: NCHW -> channels-last, flattened rows, bf16 MXU operands
    x = jnp.transpose(x_nchw, (0, 2, 3, 1)).reshape(B * HW, C).astype(jnp.bfloat16)

    # fold all affine BN / scaling algebra into the matmul weights (wrapper-side, free)
    CH = params["wc"].shape[1]              # 1280
    HID = params["w1"].shape[1]             # 256
    wc = (params["wc"] * params["cs"]).astype(jnp.bfloat16)            # BN2d scale -> conv weight
    cb = params["cb"].astype(jnp.float32)                              # BN2d shift stays as bias
    w1 = (params["w1"] / float(HW)).astype(jnp.bfloat16)               # 1/HW of GAP -> w1
    b1 = params["b1"].astype(jnp.float32)
    w2f = params["s1"].reshape(-1, 1) * params["w2"]                   # BN1d scale -> w2
    b2f = params["t1"] @ params["w2"] + params["b2"]                   # BN1d shift -> b2

    # lane-dense (padded) output -> unmasked stores; sliced back in the wrapper
    nc_pad = ((num_classes + 127) // 128) * 128
    w2p = jnp.zeros((HID, nc_pad), jnp.float32).at[:, :num_classes].set(w2f).astype(jnp.bfloat16)
    b2p = jnp.zeros((1, nc_pad), jnp.float32).at[:, :num_classes].set(b2f.reshape(1, -1))

    kernel = functools.partial(burn_head_kernel, hw=HW, ew_dtype=ew_dtype)

    # advisory cost estimate (pooling is now a VPU/XLU reduction -> no MXU flops for it)
    flops = int(2 * B * HW * C * CH + 2 * B * CH * HID + 2 * B * HID * nc_pad)
    transcendentals = int(B * HW * CH)
    bytes_accessed = int(B * HW * C * 2 + C * CH * 2 + CH * 4 + CH * HID * 2 + HID * 4
                         + HID * nc_pad * 2 + nc_pad * 4 + B * nc_pad * 4)

    resident = dict(pipeline_mode=pl.Buffered(1))   # constant index map: no double buffer needed
    grid = (B // BT,)
    out = pl.pallas_call(
        kernel,
        out_shape=jax.ShapeDtypeStruct((B, nc_pad), jnp.float32),
        grid_spec=pltpu.PrefetchScalarGridSpec(
            num_scalar_prefetch=0,
            grid=grid,
            in_specs=[
                pl.BlockSpec((BT * HW, C), lambda i: (i, 0)),          # x: tiled over batch
                pl.BlockSpec((C, CH), lambda i: (0, 0), **resident),   # weights: resident
                pl.BlockSpec((1, CH), lambda i: (0, 0), **resident),
                pl.BlockSpec((CH, HID), lambda i: (0, 0), **resident),
                pl.BlockSpec((1, HID), lambda i: (0, 0), **resident),
                pl.BlockSpec((HID, nc_pad), lambda i: (0, 0), **resident),
                pl.BlockSpec((1, nc_pad), lambda i: (0, 0), **resident),
            ],
            out_specs=pl.BlockSpec((BT, nc_pad), lambda i: (i, 0)),
        ),
        compiler_params=pltpu.CompilerParams(dimension_semantics=("parallel",)),
        cost_estimate=pl.CostEstimate(flops=flops, transcendentals=transcendentals,
                                      bytes_accessed=bytes_accessed),
    )(x, wc, cb, w1, b1, w2p, b2p)

    return out[:, :num_classes]


def fold_bn(gamma, beta, mean, var, eps=1e-5):
    scale = gamma / jnp.sqrt(var + eps)
    shift = beta - mean * scale
    return scale, shift


def reference_forward(x_nchw, params, num_classes, ew_dtype):
    """Pure-JAX reference of the same folded / mixed-precision math."""
    B, C, H, W = x_nchw.shape
    HW = H * W
    x = jnp.transpose(x_nchw, (0, 2, 3, 1)).reshape(B * HW, C).astype(jnp.bfloat16)
    wc = (params["wc"] * params["cs"]).astype(jnp.bfloat16)
    f = jnp.dot(x, wc, preferred_element_type=jnp.float32) + params["cb"]
    f = f.astype(ew_dtype)
    f = f * (0.5 * jnp.tanh(0.5 * f) + 0.5)
    ch = wc.shape[1]
    pooled = jnp.sum(f.reshape(B, HW, ch).astype(jnp.float32), axis=1)
    w1 = (params["w1"] / float(HW)).astype(jnp.bfloat16)
    h = jnp.dot(pooled.astype(jnp.bfloat16), w1, preferred_element_type=jnp.float32) + params["b1"]
    h = jnp.maximum(h, 0.0)
    w2 = (params["s1"].reshape(-1, 1) * params["w2"]).astype(jnp.bfloat16)
    b2 = params["t1"] @ params["w2"] + params["b2"]
    return jnp.dot(h.astype(jnp.bfloat16), w2, preferred_element_type=jnp.float32) + b2


if __name__ == "__main__":
    # shapes consistent with the forward's tail:
    #   trunk feature map [B, 320, 4, 4] -> conv_head 1280 -> BN+SiLU -> GAP -> 256 -> num_classes
    B, C_TRUNK, H, W = 16, 320, 4, 4
    C_HEAD, HID, NUM_CLASSES = 1280, 256, 4
    HW = H * W

    key = jax.random.PRNGKey(0)
    ks = jax.random.split(key, 13)

    x = jax.random.normal(ks[0], (B, C_TRUNK, H, W), jnp.float32)

    # conv_head (1x1 conv 320 -> 1280) + BatchNorm2d (eval mode, folded)
    wc = jax.random.normal(ks[1], (C_TRUNK, C_HEAD), jnp.float32) * 0.02
    cg = 1.0 + 0.1 * jax.random.normal(ks[2], (C_HEAD,), jnp.float32)
    cbeta = 0.1 * jax.random.normal(ks[3], (C_HEAD,), jnp.float32)
    cmean = 0.05 * jax.random.normal(ks[4], (C_HEAD,), jnp.float32)
    cvar = 0.5 + jax.random.uniform(ks[5], (C_HEAD,), jnp.float32)
    cs, cb = fold_bn(cg, cbeta, cmean, cvar)

    # classifier: Dropout -> Linear(1280,256) -> ReLU -> BatchNorm1d(256) -> Dropout -> Linear(256,nc)
    w1 = jax.random.normal(ks[6], (C_HEAD, HID), jnp.float32) * 0.02
    b1 = 0.01 * jax.random.normal(ks[7], (HID,), jnp.float32)
    g1 = 1.0 + 0.1 * jax.random.normal(ks[8], (HID,), jnp.float32)
    be1 = 0.1 * jax.random.normal(ks[9], (HID,), jnp.float32)
    m1 = 0.05 * jax.random.normal(ks[10], (HID,), jnp.float32)
    v1 = 0.5 + jax.random.uniform(ks[11], (HID,), jnp.float32)
    s1, t1 = fold_bn(g1, be1, m1, v1)
    w2 = jax.random.normal(ks[12], (HID, NUM_CLASSES), jnp.float32) * 0.05
    b2 = jnp.zeros((NUM_CLASSES,), jnp.float32)

    params = {
        "wc": wc, "cs": cs.reshape(1, -1), "cb": cb.reshape(1, -1),
        "w1": w1, "b1": b1.reshape(1, -1),
        "s1": s1.reshape(1, -1), "t1": t1.reshape(1, -1),
        "w2": w2, "b2": b2.reshape(1, -1),
    }

    ew_dtype = _default_elementwise_dtype()

    # default batch-tile selection picks BT=8 -> grid=(2,) -> exercises the batch-tiled path
    out = burn_classifier_forward(x, params, NUM_CLASSES)
    out = jax.block_until_ready(out)

    ref = reference_forward(x, params, NUM_CLASSES, ew_dtype)

    assert out.shape == (B, NUM_CLASSES)
    err = jnp.max(jnp.abs(out - ref))
    assert jnp.allclose(out, ref, atol=1e-2, rtol=1e-2), f"max abs err {err}"

    print("KERNEL_OK")
</pallas_src>

<mosaic_0001>
module attributes {stable_mosaic.version = 11 : i64} {
  func.func @burn_head_kernel(%arg0: i32, %arg1: memref<128x320xbf16, #tpu.memory_space<vmem>>, %arg2: memref<320x1280xbf16, #tpu.memory_space<vmem>>, %arg3: memref<1x1280xf32, #tpu.memory_space<vmem>>, %arg4: memref<1280x256xbf16, #tpu.memory_space<vmem>>, %arg5: memref<1x256xf32, #tpu.memory_space<vmem>>, %arg6: memref<256x128xbf16, #tpu.memory_space<vmem>>, %arg7: memref<1x128xf32, #tpu.memory_space<vmem>>, %arg8: memref<8x128xf32, #tpu.memory_space<vmem>>) attributes {dimension_semantics = [#tpu.dimension_semantics<parallel>], iteration_bounds = array<i64: 2>, scalar_prefetch = 0 : i64, scratch_operands = 0 : i64, tpu.core_type = #tpu.core_type<tc>, window_params = [{transform_indices = @transform_0, window_bounds = array<i64: 128, 320>}, {pipeline_mode = #tpu.pipeline_mode<synchronous>, transform_indices = @transform_1, window_bounds = array<i64: 320, 1280>}, {pipeline_mode = #tpu.pipeline_mode<synchronous>, transform_indices = @transform_2, window_bounds = array<i64: 1, 1280>}, {pipeline_mode = #tpu.pipeline_mode<synchronous>, transform_indices = @transform_3, window_bounds = array<i64: 1280, 256>}, {pipeline_mode = #tpu.pipeline_mode<synchronous>, transform_indices = @transform_4, window_bounds = array<i64: 1, 256>}, {pipeline_mode = #tpu.pipeline_mode<synchronous>, transform_indices = @transform_5, window_bounds = array<i64: 256, 128>}, {pipeline_mode = #tpu.pipeline_mode<synchronous>, transform_indices = @transform_6, window_bounds = array<i64: 1, 128>}, {transform_indices = @transform_7, window_bounds = array<i64: 8, 128>}]} {
    %c0 = arith.constant 0 : index
    %c0_0 = arith.constant 0 : index
    %0 = vector.load %arg1[%c0, %c0_0] : memref<128x320xbf16, #tpu.memory_space<vmem>>, vector<128x320xbf16>
    %c0_1 = arith.constant 0 : index
    %c0_2 = arith.constant 0 : index
    %1 = vector.load %arg2[%c0_1, %c0_2] : memref<320x1280xbf16, #tpu.memory_space<vmem>>, vector<320x1280xbf16>
    %cst = arith.constant dense<0.000000e+00> : vector<128x1280xf32>
    %2 = tpu.matmul %0, %1, %cst {dimension_numbers = #tpu.dot_dimension_numbers<[1], [0], [0], [1], [0, 0, 1, 1], [], []>} : vector<128x320xbf16>, vector<320x1280xbf16>, vector<128x1280xf32> -> vector<128x1280xf32>
    %c0_3 = arith.constant 0 : index
    %c0_4 = arith.constant 0 : index
    %3 = vector.load %arg3[%c0_3, %c0_4] : memref<1x1280xf32, #tpu.memory_space<vmem>>, vector<1x1280xf32>
    %4 = vector.broadcast %3 : vector<1x1280xf32> to vector<128x1280xf32>
    %5 = arith.addf %2, %4 : vector<128x1280xf32>
    %6 = arith.truncf %5 : vector<128x1280xf32> to vector<128x1280xbf16>
    %cst_5 = arith.constant 5.000000e-01 : bf16
    %7 = vector.broadcast %cst_5 : bf16 to vector<128x1280xbf16>
    %8 = arith.mulf %7, %6 : vector<128x1280xbf16>
    %9 = math.tanh %8 : vector<128x1280xbf16>
    %cst_6 = arith.constant 5.000000e-01 : bf16
    %10 = vector.broadcast %cst_6 : bf16 to vector<128x1280xbf16>
    %11 = arith.mulf %10, %9 : vector<128x1280xbf16>
    %cst_7 = arith.constant 5.000000e-01 : bf16
    %12 = vector.broadcast %cst_7 : bf16 to vector<128x1280xbf16>
    %13 = arith.addf %11, %12 : vector<128x1280xbf16>
    %14 = arith.mulf %6, %13 : vector<128x1280xbf16>
    %15 = vector.shape_cast %14 : vector<128x1280xbf16> to vector<8x16x1280xbf16>
    %16 = arith.extf %15 : vector<8x16x1280xbf16> to vector<8x16x1280xf32>
    %cst_8 = arith.constant dense<0.000000e+00> : vector<8x1280xf32>
    %17 = vector.multi_reduction <add>, %16, %cst_8 [1] : vector<8x16x1280xf32> to vector<8x1280xf32>
    %18 = arith.truncf %17 : vector<8x1280xf32> to vector<8x1280xbf16>
    %c0_9 = arith.constant 0 : index
    %c0_10 = arith.constant 0 : index
    %19 = vector.load %arg4[%c0_9, %c0_10] : memref<1280x256xbf16, #tpu.memory_space<vmem>>, vector<1280x256xbf16>
    %cst_11 = arith.constant dense<0.000000e+00> : vector<8x256xf32>
    %20 = tpu.matmul %18, %19, %cst_11 {dimension_numbers = #tpu.dot_dimension_numbers<[1], [0], [0], [1], [0, 0, 1, 1], [], []>} : vector<8x1280xbf16>, vector<1280x256xbf16>, vector<8x256xf32> -> vector<8x256xf32>
    %c0_12 = arith.constant 0 : index
    %c0_13 = arith.constant 0 : index
    %21 = vector.load %arg5[%c0_12, %c0_13] : memref<1x256xf32, #tpu.memory_space<vmem>>, vector<1x256xf32>
    %22 = vector.broadcast %21 : vector<1x256xf32> to vector<8x256xf32>
    %23 = arith.addf %20, %22 : vector<8x256xf32>
    %cst_14 = arith.constant 0.000000e+00 : f32
    %24 = vector.broadcast %cst_14 : f32 to vector<8x256xf32>
    %25 = arith.maximumf %23, %24 : vector<8x256xf32>
    %26 = arith.truncf %25 : vector<8x256xf32> to vector<8x256xbf16>
    %c0_15 = arith.constant 0 : index
    %c0_16 = arith.constant 0 : index
    %27 = vector.load %arg6[%c0_15, %c0_16] : memref<256x128xbf16, #tpu.memory_space<vmem>>, vector<256x128xbf16>
    %cst_17 = arith.constant dense<0.000000e+00> : vector<8x128xf32>
    %28 = tpu.matmul %26, %27, %cst_17 {dimension_numbers = #tpu.dot_dimension_numbers<[1], [0], [0], [1], [0, 0, 1, 1], [], []>} : vector<8x256xbf16>, vector<256x128xbf16>, vector<8x128xf32> -> vector<8x128xf32>
    %c0_18 = arith.constant 0 : index
    %c0_19 = arith.constant 0 : index
    %29 = vector.load %arg7[%c0_18, %c0_19] : memref<1x128xf32, #tpu.memory_space<vmem>>, vector<1x128xf32>
    %30 = vector.broadcast %29 : vector<1x128xf32> to vector<8x128xf32>
    %31 = arith.addf %28, %30 : vector<8x128xf32>
    %c0_20 = arith.constant 0 : index
    %c0_21 = arith.constant 0 : index
    %32 = vector.load %arg8[%c0_20, %c0_21] : memref<8x128xf32, #tpu.memory_space<vmem>>, vector<8x128xf32>
    tpu.vector_store %arg8[%c0_20, %c0_21], %31 {strides = array<i32>} : memref<8x128xf32, #tpu.memory_space<vmem>>, vector<8x128xf32>,
    return
  }
  func.func @transform_0(%arg0: i32) -> (i32, i32) {
    %c0_i32 = arith.constant 0 : i32
    %c0_i32_0 = arith.constant 0 : i32
    return %arg0, %c0_i32 : i32, i32
  }
  func.func @transform_1(%arg0: i32) -> (i32, i32) {
    %c0_i32 = arith.constant 0 : i32
    %c0_i32_0 = arith.constant 0 : i32
    %c0_i32_1 = arith.constant 0 : i32
    return %c0_i32, %c0_i32_0 : i32, i32
  }
  func.func @transform_2(%arg0: i32) -> (i32, i32) {
    %c0_i32 = arith.constant 0 : i32
    %c0_i32_0 = arith.constant 0 : i32
    %c0_i32_1 = arith.constant 0 : i32
    return %c0_i32, %c0_i32_0 : i32, i32
  }
  func.func @transform_3(%arg0: i32) -> (i32, i32) {
    %c0_i32 = arith.constant 0 : i32
    %c0_i32_0 = arith.constant 0 : i32
    %c0_i32_1 = arith.constant 0 : i32
    return %c0_i32, %c0_i32_0 : i32, i32
  }
  func.func @transform_4(%arg0: i32) -> (i32, i32) {
    %c0_i32 = arith.constant 0 : i32
    %c0_i32_0 = arith.constant 0 : i32
    %c0_i32_1 = arith.constant 0 : i32
    return %c0_i32, %c0_i32_0 : i32, i32
  }
  func.func @transform_5(%arg0: i32) -> (i32, i32) {
    %c0_i32 = arith.constant 0 : i32
    %c0_i32_0 = arith.constant 0 : i32
    %c0_i32_1 = arith.constant 0 : i32
    return %c0_i32, %c0_i32_0 : i32, i32
  }
  func.func @transform_6(%arg0: i32) -> (i32, i32) {
    %c0_i32 = arith.constant 0 : i32
    %c0_i32_0 = arith.constant 0 : i32
    %c0_i32_1 = arith.constant 0 : i32
    return %c0_i32, %c0_i32_0 : i32, i32
  }
  func.func @transform_7(%arg0: i32) -> (i32, i32) {
    %c0_i32 = arith.constant 0 : i32
    %c0_i32_0 = arith.constant 0 : i32
    return %arg0, %c0_i32 : i32, i32
  }
}

</mosaic_0001>

<bundles_post_ra>
// kernel: tpu_custom_call.1
= control target key start
LH: loop header
LB: loop body
LE: loop exit
PB: predicated region body
PF: predicated region fallthrough
CT: control target
= control target key end

     0   :  { %12 = vsyncpa [#allocation3], 0  ;;  %s9585_s0 = inlined_call_operand.vmem [shape: bf16[256,320], index: 0, kind: input, shape index: {}]   ;;  %s9586_s1 = inlined_call_operand.hbm [shape: bf16[320,1280], index: 1, kind: input, shape index: {}]   ;;  %s9587_s2 = inlined_call_operand.vmem [shape: f32[1,1280], index: 2, kind: input, shape index: {}]   ;;  %s9588_s3 = inlined_call_operand.hbm [shape: bf16[1280,256], index: 3, kind: input, shape index: {}]   ;;  %s9589_s4 = inlined_call_operand.vmem [shape: f32[1,256], index: 4, kind: input, shape index: {}]   ;;  %s9590_s5 = inlined_call_operand.vmem [shape: bf16[256,128], index: 5, kind: input, shape index: {}]   ;;  %s9591_s6 = inlined_call_operand.vmem [shape: f32[1,128], index: 6, kind: input, shape index: {}]   ;;  %s9592_s7 = inlined_call_operand.hbm [shape: f32[16,128], index: 7, kind: output, shape index: {}]  }
   0x1   :  { %13 = vsyncpa [#allocation6], 0 }
   0x2   :  { %14 = vsyncpa [#allocation4], 0 }
   0x3   :  { %16 = vsyncpa [#allocation4 + $0x1], 0  ;;  %s7710_s24 = smov 0   ;;  %s7712_s25 = smov 0  }
   0x4   :  { %s7714_s26 = smov 0   ;;  %s7716_s27 = smov 0  }
   0x5 LB: > { %s7731_s28 = sadd.s32 4294967295, %s7660_s27   ;;  %s5864_s29 = sadd.s32 4294967294, %s7660_s27   ;;  %s7660_s27 = sphi %s7716_s27, %s9729_s27   ;;  %s7656_s26 = sphi %s7714_s26, %s9728_s26   ;;  %s7652_s25 = sphi %s7712_s25, %s9727_s25   ;;  %s7648_s24 = sphi %s7710_s24, %s9726_s24  }
   0x6   : > { %s7735_s30 = sadd.s32 1, %s7660_s27   ;;  %s181_s8 = sadd.s32 1, %s7656_s26 }
   0x7   : > { %s178_s9 = ssub.s32 %s7660_s27, %s7735_s30  ;;  %p191_p0 = scmp.ne.s32.totalorder %s7656_s26, %s7652_s25 }
   0x8   : > { %p179_p1 = scmp.eq.s32.totalorder %s178_s9, 0  ;;  %p192_p2 = scmp.eq.s32.totalorder %s7731_s28, 1 }
   0x9   : > { %p197_p3 = scmp.ne.s32.totalorder %s7652_s25, %s7648_s24  ;;  %p198_p4 = scmp.eq.s32.totalorder %s5864_s29, 1 }
   0xa   : > { %s7746_s10 = scalar_select %p179_p1, %s7656_s26, %s181_s8  }
   0xb   : > { %p7748_p5 = por %p192_p2, %p191_p0  ;;  %p7752_p6 = por %p198_p4, %p197_p3 }
   0xc   : > { %9604 = sst [smem:[#allocation11_spill]] %s7746_s10  ;;  %p5865_p7 = scmp.ge.s32.totalorder %s7660_s27, 1 }
   0xd   : > { %s9605_s11 = scalar_select %p7748_p5, 1, 0 }
   0xe   : > { %s9606_s12 = scalar_select %p7752_p6, 1, 0 }
   0xf   : > { %p205_p8 = scmp.lt.s32.totalorder %s7660_s27, 3  ;;  %p9593_p9 = scmp.eq.s32.totalorder %s7731_s28, 0 }
  0x10   : > { %s7662_s14 = smov [#allocation2]   ;;  %s7663_s17 = smov [#allocation5]  }
  0x11   : > { %p7759_p10 = pnand %p5865_p7, %p205_p8  ;;  %s217_s15 = sshll.u32 %s7662_s14, 4  ;;  %s218_s15 = int_to_ptr.vmem [resolvable:$true] %s217_s15 }
  0x12   : > { %s233_s18 = sshll.u32 %s7663_s17, 4  ;;  %s7534_s21 = scalar_lea.hbm %s9586_s1, 25600  ;;  %s7771_s18 = int_to_ptr.vmem [resolvable:$true] %s233_s18 }
  0x13   : > { %s9607_s13 = scalar_select %p7759_p10, 1, 0 }
  0x14   : > { %p6691_p11 = pneg %p7759_p10  ;;  %p7535_p13 = scmp.ne.s32.totalorder %s9586_s1, %s7534_s21 }
  0x15   : > { %p7541_p3 = scmp.lt.u32.totalorder %s7534_s21, %s9586_s1 }
  0x16   : > { %p7767_p12 = pnand %p9593_p9, %p6691_p11 }
  0x18   : > { %p7536_p0 = pneg %p7767_p12 }
  0x1a   : > { %p7537_p1 = pnand %p7536_p0, %p7535_p13 }
  0x1c   : > { %p7538_p2 = pneg %p7537_p1 }
  0x1e   : > { %p7543_p4 = pnand %p7541_p3, %p7538_p2 }
  0x20   : > { %7546 = shalt.err (!%p7543_p4)
}
  0x21   : > { %s7547_s9 = scalar_lea.vmem %s218_s15, 25600  ;;  %p7555_p9 = scmp.lt.s32.totalorder %s218_s15, %s218_s15 }
  0x22   : > { %p7548_p7 = scmp.ne.s32.totalorder %s218_s15, %s7547_s9  ;;  %p7556_p6 = scmp.lt.s32.totalorder %s7547_s9, %s7547_s9 }
  0x24   : > { %p7550_p8 = pnand %p7548_p7, %p7536_p0  ;;  %p7557_p5 = por %p7556_p6, %p7555_p9 }
  0x26   : > { %p7551_p11 = pneg %p7550_p8 }
  0x28   : > { %p7558_p10 = pnand %p7557_p5, %p7551_p11 }
  0x2a   : > { %7561 = shalt.err (!%p7558_p10)
}
  0x2b   : > { %s7664_s14 = smov 640   ;;  %s7665_s17 = smov 40  }
  0x2c   : > { %6694 = dma.hbm_to_vmem [thread:$0]  (!%p7767_p12), %s9586_s1, 25600, %s218_s15, [#allocation3], %s7664_s14, %s7664_s14, %s7665_s17  }
  0x2d   : > { %s7562_s23 = scalar_lea.hbm %s9588_s3, 20480 }
  0x2e   : > { %p7563_p13 = scmp.ne.s32.totalorder %s9588_s3, %s7562_s23  ;;  %p7569_p9 = scmp.lt.u32.totalorder %s7562_s23, %s9588_s3 }
  0x30   : > { %p7565_p5 = pnand %p7563_p13, %p7536_p0 }
  0x32   : > { %p7566_p6 = pneg %p7565_p5 }
  0x34   : > { %p7571_p10 = pnand %p7569_p9, %p7566_p6 }
  0x36   : > { %7574 = shalt.err (!%p7571_p10)
}
  0x37   : > { %s7575_s15 = scalar_lea.vmem %s7771_s18, 20480  ;;  %p7583_p4 = scmp.lt.s32.totalorder %s7771_s18, %s7771_s18 }
  0x38   : > { %p7576_p1 = scmp.ne.s32.totalorder %s7771_s18, %s7575_s15  ;;  %p7584_p7 = scmp.lt.s32.totalorder %s7575_s15, %s7575_s15 }
  0x3a   : > { %p7578_p2 = pnand %p7576_p1, %p7536_p0  ;;  %p7585_p8 = por %p7584_p7, %p7583_p4 }
  0x3c   : > { %p7579_p3 = pneg %p7578_p2 }
  0x3e   : > { %p7586_p11 = pnand %p7585_p8, %p7579_p3 }
  0x40   : > { %7589 = shalt.err (!%p7586_p11)
}
  0x41   : > { %s7666_s10 = smov 128   ;;  %s7667_s14 = smov 8  }
  0x42   : > { %6697 = dma.hbm_to_vmem [thread:$0]  (!%p7767_p12), %s9588_s3, 20480, %s7771_s18, [#allocation6], %s7666_s10, %s7666_s10, %s7667_s14  }
  0x43   : > { %p9609_p13 = scmp.ne.s32.totalorder %s9607_s13, 0 }
  0x45   : > { %268 = sbr.rel (%p9609_p13) target bundleno = 1364 (0x554), region = 48 }
  0x4c   : > { %p9610_p0 = scmp.eq.s32.totalorder %s7731_s28, 0 }
  0x4e   : > { %7635 = dma.done.wait (%p9610_p0), [#allocation3], 25600   ;;  %p9611_p5 = pmov %p9610_p0 }
  0x4f   : > { %p9612_p6 = pmov %p9610_p0 }
  0x50   : > { %7637 = vsyncadd (%p9611_p5), [#allocation3], 4294941696 }
  0x51   : > { %7639 = dma.done.wait (%p9612_p6), [#allocation6], 20480   ;;  %p9613_p9 = pmov %p9610_p0 }
  0x52   : > { %v9596_v0 = vmov 0   ;;  %v6746_v1 = vld [vmem:[#allocation2 + $0x4] ss:$40 sps:$4 sm:$0xff]   ;;  %v6748_v2 = vld [vmem:[#allocation2] ss:$40 sps:$4 sm:$0xff]   ;;  %s5873_s13 = sshll.u32 %s7731_s28, 4 }
  0x53   : > { %7641 = vsyncadd (%p9613_p9), [#allocation6], 4294946816  ;;  %2116 = vmatprep.mubr.bf16.mxu1 %v9596_v0  ;;  %1745 = vmatprep.subr.bf16.mxu0 %v6746_v1  ;;  %v6749_v3 = vld [vmem:[#allocation2 + $0x54] ss:$40 sps:$4 sm:$0xff]   ;;  %v6751_v4 = vld [vmem:[#allocation2 + $0x50] ss:$40 sps:$4 sm:$0xff]  }
  0x54   : > { %1746 = vmatpush1.bf16.msra.mxu0 %v6748_v2  ;;  %v6752_v5 = vld [vmem:[#allocation2 + $0xa4] ss:$40 sps:$4 sm:$0xff]   ;;  %v6754_v6 = vld [vmem:[#allocation2 + $0xa0] ss:$40 sps:$4 sm:$0xff]   ;;  %p306_p12 = scmp.lt.s32.totalorder %s5873_s13, 31  ;;  %vm1720_vm0 = vcmask 523264  }
  0x55   : > { %1747 = vmatprep.subr.bf16.mxu0 %v6749_v3  ;;  %v6755_v7 = vld [vmem:[#allocation2 + $0xf4] ss:$40 sps:$4 sm:$0xff]   ;;  %v6757_v8 = vld [vmem:[#allocation2 + $0xf0] ss:$40 sps:$4 sm:$0xff]   ;;  %v6758_v9 = vld [vmem:[#allocation2 + $0x144] ss:$40 sps:$4 sm:$0xff]  }
  0x56   : > { %s9731_s13 = smov (!%p306_p12, %s5873_s13), 31  ;;  %v6760_v10 = vld [vmem:[#allocation2 + $0x140] ss:$40 sps:$4 sm:$0xff]   ;;  %v6761_v11 = vld [vmem:[#allocation2 + $0x194] ss:$40 sps:$4 sm:$0xff]   ;;  %vm4487_vm1 = vcmask 1041409  }
  0x57   : > { %s6680_s16 = smul.u32 12, %s9731_s13  ;;  %v6763_v12 = vld [vmem:[#allocation2 + $0x190] ss:$40 sps:$4 sm:$0xff]   ;;  %v6764_v13 = vld [vmem:[#allocation2 + $0x1e4] ss:$40 sps:$4 sm:$0xff]   ;;  %vm4489_vm2 = vcmask 1042434  }
  0x58   : > { %1748 = vmatpush1.bf16.msra.mxu0 %v6751_v4  ;;  %v6766_v15 = vld [vmem:[#allocation2 + $0x1e0] ss:$40 sps:$4 sm:$0xff]   ;;  %v6767_v16 = vld [vmem:[#allocation2 + $0x234] ss:$40 sps:$4 sm:$0xff]   ;;  %v6769_v17 = vld [vmem:[#allocation2 + $0x230] ss:$40 sps:$4 sm:$0xff]  }
  0x59   : > { %1749 = vmatprep.subr.bf16.mxu0 %v6752_v5  ;;  %s7835_s21 = scalar_lea.vmem %s9585_s0, %s6680_s16  ;;  %v6770_v18 = vld [vmem:[#allocation2 + $0x284] ss:$40 sps:$4 sm:$0xff]   ;;  %v6772_v19 = vld [vmem:[#allocation2 + $0x280] ss:$40 sps:$4 sm:$0xff]   ;;  %v6773_v20 = vld [vmem:[#allocation2 + $0x2d4] ss:$40 sps:$4 sm:$0xff]  }
  0x5a   : > { %v7838_v14 = vld [vmem:[%s7835_s21 + $0x4] ss:$12 sps:$4 sm:$0xff]   ;;  %v6818_v21 = vld [vmem:[#allocation2 + $0x50c] ss:$40 sps:$4 sm:$0xff]   ;;  %v6826_v26 = vld [vmem:[#allocation2 + $0x558] ss:$40 sps:$4 sm:$0xff]  }
  0x5b   : > { %1777 = vmatprep.mubr.bf16.mxu0 %v7838_v14  ;;  %v6820_v22 = vld [vmem:[#allocation2 + $0x508] ss:$40 sps:$4 sm:$0xff]   ;;  %v6776_v24 = vld [vmem:[#allocation2 + $0x324] ss:$40 sps:$4 sm:$0xff]   ;;  %2084 = vmatprep.subr.bf16.mxu1 %v6818_v21  ;;  %v6779_v29 = vld [vmem:[#allocation2 + $0x374] ss:$40 sps:$4 sm:$0xff]  }
  0x5c   : > { %1750 = vmatpush1.bf16.msra.mxu0 %v6754_v6  ;;  %v6775_v23 = vld [vmem:[#allocation2 + $0x2d0] ss:$40 sps:$4 sm:$0xff]   ;;  %2085 = vmatpush1.bf16.msra.mxu1 %v6820_v22  ;;  %v6824_v25 = vld [vmem:[#allocation2 + $0x55c] ss:$40 sps:$4 sm:$0xff]   ;;  %v6827_v27 = vld [vmem:[#allocation2 + $0x5ac] ss:$40 sps:$4 sm:$0xff]  }
  0x5d   : > { %1751 = vmatprep.subr.bf16.mxu0 %v6755_v7  ;;  %2086 = vmatprep.subr.bf16.mxu1 %v6824_v25  ;;  %v6778_v28 = vld [vmem:[#allocation2 + $0x320] ss:$40 sps:$4 sm:$0xff]   ;;  %v6836_v31 = vld [vmem:[#allocation2 + $0x5fc] ss:$40 sps:$4 sm:$0xff]   ;;  %v6781_v32 = vld [vmem:[#allocation2 + $0x370] ss:$40 sps:$4 sm:$0xff]  }
  0x5e   : > { %v6829_v30 = vld [vmem:[#allocation2 + $0x5a8] ss:$40 sps:$4 sm:$0xff]   ;;  %v6838_v33 = vld [vmem:[#allocation2 + $0x5f8] ss:$40 sps:$4 sm:$0xff]   ;;  %v6782_v34 = vld [vmem:[#allocation2 + $0x3c4] ss:$40 sps:$4 sm:$0xff]  }
  0x5f   : > { %v6842_v35 = vld [vmem:[#allocation2 + $0x1c] ss:$40 sps:$4 sm:$0xff]   ;;  %v6784_v36 = vld [vmem:[#allocation2 + $0x3c0] ss:$40 sps:$4 sm:$0xff]   ;;  %v6848_v40 = vld [vmem:[#allocation2 + $0x6c] ss:$40 sps:$4 sm:$0xff]  }
  0x60   : > { %1752 = vmatpush1.bf16.msra.mxu0 %v6757_v8  ;;  %2087 = vmatpush1.bf16.msra.mxu1 %v6826_v26  ;;  %v7842_v37 = vld [vmem:[%s7835_s21 + $0x8] ss:$12 sps:$4 sm:$0xff]   ;;  %v6840_v38 = vld [vmem:[#allocation2 + $0x18] ss:$40 sps:$4 sm:$0xff]   ;;  %v6788_v43 = vld [vmem:[#allocation2 + $0x464] ss:$40 sps:$4 sm:$0xff]  }
  0x61   : > { %1753 = vmatprep.subr.bf16.mxu0 %v6758_v9  ;;  %2088 = vmatprep.subr.bf16.mxu1 %v6827_v27  ;;  %v6785_v39 = vld [vmem:[#allocation2 + $0x414] ss:$40 sps:$4 sm:$0xff]   ;;  %v6787_v41 = vld [vmem:[#allocation2 + $0x410] ss:$40 sps:$4 sm:$0xff]   ;;  %v6790_v45 = vld [vmem:[#allocation2 + $0x460] ss:$40 sps:$4 sm:$0xff]  }
  0x62   : > { %v6846_v42 = vld [vmem:[#allocation2 + $0x68] ss:$40 sps:$4 sm:$0xff]   ;;  %v6852_v44 = vld [vmem:[#allocation2 + $0xbc] ss:$40 sps:$4 sm:$0xff]   ;;  %v7848_v47 = vld [vmem:[%s7835_s21 + $0x20] ss:$12 sps:$4 sm:$0xff]  }
  0x63   : > { %v6791_v46 = vld [vmem:[#allocation2 + $0x4b4] ss:$40 sps:$4 sm:$0xff]   ;;  %v6850_v48 = vld [vmem:[#allocation2 + $0xb8] ss:$40 sps:$4 sm:$0xff]   ;;  %v6799_v51 = vld [vmem:[#allocation2 + $0x504] ss:$40 sps:$4 sm:$0xff]  }
  0x64   : > { %1754 = vmatpush1.bf16.msra.mxu0 %v6760_v10  ;;  %2089 = vmatpush1.bf16.msra.mxu1 %v6829_v30  ;;  %v6858_v49 = vld [vmem:[#allocation2 + $0x10c] ss:$40 sps:$4 sm:$0xff]   ;;  %v6793_v50 = vld [vmem:[#allocation2 + $0x4b0] ss:$40 sps:$4 sm:$0xff]   ;;  %v6865_v53 = vld [vmem:[#allocation2 + $0x15c] ss:$40 sps:$4 sm:$0xff]  }
  0x65   : > { %1755 = vmatprep.subr.bf16.mxu0 %v6761_v11  ;;  %2090 = vmatprep.subr.bf16.mxu1 %v6836_v31  ;;  %v6856_v52 = vld [vmem:[#allocation2 + $0x108] ss:$40 sps:$4 sm:$0xff]   ;;  %v7853_v54 = vld [vmem:[%s7835_s21] ss:$12 sps:$4 sm:$0xff]   ;;  %v7857_v56 = vld [vmem:[%s7835_s21 + $0x38] ss:$12 sps:$4 sm:$0xff]  }
  0x66   : > { %v6797_v55 = vld [vmem:[#allocation2 + $0x500] ss:$40 sps:$4 sm:$0xff]   ;;  %v6808_v58 = vld [vmem:[#allocation2 + $0x554] ss:$40 sps:$4 sm:$0xff]   ;;  %v6806_v61 = vld [vmem:[#allocation2 + $0x550] ss:$40 sps:$4 sm:$0xff]  }
  0x67   : > { %v7860_v57 = vld [vmem:[%s7835_s21 + $0x1c] ss:$12 sps:$4 sm:$0xff]   ;;  %v6863_v59 = vld [vmem:[#allocation2 + $0x158] ss:$40 sps:$4 sm:$0xff]   ;;  %v6871_v60 = vld [vmem:[#allocation2 + $0x1ac] ss:$40 sps:$4 sm:$0xff]  }
  0x68   : > { %1756 = vmatpush1.bf16.msra.mxu0 %v6763_v12  ;;  %2091 = vmatpush1.bf16.msra.mxu1 %v6838_v33  ;;  %v7867_v62 = vld [vmem:[%s7835_s21 + $0x18] ss:$12 sps:$4 sm:$0xff]   ;;  %v6869_v1 = vld [vmem:[#allocation2 + $0x1a8] ss:$40 sps:$4 sm:$0xff]   ;;  %v7870_v2 = vld [vmem:[%s7835_s21 + $0x34] ss:$12 sps:$4 sm:$0xff]  }
  0x69   : > { %1757 = vmatprep.subr.bf16.mxu0 %v6764_v13  ;;  %2423 = vmatprep.subr.bf16.mxu1 %v6842_v35  ;;  %v6817_v63 = vld [vmem:[#allocation2 + $0x5a4] ss:$40 sps:$4 sm:$0xff]   ;;  %v7874_v4 = vld [vmem:[%s7835_s21 + $0x50] ss:$12 sps:$4 sm:$0xff]   ;;  %v6815_v5 = vld [vmem:[#allocation2 + $0x5a0] ss:$40 sps:$4 sm:$0xff]  }
  0x6a   : > { %v6878_v3 = vld [vmem:[#allocation2 + $0x1fc] ss:$40 sps:$4 sm:$0xff]   ;;  %v6876_v7 = vld [vmem:[#allocation2 + $0x1f8] ss:$40 sps:$4 sm:$0xff]   ;;  %v6884_v8 = vld [vmem:[#allocation2 + $0x24c] ss:$40 sps:$4 sm:$0xff]  }
  0x6b   : > { %6107 = vmatmul.mubr.msk.bf16.vlgmr.msra.gmra.mrb[0].mxu1 %vm1720_vm0, %v7842_v37  ;;  %v6835_v6 = vld [vmem:[#allocation2 + $0x5f4] ss:$40 sps:$4 sm:$0xff]   ;;  %v6833_v9 = vld [vmem:[#allocation2 + $0x5f0] ss:$40 sps:$4 sm:$0xff]   ;;  %v7899_v22 = vld [vmem:[%s7835_s21 + $0x80] ss:$12 sps:$4 sm:$0xff]  }
  0x6c   : > { %1758 = vmatpush1.bf16.msra.mxu0 %v6766_v15  ;;  %2424 = vmatpush1.bf16.msra.mxu1 %v6840_v38  ;;  %v6855_v10 = vld [vmem:[#allocation2 + $0xc] ss:$40 sps:$4 sm:$0xff]   ;;  %v6882_v11 = vld [vmem:[#allocation2 + $0x248] ss:$40 sps:$4 sm:$0xff]   ;;  %v6891_v13 = vld [vmem:[#allocation2 + $0x29c] ss:$40 sps:$4 sm:$0xff]  }
  0x6d   : > { %1759 = vmatprep.subr.bf16.mxu0 %v6767_v16  ;;  %2425 = vmatprep.subr.bf16.mxu1 %v6848_v40  ;;  %v7881_v12 = vld [vmem:[%s7835_s21 + $0x30] ss:$12 sps:$4 sm:$0xff]   ;;  %v7885_v15 = vld [vmem:[%s7835_s21 + $0x68] ss:$12 sps:$4 sm:$0xff]   ;;  %v7888_v16 = vld [vmem:[%s7835_s21 + $0x4c] ss:$12 sps:$4 sm:$0xff]  }
  0x6e   : > { %2126 = vmatprep.mubr.bf16.mxu1 %v9596_v0  ;;  %v7896_v21 = vld [vmem:[%s7835_s21 + $0x48] ss:$12 sps:$4 sm:$0xff]   ;;  %v6917_v27 = vld [vmem:[#allocation2 + $0x3dc] ss:$40 sps:$4 sm:$0xff]   ;;  %v6915_v31 = vld [vmem:[#allocation2 + $0x3d8] ss:$40 sps:$4 sm:$0xff]  }
  0x6f   : > { %v6910_v25 = vld [vmem:[#allocation2 + $0x38c] ss:$40 sps:$4 sm:$0xff]   ;;  %v6908_v26 = vld [vmem:[#allocation2 + $0x388] ss:$40 sps:$4 sm:$0xff]   ;;  %v7924_v35 = vld [vmem:[%s7835_s21 + $0x78] ss:$12 sps:$4 sm:$0xff]  }
  0x70   : > { %1760 = vmatpush1.bf16.msra.mxu0 %v6769_v17  ;;  %2426 = vmatpush1.bf16.msra.mxu1 %v6846_v42  ;;  %v6889_v17 = vld [vmem:[#allocation2 + $0x298] ss:$40 sps:$4 sm:$0xff]   ;;  %v7916_v30 = vld [vmem:[%s7835_s21 + $0x7c] ss:$12 sps:$4 sm:$0xff]   ;;  %v6936_v40 = vld [vmem:[#allocation2 + $0x4cc] ss:$40 sps:$4 sm:$0xff]  }
  0x71   : > { %1761 = vmatprep.subr.bf16.mxu0 %v6770_v18  ;;  %2427 = vmatprep.subr.bf16.mxu1 %v6852_v44  ;;  %v6897_v18 = vld [vmem:[#allocation2 + $0x2ec] ss:$40 sps:$4 sm:$0xff]   ;;  %v6921_v33 = vld [vmem:[#allocation2 + $0x428] ss:$40 sps:$4 sm:$0xff]   ;;  %v6978_v42 = vld [vmem:[#allocation2 + $0x51c] ss:$40 sps:$4 sm:$0xff]  }
  0x72   : > { %v7930_v38 = vld [vmem:[%s7835_s21 + $0x94] ss:$12 sps:$4 sm:$0xff]   ;;  %v7941_v44 = vld [vmem:[%s7835_s21 + $0xac] ss:$12 sps:$4 sm:$0xff]   ;;  %vm4491_vm3 = vcmask 1043459   ;;  %vm4493_vm4 = vcmask 1044484  }
  0x73   : > { %6108 = vmatmul.mubr.msk.bf16.gmra.mrb[4].mxu1 %vm1720_vm0, %v7848_v47  ;;  %vm4495_vm5 = vcmask 1045509   ;;  %vm4497_vm6 = vcmask 1046534   ;;  %vm4499_vm7 = vcmask 1047559   ;;  %s302_s13 = sand.u32 1, %s7652_s25   ;;  %p9723_p1 = scmp.ne.s32.totalorder %s9605_s11, 0 }
  0x74   : > { %1762 = vmatpush1.bf16.msra.mxu0 %v6772_v19  ;;  %2428 = vmatpush1.bf16.msra.mxu1 %v6850_v48  ;;  %v6895_v19 = vld [vmem:[#allocation2 + $0x2e8] ss:$40 sps:$4 sm:$0xff]   ;;  %s5872_s16 = sshll.u32 %s302_s13, 3  ;;  %s5770_s15 = scalar_lea.sflag [#allocation4], %s302_s13 }
  0x75   : > { %1763 = vmatprep.subr.bf16.mxu0 %v6773_v20  ;;  %2429 = vmatprep.subr.bf16.mxu1 %v6858_v49  ;;  %v6904_v20 = vld [vmem:[#allocation2 + $0x33c] ss:$40 sps:$4 sm:$0xff]   ;;  %v7947_v48 = vld [vmem:[%s7835_s21 + $0xa8] ss:$12 sps:$4 sm:$0xff]   ;;  %s304_s22 = scalar_lea.vmem [#allocation7], %s5872_s16 }
  0x76   : > { %2136 = vmatprep.mubr.bf16.mxu1 %v9596_v0  ;;  %v6990_v49 = vld [vmem:[#allocation2 + $0x5bc] ss:$40 sps:$4 sm:$0xff]   ;;  %s5783_s23 = sshll.u32 %s304_s22, 4  ;;  %s9545_s23 = int_to_ptr.vmem [resolvable:$true] %s5783_s23 }
  0x77   : > { %s7590_s10 = scalar_lea.vmem %s9545_s23, 128 }
  0x78   : > { %1764 = vmatpush1.bf16.msra.mxu0 %v6775_v23  ;;  %2430 = vmatpush1.bf16.msra.mxu1 %v6856_v52  ;;  %v7902_v23 = vld [vmem:[%s7835_s21 + $0x64] ss:$12 sps:$4 sm:$0xff]   ;;  %p7591_p10 = scmp.ne.s32.totalorder %s9545_s23, %s7590_s10 }
  0x79   : > { %1765 = vmatprep.subr.bf16.mxu0 %v6776_v24  ;;  %2431 = vmatprep.subr.bf16.mxu1 %v6865_v53  ;;  %v6902_v24 = vld [vmem:[#allocation2 + $0x338] ss:$40 sps:$4 sm:$0xff]   ;;  %v6994_v52 = vld [vmem:[#allocation2 + $0x608] ss:$40 sps:$4 sm:$0xff]  }
  0x7a   : > { %v6853_v53 = vld [vmem:[#allocation2 + $0x8] ss:$40 sps:$4 sm:$0xff]   ;;  %p7592_p2 = pnand %p7591_p10, %p9723_p1 }
  0x7b   : > { %6109 = vmatmul.mubr.msk.bf16.gmra.mrb[8].mxu1 %vm1720_vm0, %v7857_v56 }
  0x7c   : > { %1766 = vmatpush1.bf16.msra.mxu0 %v6778_v28  ;;  %2432 = vmatpush1.bf16.msra.mxu1 %v6863_v59  ;;  %v7910_v28 = vld [vmem:[%s7835_s21 + $0x60] ss:$12 sps:$4 sm:$0xff]   ;;  %v6874_v59 = vld [vmem:[#allocation2 + $0xfc] ss:$40 sps:$4 sm:$0xff]   ;;  %p7593_p3 = pneg %p7592_p2 }
  0x7d   : > { %1767 = vmatprep.subr.bf16.mxu0 %v6779_v29  ;;  %2433 = vmatprep.subr.bf16.mxu1 %v6871_v60  ;;  %v7913_v29 = vld [vmem:[%s7835_s21 + $0x98] ss:$12 sps:$4 sm:$0xff]  }
  0x7e   : > { %2146 = vmatprep.mubr.bf16.mxu1 %v9596_v0  ;;  %v6872_v60 = vld [vmem:[#allocation2 + $0xf8] ss:$40 sps:$4 sm:$0xff]  }
  0x80   : > { %1768 = vmatpush1.bf16.msra.mxu0 %v6781_v32  ;;  %2434 = vmatpush1.bf16.msra.mxu1 %v6869_v1  ;;  %v6923_v32 = vld [vmem:[#allocation2 + $0x42c] ss:$40 sps:$4 sm:$0xff]  }
  0x81   : > { %1769 = vmatprep.subr.bf16.mxu0 %v6782_v34  ;;  %2435 = vmatprep.subr.bf16.mxu1 %v6878_v3  ;;  %v6930_v34 = vld [vmem:[#allocation2 + $0x47c] ss:$40 sps:$4 sm:$0xff]   ;;  %v6894_v1 = vld [vmem:[#allocation2 + $0x1ec] ss:$40 sps:$4 sm:$0xff]   ;;  %v6898_v3 = vld [vmem:[#allocation2 + $0x238] ss:$40 sps:$4 sm:$0xff]  }
  0x83   : > { %6110 = vmatmul.mubr.msk.bf16.gmra.mrb[12].mxu1 %vm1720_vm0, %v7874_v4 }
  0x84   : > { %1770 = vmatpush1.bf16.msra.mxu0 %v6784_v36  ;;  %2436 = vmatpush1.bf16.msra.mxu1 %v6876_v7  ;;  %v7927_v36 = vld [vmem:[%s7835_s21 + $0xb0] ss:$12 sps:$4 sm:$0xff]   ;;  %v6911_v7 = vld [vmem:[#allocation2 + $0x2d8] ss:$40 sps:$4 sm:$0xff]  }
  0x85   : > { %1771 = vmatprep.subr.bf16.mxu0 %v6785_v39  ;;  %2437 = vmatprep.subr.bf16.mxu1 %v6884_v8  ;;  %v6928_v39 = vld [vmem:[#allocation2 + $0x478] ss:$40 sps:$4 sm:$0xff]   ;;  %v6920_v8 = vld [vmem:[#allocation2 + $0x32c] ss:$40 sps:$4 sm:$0xff]  }
  0x86   : > { %2156 = vmatprep.mubr.bf16.mxu1 %v9596_v0 }
  0x88   : > { %1772 = vmatpush1.bf16.msra.mxu0 %v6787_v41  ;;  %2438 = vmatpush1.bf16.msra.mxu1 %v6882_v11  ;;  %v6934_v41 = vld [vmem:[#allocation2 + $0x4c8] ss:$40 sps:$4 sm:$0xff]   ;;  %v6933_v11 = vld [vmem:[#allocation2 + $0x3cc] ss:$40 sps:$4 sm:$0xff]  }
  0x89   : > { %1773 = vmatprep.subr.bf16.mxu0 %v6788_v43  ;;  %2439 = vmatprep.subr.bf16.mxu1 %v6891_v13  ;;  %v7938_v43 = vld [vmem:[%s7835_s21 + $0x90] ss:$12 sps:$4 sm:$0xff]  }
  0x8a   : > { %v6939_v13 = vld [vmem:[#allocation2 + $0x41c] ss:$40 sps:$4 sm:$0xff]  }
  0x8b   : > { %6111 = vmatmul.mubr.msk.bf16.gmra.mrb[16].mxu1 %vm1720_vm0, %v7885_v15 }
  0x8c   : > { %1774 = vmatpush1.bf16.msra.mxu0 %v6790_v45  ;;  %2166 = vmatprep.mubr.bf16.mxu1 %v9596_v0  ;;  %v6976_v45 = vld [vmem:[#allocation2 + $0x518] ss:$40 sps:$4 sm:$0xff]  }
  0x8d   : > { %1775 = vmatprep.subr.bf16.mxu0 %v6791_v46  ;;  %2440 = vmatpush1.bf16.msra.mxu1 %v6889_v17  ;;  %v6984_v46 = vld [vmem:[#allocation2 + $0x56c] ss:$40 sps:$4 sm:$0xff]  }
  0x8e   : > { %2441 = vmatprep.subr.bf16.mxu1 %v6897_v18  ;;  %v7988_v17 = vld [vmem:[%s7835_s21 + $0x8] ss:$12 sps:$4 sm:$0xff]  }
  0x8f   : > { %v6940_v18 = vld [vmem:[#allocation2 + $0x468] ss:$40 sps:$4 sm:$0xff]  }
  0x90   : > { %1776 = vmatpush1.bf16.msra.mxu0 %v6793_v50  ;;  %v6988_v50 = vld [vmem:[#allocation2 + $0x5b8] ss:$40 sps:$4 sm:$0xff]  }
  0x91   : > { %1858 = vmatprep.subr.bf16.mxu0 %v6799_v51  ;;  %2442 = vmatpush1.bf16.msra.mxu1 %v6895_v19  ;;  %v6996_v51 = vld [vmem:[#allocation2 + $0x60c] ss:$40 sps:$4 sm:$0xff]   ;;  %v6945_v19 = vld [vmem:[#allocation2 + $0x4bc] ss:$40 sps:$4 sm:$0xff]  }
  0x92   : > { %2443 = vmatprep.subr.bf16.mxu1 %v6904_v20  ;;  %v6943_v20 = vld [vmem:[#allocation2 + $0x4b8] ss:$40 sps:$4 sm:$0xff]  }
  0x93   : > { %1778 = vmatmul.mubr.bf16.vlgmr.msra.gmra.mrb[0].mxu0 %v7853_v54  ;;  %6112 = vmatmul.mubr.msk.bf16.gmra.mrb[20].mxu1 %vm1720_vm0, %v7899_v22 }
  0x94   : > { %1859 = vmatpush1.bf16.msra.mxu0 %v6797_v55  ;;  %1787 = vmatprep.mubr.bf16.mxu0 %v7860_v57  ;;  %v6859_v55 = vld [vmem:[#allocation2 + $0x58] ss:$40 sps:$4 sm:$0xff]  }
  0x95   : > { %1860 = vmatprep.subr.bf16.mxu0 %v6808_v58  ;;  %2176 = vmatprep.mubr.bf16.mxu1 %v9596_v0  ;;  %v6866_v58 = vld [vmem:[#allocation2 + $0xa8] ss:$40 sps:$4 sm:$0xff]  }
  0x96   : > { %2444 = vmatpush1.bf16.msra.mxu1 %v6902_v24  ;;  %v6948_v24 = vld [vmem:[#allocation2 + $0x14] ss:$40 sps:$4 sm:$0xff]  }
  0x97   : > { %2445 = vmatprep.subr.bf16.mxu1 %v6910_v25  ;;  %v7996_v25 = vld [vmem:[%s7835_s21 + $0x4] ss:$12 sps:$4 sm:$0xff]  }
  0x98   : > { %1861 = vmatpush1.bf16.msra.mxu0 %v6806_v61  ;;  %v6881_v61 = vld [vmem:[#allocation2 + $0x14c] ss:$40 sps:$4 sm:$0xff]  }
  0x99   : > { %1862 = vmatprep.subr.bf16.mxu0 %v6817_v63  ;;  %v6885_v63 = vld [vmem:[#allocation2 + $0x198] ss:$40 sps:$4 sm:$0xff]  }
  0x9a   : > { %2446 = vmatpush1.bf16.msra.mxu1 %v6908_v26  ;;  %v8000_v26 = vld [vmem:[%s7835_s21 + $0x20] ss:$12 sps:$4 sm:$0xff]  }
  0x9b   : > { %1788 = vmatmul.mubr.bf16.gmra.mrb[4].mxu0 %v7867_v62  ;;  %2447 = vmatprep.subr.bf16.mxu1 %v6917_v27  ;;  %v6946_v27 = vld [vmem:[#allocation2 + $0x10] ss:$40 sps:$4 sm:$0xff]  }
  0x9c   : > { %1797 = vmatprep.mubr.bf16.mxu0 %v7870_v2  ;;  %1863 = vmatpush1.bf16.msra.mxu0 %v6815_v5  ;;  %v6907_v5 = vld [vmem:[#allocation2 + $0x28c] ss:$40 sps:$4 sm:$0xff]  }
  0x9d   : > { %1864 = vmatprep.subr.bf16.mxu0 %v6835_v6  ;;  %6113 = vmatmul.mubr.msk.bf16.gmra.mrb[24].mxu1 %vm1720_vm0, %v7913_v29  ;;  %v6913_v6 = vld [vmem:[#allocation2 + $0x2dc] ss:$40 sps:$4 sm:$0xff]  }
  0x9e   : > { %2186 = vmatprep.mubr.bf16.mxu1 %v9596_v0  ;;  %2448 = vmatpush1.bf16.msra.mxu1 %v6915_v31  ;;  %v6951_v31 = vld [vmem:[#allocation2 + $0x64] ss:$40 sps:$4 sm:$0xff]  }
  0x9f   : > { %2449 = vmatprep.subr.bf16.mxu1 %v6923_v32  ;;  %v8006_v32 = vld [vmem:[%s7835_s21] ss:$12 sps:$4 sm:$0xff]  }
  0xa0   : > { %1865 = vmatpush1.bf16.msra.mxu0 %v6833_v9  ;;  %v6926_v9 = vld [vmem:[#allocation2 + $0x37c] ss:$40 sps:$4 sm:$0xff]  }
  0xa1   : > { %1971 = vmatprep.subr.bf16.mxu0 %v6855_v10  ;;  %v6924_v10 = vld [vmem:[#allocation2 + $0x378] ss:$40 sps:$4 sm:$0xff]  }
  0xa2   : > { %2450 = vmatpush1.bf16.msra.mxu1 %v6921_v33  ;;  %v6949_v33 = vld [vmem:[#allocation2 + $0x60] ss:$40 sps:$4 sm:$0xff]  }
  0xa3   : > { %1798 = vmatmul.mubr.bf16.gmra.mrb[8].mxu0 %v7881_v12  ;;  %2451 = vmatprep.subr.bf16.mxu1 %v6930_v34  ;;  %v8010_v34 = vld [vmem:[%s7835_s21 + $0x1c] ss:$12 sps:$4 sm:$0xff]  }
  0xa4   : > { %1807 = vmatprep.mubr.bf16.mxu0 %v7888_v16 }
  0xa5   : > { %6114 = vmatmul.mubr.msk.bf16.gmra.mrb[28].mxu1 %vm1720_vm0, %v7927_v36 }
  0xa6   : > { %2455 = vmatprep.mubr.bf16.mxu1 %v7838_v14  ;;  %2452 = vmatpush1.bf16.msra.mxu1 %v6928_v39  ;;  %v6982_v14 = vld [vmem:[#allocation2 + $0x568] ss:$40 sps:$4 sm:$0xff]   ;;  %v6954_v39 = vld [vmem:[#allocation2 + $0xb4] ss:$40 sps:$4 sm:$0xff]  }
  0xa7   : > { %2453 = vmatprep.subr.bf16.mxu1 %v6936_v40  ;;  %v8014_v40 = vld [vmem:[%s7835_s21 + $0x38] ss:$12 sps:$4 sm:$0xff]  }
  0xaa   : > { %2454 = vmatpush1.bf16.msra.mxu1 %v6934_v41  ;;  %v6952_v41 = vld [vmem:[#allocation2 + $0xb0] ss:$40 sps:$4 sm:$0xff]  }
  0xab   : > { %1808 = vmatmul.mubr.bf16.gmra.mrb[12].mxu0 %v7896_v21  ;;  %2536 = vmatprep.subr.bf16.mxu1 %v6978_v42  ;;  %v6957_v42 = vld [vmem:[#allocation2 + $0x104] ss:$40 sps:$4 sm:$0xff]  }
  0xac   : > { %1817 = vmatprep.mubr.bf16.mxu0 %v7902_v23 }
  0xad   : > { %2456 = vmatmul.mubr.bf16.vlgmr.msra.gmra.mrb[32].mxu1 %v7853_v54  ;;  %v6861_v54 = vld [vmem:[#allocation2 + $0x5c] ss:$40 sps:$4 sm:$0xff]  }
  0xae   : > { %2465 = vmatprep.mubr.bf16.mxu1 %v7860_v57  ;;  %2537 = vmatpush1.bf16.msra.mxu1 %v6976_v45  ;;  %v6868_v57 = vld [vmem:[#allocation2 + $0xac] ss:$40 sps:$4 sm:$0xff]   ;;  %v8020_v45 = vld [vmem:[%s7835_s21 + $0x18] ss:$12 sps:$4 sm:$0xff]  }
  0xaf   : > { %2538 = vmatprep.subr.bf16.mxu1 %v6984_v46  ;;  %v6955_v46 = vld [vmem:[#allocation2 + $0x100] ss:$40 sps:$4 sm:$0xff]  }
  0xb2   : > { %2539 = vmatpush1.bf16.msra.mxu1 %v6982_v14  ;;  %v8024_v14 = vld [vmem:[%s7835_s21 + $0x34] ss:$12 sps:$4 sm:$0xff]  }
  0xb3   : > { %1818 = vmatmul.mubr.bf16.gmra.mrb[16].mxu0 %v7910_v28  ;;  %2540 = vmatprep.subr.bf16.mxu1 %v6990_v49  ;;  %v6960_v49 = vld [vmem:[#allocation2 + $0x154] ss:$40 sps:$4 sm:$0xff]  }
  0xb4   : > { %1827 = vmatprep.mubr.bf16.mxu0 %v7916_v30 }
  0xb5   : > { %2466 = vmatmul.mubr.bf16.gmra.mrb[36].mxu1 %v7867_v62  ;;  %v6887_v62 = vld [vmem:[#allocation2 + $0x19c] ss:$40 sps:$4 sm:$0xff]  }
  0xb6   : > { %2475 = vmatprep.mubr.bf16.mxu1 %v7870_v2  ;;  %2541 = vmatpush1.bf16.msra.mxu1 %v6988_v50  ;;  %v6900_v2 = vld [vmem:[#allocation2 + $0x23c] ss:$40 sps:$4 sm:$0xff]  }
  0xb7   : > { %2542 = vmatprep.subr.bf16.mxu1 %v6996_v51  ;;  %v8028_v50 = vld [vmem:[%s7835_s21 + $0x50] ss:$12 sps:$4 sm:$0xff]  }
  0xb8   : > { %v6958_v51 = vld [vmem:[#allocation2 + $0x150] ss:$40 sps:$4 sm:$0xff]  }
  0xba   : > { %2543 = vmatpush1.bf16.msra.mxu1 %v6994_v52  ;;  %v6963_v52 = vld [vmem:[#allocation2 + $0x1a4] ss:$40 sps:$4 sm:$0xff]  }
  0xbb   : > { %1828 = vmatmul.mubr.bf16.gmra.mrb[20].mxu0 %v7924_v35 }
  0xbc   : > { %1837 = vmatprep.mubr.bf16.mxu0 %v7930_v38 }
  0xbd   : > { %2476 = vmatmul.mubr.bf16.gmra.mrb[40].mxu1 %v7881_v12  ;;  %v6931_v12 = vld [vmem:[#allocation2 + $0x3c8] ss:$40 sps:$4 sm:$0xff]  }
  0xbe   : > { %2485 = vmatprep.mubr.bf16.mxu1 %v7888_v16  ;;  %v6942_v16 = vld [vmem:[#allocation2 + $0x46c] ss:$40 sps:$4 sm:$0xff]  }
  0xc3   : > { %1838 = vmatmul.mubr.bf16.gmra.mrb[24].mxu0 %v7938_v43 }
  0xc4   : > { %1847 = vmatprep.mubr.bf16.mxu0 %v7941_v44 }
  0xc5   : > { %2486 = vmatmul.mubr.bf16.gmra.mrb[44].mxu1 %v7896_v21 }
  0xc6   : > { %2495 = vmatprep.mubr.bf16.mxu1 %v7902_v23 }
  0xcb   : > { %1848 = vmatmul.mubr.bf16.gmra.mrb[28].mxu0 %v7947_v48 }
  0xcc   : > { %1890 = vmatprep.mubr.bf16.mxu0 %v9596_v0 }
  0xcd   : > { %2496 = vmatmul.mubr.bf16.gmra.mrb[48].mxu1 %v7910_v28 }
  0xce   : > { %2505 = vmatprep.mubr.bf16.mxu1 %v7916_v30 }
  0xd3   : > { %6099 = vmatmul.mubr.msk.bf16.vlgmr.msra.gmra.mrb[0].mxu0 %vm1720_vm0, %v7842_v37  ;;  %v6879_v37 = vld [vmem:[#allocation2 + $0x148] ss:$40 sps:$4 sm:$0xff]  }
  0xd4   : > { %1972 = vmatpush1.bf16.msra.mxu0 %v6853_v53  ;;  %1900 = vmatprep.mubr.bf16.mxu0 %v9596_v0  ;;  %v8034_v53 = vld [vmem:[%s7835_s21 + $0x30] ss:$12 sps:$4 sm:$0xff]  }
  0xd5   : > { %1973 = vmatprep.subr.bf16.mxu0 %v6861_v54  ;;  %2506 = vmatmul.mubr.bf16.gmra.mrb[52].mxu1 %v7924_v35  ;;  %v6961_v54 = vld [vmem:[#allocation2 + $0x1a0] ss:$40 sps:$4 sm:$0xff]  }
  0xd6   : > { %2515 = vmatprep.mubr.bf16.mxu1 %v7930_v38 }
  0xd8   : > { %1974 = vmatpush1.bf16.msra.mxu0 %v6859_v55  ;;  %v8038_v55 = vld [vmem:[%s7835_s21 + $0x4c] ss:$12 sps:$4 sm:$0xff]  }
  0xd9   : > { %1975 = vmatprep.subr.bf16.mxu0 %v6868_v57  ;;  %v6966_v57 = vld [vmem:[#allocation2 + $0x1f4] ss:$40 sps:$4 sm:$0xff]  }
  0xdb   : > { %6100 = vmatmul.mubr.msk.bf16.gmra.mrb[4].mxu0 %vm1720_vm0, %v7848_v47  ;;  %v6892_v47 = vld [vmem:[#allocation2 + $0x1e8] ss:$40 sps:$4 sm:$0xff]  }
  0xdc   : > { %1976 = vmatpush1.bf16.msra.mxu0 %v6866_v58  ;;  %1910 = vmatprep.mubr.bf16.mxu0 %v9596_v0  ;;  %v8042_v58 = vld [vmem:[%s7835_s21 + $0x68] ss:$12 sps:$4 sm:$0xff]  }
  0xdd   : > { %1977 = vmatprep.subr.bf16.mxu0 %v6874_v59  ;;  %2516 = vmatmul.mubr.bf16.gmra.mrb[56].mxu1 %v7938_v43  ;;  %v6964_v59 = vld [vmem:[#allocation2 + $0x1f0] ss:$40 sps:$4 sm:$0xff]  }
  0xde   : > { %2525 = vmatprep.mubr.bf16.mxu1 %v7941_v44 }
  0xe0   : > { %1978 = vmatpush1.bf16.msra.mxu0 %v6872_v60  ;;  %v6969_v60 = vld [vmem:[#allocation2 + $0x244] ss:$40 sps:$4 sm:$0xff]  }
  0xe1   : > { %1979 = vmatprep.subr.bf16.mxu0 %v6881_v61  ;;  %v6967_v61 = vld [vmem:[#allocation2 + $0x240] ss:$40 sps:$4 sm:$0xff]  }
  0xe3   : > { %6101 = vmatmul.mubr.msk.bf16.gmra.mrb[8].mxu0 %vm1720_vm0, %v7857_v56  ;;  %v6905_v56 = vld [vmem:[#allocation2 + $0x288] ss:$40 sps:$4 sm:$0xff]  }
  0xe4   : > { %1980 = vmatpush1.bf16.msra.mxu0 %v6879_v37  ;;  %1920 = vmatprep.mubr.bf16.mxu0 %v9596_v0  ;;  %v6972_v37 = vld [vmem:[#allocation2 + $0x294] ss:$40 sps:$4 sm:$0xff]  }
  0xe5   : > { %1981 = vmatprep.subr.bf16.mxu0 %v6887_v62  ;;  %2526 = vmatmul.mubr.bf16.gmra.mrb[60].mxu1 %v7947_v48  ;;  %v6970_v62 = vld [vmem:[#allocation2 + $0x290] ss:$40 sps:$4 sm:$0xff]  }
  0xe6   : > { %2568 = vmatprep.mubr.bf16.mxu1 %v9596_v0 }
  0xe8   : > { %1982 = vmatpush1.bf16.msra.mxu0 %v6885_v63  ;;  %v6975_v63 = vld [vmem:[#allocation2 + $0x2e4] ss:$40 sps:$4 sm:$0xff]  }
  0xe9   : > { %1983 = vmatprep.subr.bf16.mxu0 %v6894_v1  ;;  %v6973_v1 = vld [vmem:[#allocation2 + $0x2e0] ss:$40 sps:$4 sm:$0xff]  }
  0xeb   : > { %6102 = vmatmul.mubr.msk.bf16.gmra.mrb[12].mxu0 %vm1720_vm0, %v7874_v4  ;;  %v6918_v4 = vld [vmem:[#allocation2 + $0x328] ss:$40 sps:$4 sm:$0xff]  }
  0xec   : > { %1984 = vmatpush1.bf16.msra.mxu0 %v6892_v47  ;;  %1930 = vmatprep.mubr.bf16.mxu0 %v9596_v0  ;;  %v6985_v47 = vld [vmem:[#allocation2 + $0x380] ss:$40 sps:$4 sm:$0xff]  }
  0xed   : > { %1985 = vmatprep.subr.bf16.mxu0 %v6900_v2  ;;  %6123 = vmatmul.mubr.msk.bf16.vlgmr.msra.gmra.mrb[32].mxu1 %vm1720_vm0, %v7988_v17  ;;  %v6997_v2 = vld [vmem:[#allocation2 + $0x420] ss:$40 sps:$4 sm:$0xff]  }
  0xee   : > { %2578 = vmatprep.mubr.bf16.mxu1 %v9596_v0 }
  0xf0   : > { %1986 = vmatpush1.bf16.msra.mxu0 %v6898_v3  ;;  %v7000_v3 = vld [vmem:[#allocation2 + $0x470] ss:$40 sps:$4 sm:$0xff]  }
  0xf1   : > { %1987 = vmatprep.subr.bf16.mxu0 %v6907_v5  ;;  %v7008_v5 = vld [vmem:[#allocation2 + $0x514] ss:$40 sps:$4 sm:$0xff]  }
  0xf3   : > { %6103 = vmatmul.mubr.msk.bf16.gmra.mrb[16].mxu0 %vm1720_vm0, %v7885_v15  ;;  %v6937_v15 = vld [vmem:[#allocation2 + $0x418] ss:$40 sps:$4 sm:$0xff]  }
  0xf4   : > { %1988 = vmatpush1.bf16.msra.mxu0 %v6905_v56  ;;  %1940 = vmatprep.mubr.bf16.mxu0 %v9596_v0  ;;  %v7011_v56 = vld [vmem:[#allocation2 + $0x564] ss:$40 sps:$4 sm:$0xff]  }
  0xf5   : > { %1989 = vmatprep.subr.bf16.mxu0 %v6913_v6  ;;  %6124 = vmatmul.mubr.msk.bf16.gmra.mrb[36].mxu1 %vm1720_vm0, %v8000_v26  ;;  %v7014_v6 = vld [vmem:[#allocation2 + $0x5b4] ss:$40 sps:$4 sm:$0xff]  }
  0xf6   : > { %2588 = vmatprep.mubr.bf16.mxu1 %v9596_v0 }
  0xf8   : > { %1990 = vmatpush1.bf16.msra.mxu0 %v6911_v7  ;;  %v7017_v7 = vld [vmem:[#allocation2 + $0x604] ss:$40 sps:$4 sm:$0xff]  }
  0xf9   : > { %1991 = vmatprep.subr.bf16.mxu0 %v6920_v8  ;;  %v7015_v8 = vld [vmem:[#allocation2 + $0x600] ss:$40 sps:$4 sm:$0xff]  }
  0xfb   : > { %6104 = vmatmul.mubr.msk.bf16.gmra.mrb[20].mxu0 %vm1720_vm0, %v7899_v22 }
  0xfc   : > { %1992 = vmatpush1.bf16.msra.mxu0 %v6918_v4  ;;  %1950 = vmatprep.mubr.bf16.mxu0 %v9596_v0  ;;  %v7020_v4 = vld [vmem:[#allocation2 + $0x24] ss:$40 sps:$4 sm:$0xff]  }
  0xfd   : > { %1993 = vmatprep.subr.bf16.mxu0 %v6926_v9  ;;  %6125 = vmatmul.mubr.msk.bf16.gmra.mrb[40].mxu1 %vm1720_vm0, %v8014_v40  ;;  %v7068_v9 = vld [vmem:[#allocation5 + $0x4] ss:$8 sps:$4 sm:$0xff]  }
  0xfe   : > { %2598 = vmatprep.mubr.bf16.mxu1 %v9596_v0  ;;  %5384 = vmatprep.subr.bf16.mxu1 %v7068_v9 }
 0x100   : > { %1994 = vmatpush1.bf16.msra.mxu0 %v6924_v10  ;;  %v7066_v10 = vld [vmem:[#allocation5] ss:$8 sps:$4 sm:$0xff]  }
 0x101   : > { %1995 = vmatprep.subr.bf16.mxu0 %v6933_v11  ;;  %5385 = vmatpush1.bf16.msra.mxu1 %v7066_v10  ;;  %v7074_v11 = vld [vmem:[#allocation5 + $0x14] ss:$8 sps:$4 sm:$0xff]   ;;  %v7024_v10 = vld [vmem:[#allocation2 + $0xc0] ss:$40 sps:$4 sm:$0xff]  }
 0x102   : > { %5386 = vmatprep.subr.bf16.mxu1 %v7074_v11 }
 0x103   : > { %6105 = vmatmul.mubr.msk.bf16.gmra.mrb[24].mxu0 %vm1720_vm0, %v7913_v29 }
 0x104   : > { %1996 = vmatpush1.bf16.msra.mxu0 %v6931_v12  ;;  %1960 = vmatprep.mubr.bf16.mxu0 %v9596_v0  ;;  %v7072_v12 = vld [vmem:[#allocation5 + $0x10] ss:$8 sps:$4 sm:$0xff]  }
 0x105   : > { %1997 = vmatprep.subr.bf16.mxu0 %v6939_v13  ;;  %6126 = vmatmul.mubr.msk.bf16.gmra.mrb[44].mxu1 %vm1720_vm0, %v8028_v50  ;;  %v7077_v13 = vld [vmem:[#allocation5 + $0x24] ss:$8 sps:$4 sm:$0xff]  }
 0x106   : > { %2608 = vmatprep.mubr.bf16.mxu1 %v9596_v0  ;;  %5387 = vmatpush1.bf16.msra.mxu1 %v7072_v12  ;;  %v550_v12 = vlaneseq }
 0x107   : > { %5388 = vmatprep.subr.bf16.mxu1 %v7077_v13  ;;  %v7119_v13 = vld [vmem:[#allocation5 + $0xd4] ss:$8 sps:$4 sm:$0xff]  }
 0x108   : > { %1998 = vmatpush1.bf16.msra.mxu0 %v6937_v15  ;;  %v7075_v15 = vld [vmem:[#allocation5 + $0x20] ss:$8 sps:$4 sm:$0xff]  }
 0x109   : > { %1999 = vmatprep.subr.bf16.mxu0 %v6942_v16  ;;  %v7080_v16 = vld [vmem:[#allocation5 + $0x34] ss:$8 sps:$4 sm:$0xff]  }
 0x10a   : > { %5389 = vmatpush1.bf16.msra.mxu1 %v7075_v15  ;;  %v7117_v15 = vld [vmem:[#allocation5 + $0xd0] ss:$8 sps:$4 sm:$0xff]  }
 0x10b   : > { %6106 = vmatmul.mubr.msk.bf16.gmra.mrb[28].mxu0 %vm1720_vm0, %v7927_v36  ;;  %5390 = vmatprep.subr.bf16.mxu1 %v7080_v16  ;;  %v7027_v16 = vld [vmem:[#allocation2 + $0x110] ss:$40 sps:$4 sm:$0xff]  }
 0x10c   : > { %2000 = vmatpush1.bf16.msra.mxu0 %v6940_v18  ;;  %2003 = vmatprep.mubr.bf16.mxu0 %v7996_v25  ;;  %v8072_v18 = vld [vmem:[%s7835_s21 + $0x48] ss:$12 sps:$4 sm:$0xff]  }
 0x10d   : > { %2001 = vmatprep.subr.bf16.mxu0 %v6945_v19  ;;  %6127 = vmatmul.mubr.msk.bf16.gmra.mrb[48].mxu1 %vm1720_vm0, %v8042_v58  ;;  %v7078_v19 = vld [vmem:[#allocation5 + $0x30] ss:$8 sps:$4 sm:$0xff]  }
 0x10e   : > { %2618 = vmatprep.mubr.bf16.mxu1 %v9596_v0  ;;  %5391 = vmatpush1.bf16.msra.mxu1 %v7078_v19  ;;  %v7032_v19 = vld [vmem:[#allocation2 + $0x164] ss:$40 sps:$4 sm:$0xff]  }
 0x110   : > { %2002 = vmatpush1.bf16.msra.mxu0 %v6943_v20  ;;  %v8076_v20 = vld [vmem:[%s7835_s21 + $0x64] ss:$12 sps:$4 sm:$0xff]  }
 0x111   : > { %2197 = vmatprep.subr.bf16.mxu0 %v6948_v24  ;;  %v7083_v24 = vld [vmem:[#allocation5 + $0x44] ss:$8 sps:$4 sm:$0xff]  }
 0x112   : > { %5392 = vmatprep.subr.bf16.mxu1 %v7083_v24  ;;  %v8131_v24 = vshrl.u32 %v550_v12, 7 }
 0x113   : > { %2004 = vmatmul.mubr.bf16.vlgmr.msra.gmra.mrb[32].mxu0 %v8006_v32 }
 0x114   : > { %2198 = vmatpush1.bf16.msra.mxu0 %v6946_v27  ;;  %2013 = vmatprep.mubr.bf16.mxu0 %v8010_v34  ;;  %v7081_v27 = vld [vmem:[#allocation5 + $0x40] ss:$8 sps:$4 sm:$0xff]   ;;  %9614 = vst [vmem:[#allocation12_spill] sm:$0xff] %v8131_v24 }
 0x115   : > { %2199 = vmatprep.subr.bf16.mxu0 %v6951_v31  ;;  %6128 = vmatmul.mubr.msk.bf16.gmra.mrb[52].mxu1 %vm1720_vm0, %v7899_v22  ;;  %v6979_v22 = vld [vmem:[#allocation2 + $0x330] ss:$40 sps:$4 sm:$0xff]   ;;  %v7089_v31 = vld [vmem:[#allocation5 + $0x54] ss:$8 sps:$4 sm:$0xff]  }
 0x116   : > { %2628 = vmatprep.mubr.bf16.mxu1 %v9596_v0  ;;  %5393 = vmatpush1.bf16.msra.mxu1 %v7081_v27 }
 0x117   : > { %5394 = vmatprep.subr.bf16.mxu1 %v7089_v31  ;;  %v7122_v31 = vld [vmem:[#allocation5 + $0xe4] ss:$8 sps:$4 sm:$0xff]  }
 0x118   : > { %2200 = vmatpush1.bf16.msra.mxu0 %v6949_v33  ;;  %v8080_v33 = vld [vmem:[%s7835_s21 + $0x60] ss:$12 sps:$4 sm:$0xff]  }
 0x119   : > { %2201 = vmatprep.subr.bf16.mxu0 %v6954_v39  ;;  %v7087_v39 = vld [vmem:[#allocation5 + $0x50] ss:$8 sps:$4 sm:$0xff]  }
 0x11a   : > { %5395 = vmatpush1.bf16.msra.mxu1 %v7087_v39 }
 0x11b   : > { %2014 = vmatmul.mubr.bf16.gmra.mrb[36].mxu0 %v8020_v45 }
 0x11c   : > { %2202 = vmatpush1.bf16.msra.mxu0 %v6952_v41  ;;  %2023 = vmatprep.mubr.bf16.mxu0 %v8024_v14  ;;  %v8084_v41 = vld [vmem:[%s7835_s21 + $0x7c] ss:$12 sps:$4 sm:$0xff]  }
 0x11d   : > { %2203 = vmatprep.subr.bf16.mxu0 %v6957_v42  ;;  %6129 = vmatmul.mubr.msk.bf16.gmra.mrb[56].mxu1 %vm1720_vm0, %v7913_v29  ;;  %v6999_v29 = vld [vmem:[#allocation2 + $0x424] ss:$40 sps:$4 sm:$0xff]  }
 0x11e   : > { %2638 = vmatprep.mubr.bf16.mxu1 %v9596_v0 }
 0x120   : > { %2204 = vmatpush1.bf16.msra.mxu0 %v6955_v46  ;;  %v7092_v46 = vld [vmem:[#allocation5 + $0x64] ss:$8 sps:$4 sm:$0xff]  }
 0x121   : > { %2205 = vmatprep.subr.bf16.mxu0 %v6960_v49  ;;  %5396 = vmatprep.subr.bf16.mxu1 %v7092_v46  ;;  %v7120_v46 = vld [vmem:[#allocation5 + $0xe0] ss:$8 sps:$4 sm:$0xff]  }
 0x123   : > { %2024 = vmatmul.mubr.bf16.gmra.mrb[40].mxu0 %v8034_v53 }
 0x124   : > { %2206 = vmatpush1.bf16.msra.mxu0 %v6958_v51  ;;  %2033 = vmatprep.mubr.bf16.mxu0 %v8038_v55  ;;  %v7090_v51 = vld [vmem:[#allocation5 + $0x60] ss:$8 sps:$4 sm:$0xff]  }
 0x125   : > { %2207 = vmatprep.subr.bf16.mxu0 %v6963_v52  ;;  %6130 = vmatmul.mubr.msk.bf16.gmra.mrb[60].mxu1 %vm1720_vm0, %v7927_v36  ;;  %v7003_v36 = vld [vmem:[#allocation2 + $0x4c0] ss:$40 sps:$4 sm:$0xff]  }
 0x126   : > { %5397 = vmatpush1.bf16.msra.mxu1 %v7090_v51 }
 0x128   : > { %2208 = vmatpush1.bf16.msra.mxu0 %v6961_v54  ;;  %v7095_v54 = vld [vmem:[#allocation5 + $0x74] ss:$8 sps:$4 sm:$0xff]  }
 0x129   : > { %2209 = vmatprep.subr.bf16.mxu0 %v6966_v57  ;;  %v7093_v57 = vld [vmem:[#allocation5 + $0x70] ss:$8 sps:$4 sm:$0xff]   ;;  %5398 = vmatprep.subr.bf16.mxu1 %v7095_v54 }
 0x12a   : > { %5399 = vmatpush1.bf16.msra.mxu1 %v7093_v57  ;;  %v7035_v57 = vld [vmem:[#allocation2 + $0x1b4] ss:$40 sps:$4 sm:$0xff]  }
 0x12b   : > { %2034 = vmatmul.mubr.bf16.gmra.mrb[44].mxu0 %v7896_v21  ;;  %v6981_v21 = vld [vmem:[#allocation2 + $0x334] ss:$40 sps:$4 sm:$0xff]  }
 0x12c   : > { %2210 = vmatpush1.bf16.msra.mxu0 %v6964_v59  ;;  %2043 = vmatprep.mubr.bf16.mxu0 %v7902_v23  ;;  %v6987_v23 = vld [vmem:[#allocation2 + $0x384] ss:$40 sps:$4 sm:$0xff]   ;;  %v7511_v59 = vld [vmem:[%s7835_s21 + $0x94] ss:$12 sps:$4 sm:$0xff]  }
 0x12d   : > { %2211 = vmatprep.subr.bf16.mxu0 %v6969_v60 }
 0x130   : > { %2212 = vmatpush1.bf16.msra.mxu0 %v6967_v61  ;;  %v7098_v61 = vld [vmem:[#allocation5 + $0x84] ss:$8 sps:$4 sm:$0xff]  }
 0x131   : > { %2213 = vmatprep.subr.bf16.mxu0 %v6972_v37  ;;  %5400 = vmatprep.subr.bf16.mxu1 %v7098_v61  ;;  %v8147_v61 = vld [vmem:[%s9587_s2] sm:$0xff] }
 0x133   : > { %2044 = vmatmul.mubr.bf16.gmra.mrb[48].mxu0 %v7910_v28  ;;  %v6993_v28 = vld [vmem:[#allocation2 + $0x3d4] ss:$40 sps:$4 sm:$0xff]  }
 0x134   : > { %2214 = vmatpush1.bf16.msra.mxu0 %v6970_v62  ;;  %2053 = vmatprep.mubr.bf16.mxu0 %v7916_v30  ;;  %v6991_v30 = vld [vmem:[#allocation2 + $0x3d0] ss:$40 sps:$4 sm:$0xff]   ;;  %v7096_v62 = vld [vmem:[#allocation5 + $0x80] ss:$8 sps:$4 sm:$0xff]  }
 0x135   : > { %2215 = vmatprep.subr.bf16.mxu0 %v6975_v63  ;;  %5401 = vmatpush1.bf16.msra.mxu1 %v7096_v62  ;;  %v8150_v62 = vsub.s32 1, %v8131_v24 }
 0x137   : > { %9620 = vst [vmem:[#allocation18_spill] sm:$0xff] %v8150_v62 }
 0x138   : > { %2216 = vmatpush1.bf16.msra.mxu0 %v6973_v1 }
 0x139   : > { %2217 = vmatprep.subr.bf16.mxu0 %v6981_v21  ;;  %v7104_v21 = vld [vmem:[#allocation5 + $0x94] ss:$8 sps:$4 sm:$0xff]  }
 0x13a   : > { %5402 = vmatprep.subr.bf16.mxu1 %v7104_v21  ;;  %v7123_v21 = vld [vmem:[#allocation5 + $0xf0] ss:$8 sps:$4 sm:$0xff]  }
 0x13b   : > { %2054 = vmatmul.mubr.bf16.gmra.mrb[52].mxu0 %v7924_v35  ;;  %v7002_v35 = vld [vmem:[#allocation2 + $0x474] ss:$40 sps:$4 sm:$0xff]  }
 0x13c   : > { %2218 = vmatpush1.bf16.msra.mxu0 %v6979_v22  ;;  %2063 = vmatprep.mubr.bf16.mxu0 %v7930_v38  ;;  %v7005_v38 = vld [vmem:[#allocation2 + $0x4c4] ss:$40 sps:$4 sm:$0xff]   ;;  %v7512_v22 = vld [vmem:[%s7835_s21 + $0x90] ss:$12 sps:$4 sm:$0xff]  }
 0x13d   : > { %2219 = vmatprep.subr.bf16.mxu0 %v6987_v23  ;;  %v7102_v23 = vld [vmem:[#allocation5 + $0x90] ss:$8 sps:$4 sm:$0xff]  }
 0x13e   : > { %v8087_v42 = vpop.f32.mrb[0].mxu1  ;;  %5403 = vmatpush1.bf16.msra.mxu1 %v7102_v23 }
 0x13f   : > { %v8089_v49 = vpop.f32.mrb[1].mxu1 }
 0x140   : > { %2220 = vmatpush1.bf16.msra.mxu0 %v6985_v47  ;;  %v8091_v52 = vpop.f32.mrb[2].mxu1  ;;  %v7513_v47 = vld [vmem:[%s7835_s21 + $0xac] ss:$12 sps:$4 sm:$0xff]  }
 0x141   : > { %2221 = vmatprep.subr.bf16.mxu0 %v6993_v28 }
 0x143   : > { %2064 = vmatmul.mubr.bf16.gmra.mrb[56].mxu0 %v7938_v43  ;;  %v7006_v43 = vld [vmem:[#allocation2 + $0x510] ss:$40 sps:$4 sm:$0xff]  }
 0x144   : > { %2222 = vmatpush1.bf16.msra.mxu0 %v6991_v30  ;;  %2073 = vmatprep.mubr.bf16.mxu0 %v7941_v44  ;;  %v7009_v44 = vld [vmem:[#allocation2 + $0x560] ss:$40 sps:$4 sm:$0xff]  }
 0x145   : > { %2223 = vmatprep.subr.bf16.mxu0 %v6999_v29 }
 0x148   : > { %2224 = vmatpush1.bf16.msra.mxu0 %v6997_v2  ;;  %v7107_v2 = vld [vmem:[#allocation5 + $0xa4] ss:$8 sps:$4 sm:$0xff]  }
 0x149   : > { %2225 = vmatprep.subr.bf16.mxu0 %v7002_v35  ;;  %v7105_v35 = vld [vmem:[#allocation5 + $0xa0] ss:$8 sps:$4 sm:$0xff]   ;;  %5404 = vmatprep.subr.bf16.mxu1 %v7107_v2 }
 0x14a   : > { %5405 = vmatpush1.bf16.msra.mxu1 %v7105_v35 }
 0x14b   : > { %2074 = vmatmul.mubr.bf16.gmra.mrb[60].mxu0 %v7947_v48  ;;  %v7012_v48 = vld [vmem:[#allocation2 + $0x5b0] ss:$40 sps:$4 sm:$0xff]  }
 0x14c   : > { %2226 = vmatpush1.bf16.msra.mxu0 %v7000_v3  ;;  %2229 = vmatprep.mubr.bf16.mxu0 %v7996_v25  ;;  %v7514_v3 = vld [vmem:[%s7835_s21 + $0xa8] ss:$12 sps:$4 sm:$0xff]  }
 0x14d   : > { %2227 = vmatprep.subr.bf16.mxu0 %v7005_v38 }
 0x150   : > { %2228 = vmatpush1.bf16.msra.mxu0 %v7003_v36  ;;  %v7018_v36 = vld [vmem:[#allocation2 + $0x20] ss:$40 sps:$4 sm:$0xff]  }
 0x151   : > { %2310 = vmatprep.subr.bf16.mxu0 %v7008_v5  ;;  %v7110_v5 = vld [vmem:[#allocation5 + $0xb4] ss:$8 sps:$4 sm:$0xff]  }
 0x152   : > { %5406 = vmatprep.subr.bf16.mxu1 %v7110_v5 }
 0x153   : > { %2230 = vmatmul.mubr.bf16.vlgmr.msra.gmra.mrb[64].mxu0 %v8006_v32 }
 0x154   : > { %2311 = vmatpush1.bf16.msra.mxu0 %v7006_v43  ;;  %2239 = vmatprep.mubr.bf16.mxu0 %v8010_v34  ;;  %v7023_v43 = vld [vmem:[#allocation2 + $0x74] ss:$40 sps:$4 sm:$0xff]  }
 0x155   : > { %2312 = vmatprep.subr.bf16.mxu0 %v7011_v56  ;;  %v7108_v56 = vld [vmem:[#allocation5 + $0xb0] ss:$8 sps:$4 sm:$0xff]  }
 0x156   : > { %5407 = vmatpush1.bf16.msra.mxu1 %v7108_v56 }
 0x158   : > { %2313 = vmatpush1.bf16.msra.mxu0 %v7009_v44  ;;  %v7021_v44 = vld [vmem:[#allocation2 + $0x70] ss:$40 sps:$4 sm:$0xff]  }
 0x159   : > { %2314 = vmatprep.subr.bf16.mxu0 %v7014_v6  ;;  %v7026_v6 = vld [vmem:[#allocation2 + $0xc4] ss:$40 sps:$4 sm:$0xff]  }
 0x15b   : > { %2240 = vmatmul.mubr.bf16.gmra.mrb[68].mxu0 %v8020_v45 }
 0x15c   : > { %2249 = vmatprep.mubr.bf16.mxu0 %v8024_v14  ;;  %2315 = vmatpush1.bf16.msra.mxu0 %v7012_v48 }
 0x15d   : > { %2316 = vmatprep.subr.bf16.mxu0 %v7017_v7  ;;  %v7113_v7 = vld [vmem:[#allocation5 + $0xc4] ss:$8 sps:$4 sm:$0xff]  }
 0x15e   : > { %5408 = vmatprep.subr.bf16.mxu1 %v7113_v7  ;;  %v7041_v7 = vld [vmem:[#allocation2 + $0x254] ss:$40 sps:$4 sm:$0xff]  }
 0x160   : > { %2317 = vmatpush1.bf16.msra.mxu0 %v7015_v8 }
 0x161   : > { %2649 = vmatprep.subr.bf16.mxu0 %v7020_v4  ;;  %v7111_v4 = vld [vmem:[#allocation5 + $0xc0] ss:$8 sps:$4 sm:$0xff]  }
 0x162   : > { %5409 = vmatpush1.bf16.msra.mxu1 %v7111_v4 }
 0x163   : > { %2250 = vmatmul.mubr.bf16.gmra.mrb[72].mxu0 %v8034_v53  ;;  %v8093_v53 = vpop.f32.mrb[3].mxu1  ;;  %5410 = vmatprep.subr.bf16.mxu1 %v7119_v13  ;;  %v7039_v13 = vld [vmem:[#allocation2 + $0x250] ss:$40 sps:$4 sm:$0xff]  }
 0x164   : > { %2259 = vmatprep.mubr.bf16.mxu0 %v8038_v55  ;;  %v7510_v55 = vld [vmem:[%s7835_s21 + $0x78] ss:$12 sps:$4 sm:$0xff]   ;;  %v8097_v60 = vpop.f32.mrb[4].mxu1 }
 0x165   : > { %v8099_v37 = vpop.f32.mrb[5].mxu1 }
 0x166   : > { %v8101_v63 = vpop.f32.mrb[6].mxu1  ;;  %5411 = vmatpush1.bf16.msra.mxu1 %v7117_v15 }
 0x167   : > { %v8103_v1 = vpop.f32.mrb[7].mxu1  ;;  %5412 = vmatprep.subr.bf16.mxu1 %v7122_v31 }
 0x168   : > { %v8107_v28 = vpop.f32.mrb[8].mxu1 }
 0x169   : > { %v8109_v30 = vpop.f32.mrb[9].mxu1 }
 0x16a   : > { %v8111_v29 = vpop.f32.mrb[10].mxu1  ;;  %5413 = vmatpush1.bf16.msra.mxu1 %v7120_v46 }
 0x16b   : > { %2260 = vmatmul.mubr.bf16.gmra.mrb[76].mxu0 %v8072_v18  ;;  %v8114_v38 = vpop.f32.mrb[11].mxu1 }
 0x16c   : > { %2269 = vmatprep.mubr.bf16.mxu0 %v8076_v20  ;;  %v8120_v48 = vpop.f32.mrb[12].mxu1 }
 0x16d   : > { %v8122_v8 = vpop.f32.mrb[13].mxu1 }
 0x16e   : > { %v8124_v9 = vpop.f32.mrb[14].mxu1 }
 0x16f   : > { %v8126_v11 = vpop.f32.mrb[15].mxu1 }
 0x170   : > { %v8133_v27 = vpop.f32.mrb[16].mxu1 }
 0x171   : > { %9615 = vst [vmem:[#allocation13_spill] sm:$0xff] %v8133_v27  ;;  %v8135_v39 = vpop.f32.mrb[17].mxu1 }
 0x172   : > { %9616 = vst [vmem:[#allocation14_spill] sm:$0xff] %v8135_v39  ;;  %v8137_v51 = vpop.f32.mrb[18].mxu1  ;;  %v7063_v39 = vld [vmem:[#allocation2 + $0x4d0] ss:$40 sps:$4 sm:$0xff]  }
 0x173   : > { %2270 = vmatmul.mubr.bf16.gmra.mrb[80].mxu0 %v8080_v33  ;;  %9617 = vst [vmem:[#allocation15_spill] sm:$0xff] %v8137_v51  ;;  %v8139_v54 = vpop.f32.mrb[19].mxu1 }
 0x174   : > { %2279 = vmatprep.mubr.bf16.mxu0 %v8084_v41  ;;  %9618 = vst [vmem:[#allocation16_spill] sm:$0xff] %v8139_v54  ;;  %v8159_v2 = vpop.f32.mrb[20].mxu1  ;;  %v7517_v54 = vld [vmem:[%s7835_s21 + $0xb0] ss:$12 sps:$4 sm:$0xff]  }
 0x175   : > { %9621 = vst [vmem:[#allocation19_spill] sm:$0xff] %v8159_v2 }
 0x17b   : > { %2280 = vmatmul.mubr.bf16.gmra.mrb[84].mxu0 %v7510_v55  ;;  %v8142_v55 = vsub.s32 0, %v8131_v24 }
 0x17c   : > { %2289 = vmatprep.mubr.bf16.mxu0 %v7511_v59  ;;  %v7125_v59 = vld [vmem:[#allocation5 + $0xf4] ss:$8 sps:$4 sm:$0xff]  }
 0x17d   : > { %9619 = vst [vmem:[#allocation17_spill] sm:$0xff] %v8142_v55  ;;  %5414 = vmatprep.subr.bf16.mxu1 %v7125_v59  ;;  %v8157_v23 = vrot.slane %v8147_v61, %v8142_v55  ;;  %v9623_v55 = vmov 0  }
 0x17e   : > { %5415 = vmatpush1.bf16.msra.mxu1 %v7123_v21 }
 0x183   : > { %2290 = vmatmul.mubr.bf16.gmra.mrb[88].mxu0 %v7512_v22  ;;  %v7033_v22 = vld [vmem:[#allocation2 + $0x1b0] ss:$40 sps:$4 sm:$0xff]  }
 0x184   : > { %2299 = vmatprep.mubr.bf16.mxu0 %v7513_v47  ;;  %v7038_v47 = vld [vmem:[#allocation2 + $0x204] ss:$40 sps:$4 sm:$0xff]  }
 0x18b   : > { %2300 = vmatmul.mubr.bf16.gmra.mrb[92].mxu0 %v7514_v3  ;;  %v8163_v3 = vrot.slane %v8147_v61, %v8150_v62 }
 0x18c   : > { %2342 = vmatprep.mubr.bf16.mxu0 %v9596_v0 }
 0x193   : > { %6115 = vmatmul.mubr.msk.bf16.vlgmr.msra.gmra.mrb[64].mxu0 %vm1720_vm0, %v7988_v17  ;;  %v7029_v17 = vld [vmem:[#allocation2 + $0x114] ss:$40 sps:$4 sm:$0xff]  }
 0x194   : > { %2650 = vmatpush1.bf16.msra.mxu0 %v7018_v36  ;;  %2352 = vmatprep.mubr.bf16.mxu0 %v9596_v0 }
 0x195   : > { %2651 = vmatprep.subr.bf16.mxu0 %v7023_v43  ;;  %v7036_v43 = vld [vmem:[#allocation2 + $0x200] ss:$40 sps:$4 sm:$0xff]  }
 0x198   : > { %2652 = vmatpush1.bf16.msra.mxu0 %v7021_v44 }
 0x199   : > { %2653 = vmatprep.subr.bf16.mxu0 %v7026_v6 }
 0x19b   : > { %6116 = vmatmul.mubr.msk.bf16.gmra.mrb[68].mxu0 %vm1720_vm0, %v8000_v26  ;;  %v7030_v26 = vld [vmem:[#allocation2 + $0x160] ss:$40 sps:$4 sm:$0xff]  }
 0x19c   : > { %2654 = vmatpush1.bf16.msra.mxu0 %v7024_v10  ;;  %2362 = vmatprep.mubr.bf16.mxu0 %v9596_v0 }
 0x19d   : > { %2655 = vmatprep.subr.bf16.mxu0 %v7029_v17 }
 0x1a0   : > { %2656 = vmatpush1.bf16.msra.mxu0 %v7027_v16  ;;  %v7044_v16 = vld [vmem:[#allocation2 + $0x2a4] ss:$40 sps:$4 sm:$0xff]  }
 0x1a1   : > { %2657 = vmatprep.subr.bf16.mxu0 %v7032_v19 }
 0x1a3   : > { %6117 = vmatmul.mubr.msk.bf16.gmra.mrb[72].mxu0 %vm1720_vm0, %v8014_v40  ;;  %v8165_v40 = vpop.f32.mrb[21].mxu1 }
 0x1a4   : > { %2658 = vmatpush1.bf16.msra.mxu0 %v7030_v26  ;;  %2372 = vmatprep.mubr.bf16.mxu0 %v9596_v0  ;;  %9622 = vst [vmem:[#allocation20_spill] sm:$0xff] %v8165_v40 }
 0x1a5   : > { %2659 = vmatprep.subr.bf16.mxu0 %v7035_v57  ;;  %v7042_v57 = vld [vmem:[#allocation2 + $0x2a0] ss:$40 sps:$4 sm:$0xff]  }
 0x1a6   : > { %v1892_v35 = vpop.f32.mrb[0].mxu0 }
 0x1a7   : > { %v1894_v36 = vpop.f32.mrb[1].mxu0  ;;  %v6342_v56 = vadd.f32 %v1892_v35, %v8157_v23 }
 0x1a8   : > { %v1896_v5 = vpop.f32.mrb[2].mxu0  ;;  %2660 = vmatpush1.bf16.msra.mxu0 %v7033_v22  ;;  %v6343_v4 = vadd.f32 %v1894_v36, %v8163_v3  ;;  %v7047_v22 = vld [vmem:[#allocation2 + $0x2f4] ss:$40 sps:$4 sm:$0xff]  }
 0x1a9   : > { %v6344_v44 = vadd.f32 %v1896_v5, %v8157_v23  ;;  %v1898_v6 = vpop.f32.mrb[3].mxu0  ;;  %2661 = vmatprep.subr.bf16.mxu0 %v7038_v47 }
 0x1aa   : > { %v6345_v10 = vadd.f32 %v1898_v6, %v8163_v3 }
 0x1ab   : > { %v8171_v17 = vpack.c.bf16 %v6344_v44, %v6342_v56  ;;  %6118 = vmatmul.mubr.msk.bf16.gmra.mrb[76].mxu0 %vm1720_vm0, %v8028_v50  ;;  %v7050_v44 = vld [vmem:[#allocation2 + $0x344] ss:$40 sps:$4 sm:$0xff]  }
 0x1ac   : > { %v8175_v12 = vpack.c.bf16 %v6345_v10, %v6343_v4  ;;  %2662 = vmatpush1.bf16.msra.mxu0 %v7036_v43  ;;  %2382 = vmatprep.mubr.bf16.mxu0 %v9596_v0  ;;  %v7045_v43 = vld [vmem:[#allocation2 + $0x2f0] ss:$40 sps:$4 sm:$0xff]  }
 0x1ad   : > { %v2955_v15 = vmul.bf16 1056980736, %v8171_v17  ;;  %2663 = vmatprep.subr.bf16.mxu0 %v7041_v7 }
 0x1ae   : > { %v2956_v19 = vmul.bf16 1056980736, %v8175_v12  ;;  %v1902_v31 = vpop.f32.mrb[4].mxu0 }
 0x1af   : > { %7334 = vtanh.bf16 %v2955_v15  ;;  %v1904_v46 = vpop.f32.mrb[5].mxu0  ;;  %v6346_v50 = vadd.f32 %v1902_v31, %v8157_v23 }
 0x1b0   : > { %7336 = vtanh.bf16 %v2956_v19  ;;  %v1906_v26 = vpop.f32.mrb[6].mxu0  ;;  %2664 = vmatpush1.bf16.msra.mxu0 %v7039_v13  ;;  %v6347_v47 = vadd.f32 %v1904_v46, %v8163_v3  ;;  %v7053_v19 = vld [vmem:[#allocation2 + $0x394] ss:$40 sps:$4 sm:$0xff]  }
 0x1b1   : > { %v6348_v59 = vadd.f32 %v1906_v26, %v8157_v23  ;;  %v1908_v21 = vpop.f32.mrb[7].mxu0  ;;  %2665 = vmatprep.subr.bf16.mxu0 %v7044_v16 }
 0x1b2   : > { %v6349_v35 = vadd.f32 %v1908_v21, %v8163_v3  ;;  %v7515_v21 = vld [vmem:[%s7835_s21 + $0x80] ss:$12 sps:$4 sm:$0xff]  }
 0x1b3   : > { %v8184_v36 = vpack.c.bf16 %v6348_v59, %v6346_v50  ;;  %6119 = vmatmul.mubr.msk.bf16.gmra.mrb[80].mxu0 %vm1720_vm0, %v8042_v58  ;;  %v7048_v58 = vld [vmem:[#allocation2 + $0x340] ss:$40 sps:$4 sm:$0xff]  }
 0x1b4   : > { %v8188_v5 = vpack.c.bf16 %v6349_v35, %v6347_v47  ;;  %2666 = vmatpush1.bf16.msra.mxu0 %v7042_v57  ;;  %2392 = vmatprep.mubr.bf16.mxu0 %v9596_v0  ;;  %v7051_v35 = vld [vmem:[#allocation2 + $0x390] ss:$40 sps:$4 sm:$0xff]  }
 0x1b5   : > { %v2965_v56 = vmul.bf16 1056980736, %v8184_v36  ;;  %2667 = vmatprep.subr.bf16.mxu0 %v7047_v22 }
 0x1b6   : > { %v2966_v6 = vmul.bf16 1056980736, %v8188_v5  ;;  %v1912_v7 = vpop.f32.mrb[8].mxu0 }
 0x1b7   : > { %7338 = vtanh.bf16 %v2965_v56  ;;  %v1914_v4 = vpop.f32.mrb[9].mxu0  ;;  %v6350_v13 = vadd.f32 %v1912_v7, %v8157_v23 }
 0x1b8   : > { %7340 = vtanh.bf16 %v2966_v6  ;;  %v1916_v10 = vpop.f32.mrb[10].mxu0  ;;  %2668 = vmatpush1.bf16.msra.mxu0 %v7045_v43  ;;  %v6351_v46 = vadd.f32 %v1914_v4, %v8163_v3 }
 0x1b9   : > { %v6352_v15 = vadd.f32 %v1916_v10, %v8157_v23  ;;  %v1918_v16 = vpop.f32.mrb[11].mxu0  ;;  %2669 = vmatprep.subr.bf16.mxu0 %v7050_v44  ;;  %v7056_v44 = vld [vmem:[#allocation2 + $0x3e4] ss:$40 sps:$4 sm:$0xff]  }
 0x1ba   : > { %v7335_v31 = vpop.eup %7334  ;;  %v6353_v26 = vadd.f32 %v1918_v16, %v8163_v3  ;;  %v7054_v16 = vld [vmem:[#allocation2 + $0x3e0] ss:$40 sps:$4 sm:$0xff]  }
 0x1bb   : > { %v7337_v57 = vpop.eup %7336  ;;  %v3115_v50 = vmul.bf16 1056980736, %v7335_v31  ;;  %v8197_v59 = vpack.c.bf16 %v6352_v15, %v6350_v13  ;;  %6120 = vmatmul.mubr.msk.bf16.gmra.mrb[84].mxu0 %vm1720_vm0, %v7515_v21  ;;  %v560_v31 = vsub.s32 2, %v8131_v24 }
 0x1bc   : > { %v3116_v22 = vmul.bf16 1056980736, %v7337_v57  ;;  %v8201_v47 = vpack.c.bf16 %v6353_v26, %v6351_v46  ;;  %2670 = vmatpush1.bf16.msra.mxu0 %v7048_v58  ;;  %2402 = vmatprep.mubr.bf16.mxu0 %v9596_v0 }
 0x1bd   : > { %v3195_v43 = vadd.bf16 1056980736, %v3115_v50  ;;  %v2975_v56 = vmul.bf16 1056980736, %v8197_v59  ;;  %2671 = vmatprep.subr.bf16.mxu0 %v7053_v19 }
 0x1be   : > { %v3196_v6 = vadd.bf16 1056980736, %v3116_v22  ;;  %v2976_v7 = vmul.bf16 1056980736, %v8201_v47  ;;  %v1922_v4 = vpop.f32.mrb[12].mxu0 }
 0x1bf   : > { %v3275_v10 = vmul.bf16 %v3195_v43, %v8171_v17  ;;  %7342 = vtanh.bf16 %v2975_v56  ;;  %v1924_v13 = vpop.f32.mrb[13].mxu0  ;;  %v6354_v26 = vadd.f32 %v1922_v4, %v8157_v23  ;;  %v7059_v17 = vld [vmem:[#allocation2 + $0x434] ss:$40 sps:$4 sm:$0xff]  }
 0x1c0   : > { %v3276_v15 = vmul.bf16 %v3196_v6, %v8175_v12  ;;  %7344 = vtanh.bf16 %v2976_v7  ;;  %v1926_v58 = vpop.f32.mrb[14].mxu0  ;;  %2672 = vmatpush1.bf16.msra.mxu0 %v7051_v35  ;;  %v6355_v12 = vadd.f32 %v1924_v13, %v8163_v3 }
 0x1c1   : > { %v3355_v46 = vunpack.c.l.bf16 %v3275_v10  ;;  %v3365_v19 = vunpack.c.h.bf16 %v3275_v10  ;;  %v6356_v57 = vadd.f32 %v1926_v58, %v8157_v23  ;;  %v1928_v50 = vpop.f32.mrb[15].mxu0  ;;  %2673 = vmatprep.subr.bf16.mxu0 %v7056_v44  ;;  %v7516_v10 = vld [vmem:[%s7835_s21 + $0x98] ss:$12 sps:$4 sm:$0xff]  }
 0x1c2   : > { %v7339_v21 = vpop.eup %7338  ;;  %v3356_v22 = vunpack.c.l.bf16 %v3276_v15  ;;  %v3366_v43 = vunpack.c.h.bf16 %v3276_v15  ;;  %v6357_v35 = vadd.f32 %v1928_v50, %v8163_v3  ;;  %v7057_v44 = vld [vmem:[#allocation2 + $0x430] ss:$40 sps:$4 sm:$0xff]   ;;  %v7062_v15 = vld [vmem:[#allocation2 + $0x484] ss:$40 sps:$4 sm:$0xff]  }
 0x1c3   : > { %v7341_v56 = vpop.eup %7340  ;;  %v3515_v6 = vadd.f32 %v3365_v19, %v3355_v46  ;;  %v3125_v7 = vmul.bf16 1056980736, %v7339_v21  ;;  %v8213_v0 = vpack.c.bf16 %v6356_v57, %v6354_v26  ;;  %6121 = vmatmul.mubr.msk.bf16.gmra.mrb[88].mxu0 %vm1720_vm0, %v7516_v10  ;;  %v8230_v46 = vpop.f32.mrb[22].mxu1 }
 0x1c4   : > { %v3522_v4 = vadd.f32 %v3366_v43, %v3356_v22  ;;  %v3126_v58 = vmul.bf16 1056980736, %v7341_v56  ;;  %v8217_v62 = vpack.c.bf16 %v6357_v35, %v6355_v12  ;;  %2674 = vmatpush1.bf16.msra.mxu0 %v7054_v16  ;;  %2412 = vmatprep.mubr.bf16.mxu0 %v9623_v55  ;;  %v8224_v22 = vrot.slane %v8147_v61, %v560_v31 }
 0x1c5   : > { %v3516_v13 = vrot.slane %v3515_v6, 4  ;;  %v3205_v40 = vadd.bf16 1056980736, %v3125_v7  ;;  %v2985_v50 = vmul.bf16 1056980736, %v8213_v0  ;;  %2675 = vmatprep.subr.bf16.mxu0 %v7059_v17  ;;  %9624 = vst [vmem:[#allocation21_spill] sm:$0xff] %v8230_v46 }
 0x1c6   : > { %v3523_v19 = vrot.slane %v3522_v4, 4  ;;  %v3206_v26 = vadd.bf16 1056980736, %v3126_v58  ;;  %v2986_v57 = vmul.bf16 1056980736, %v8217_v62  ;;  %v1932_v21 = vpop.f32.mrb[16].mxu0 }
 0x1c7   : > { %v3517_v16 = vadd.f32 %v3516_v13, %v3515_v6  ;;  %v3285_v43 = vmul.bf16 %v3205_v40, %v8184_v36  ;;  %7346 = vtanh.bf16 %v2985_v50  ;;  %v6358_v12 = vadd.f32 %v1932_v21, %v8157_v23  ;;  %v1934_v35 = vpop.f32.mrb[17].mxu0  ;;  %v7060_v58 = vld [vmem:[#allocation2 + $0x480] ss:$40 sps:$4 sm:$0xff]   ;;  %v7065_v13 = vld [vmem:[#allocation2 + $0x4d4] ss:$40 sps:$4 sm:$0xff]  }
 0x1c8   : > { %v3524_v56 = vadd.f32 %v3523_v19, %v3522_v4  ;;  %v3286_v17 = vmul.bf16 %v3206_v26, %v8188_v5  ;;  %7348 = vtanh.bf16 %v2986_v57  ;;  %v6359_v7 = vadd.f32 %v1934_v35, %v8163_v3  ;;  %v1936_v10 = vpop.f32.mrb[18].mxu0  ;;  %2676 = vmatpush1.bf16.msra.mxu0 %v7057_v44 }
 0x1c9   : > { %v3518_v31 = vrot.slane %v3517_v16, 2  ;;  %v3375_v2 = vunpack.c.l.bf16 %v3285_v43  ;;  %v3385_v6 = vunpack.c.h.bf16 %v3285_v43  ;;  %v6360_v40 = vadd.f32 %v1936_v10, %v8157_v23  ;;  %v1938_v36 = vpop.f32.mrb[19].mxu0  ;;  %2677 = vmatprep.subr.bf16.mxu0 %v7062_v15 }
 0x1ca   : > { %v7343_v4 = vpop.eup %7342  ;;  %v3525_v50 = vrot.slane %v3524_v56, 2  ;;  %v3376_v5 = vunpack.c.l.bf16 %v3286_v17  ;;  %v3386_v19 = vunpack.c.h.bf16 %v3286_v17  ;;  %v6361_v26 = vadd.f32 %v1938_v36, %v8163_v3  ;;  %v7071_v17 = vld [vmem:[#allocation2 + $0x524] ss:$40 sps:$4 sm:$0xff]  }
 0x1cb   : > { %v7345_v57 = vpop.eup %7344  ;;  %v3519_v44 = vadd.f32 %v3518_v31, %v3517_v16  ;;  %v3585_v21 = vadd.f32 %v3385_v6, %v3375_v2  ;;  %v3135_v35 = vmul.bf16 1056980736, %v7343_v4  ;;  %v8234_v46 = vpack.c.bf16 %v6360_v40, %v6358_v12  ;;  %6122 = vmatmul.mubr.msk.bf16.gmra.mrb[92].mxu0 %vm1720_vm0, %v7517_v54 }
 0x1cc   : > { %v3526_v43 = vadd.f32 %v3525_v50, %v3524_v56  ;;  %v3592_v10 = vadd.f32 %v3386_v19, %v3376_v5  ;;  %v3136_v51 = vmul.bf16 1056980736, %v7345_v57  ;;  %v8238_v15 = vpack.c.bf16 %v6361_v26, %v6359_v7  ;;  %2678 = vmatpush1.bf16.msra.mxu0 %v7060_v58  ;;  %2681 = vmatprep.mubr.bf16.mxu0 %v7996_v25  ;;  %v7069_v19 = vld [vmem:[#allocation2 + $0x520] ss:$40 sps:$4 sm:$0xff]  }
 0x1cd   : > { %v3520_v36 = vrot.slane %v3519_v44, 1  ;;  %v3586_v27 = vrot.slane %v3585_v21, 4  ;;  %v3215_v16 = vadd.bf16 1056980736, %v3135_v35  ;;  %v2995_v2 = vmul.bf16 1056980736, %v8234_v46  ;;  %2679 = vmatprep.subr.bf16.mxu0 %v7065_v13 }
 0x1ce   : > { %v3527_v12 = vrot.slane %v3526_v43, 1  ;;  %v3593_v31 = vrot.slane %v3592_v10, 4  ;;  %v3216_v6 = vadd.bf16 1056980736, %v3136_v51  ;;  %v2996_v54 = vmul.bf16 1056980736, %v8238_v15 }
 0x1cf   : > { %v3521_v56 = vadd.f32 %v3520_v36, %v3519_v44  ;;  %v3587_v40 = vadd.f32 %v3586_v27, %v3585_v21  ;;  %v3295_v7 = vmul.bf16 %v3215_v16, %v8197_v59  ;;  %7350 = vtanh.bf16 %v2995_v2  ;;  %v1942_v58 = vpop.f32.mrb[20].mxu0  ;;  %v7086_v44 = vld [vmem:[#allocation2 + $0x574] ss:$40 sps:$4 sm:$0xff]  }
 0x1d0   : > { %v3528_v4 = vadd.f32 %v3527_v12, %v3526_v43  ;;  %v3594_v25 = vadd.f32 %v3593_v31, %v3592_v10  ;;  %v3296_v50 = vmul.bf16 %v3216_v6, %v8201_v47  ;;  %7352 = vtanh.bf16 %v2996_v54  ;;  %v1944_v5 = vpop.f32.mrb[21].mxu0  ;;  %2680 = vmatpush1.bf16.msra.mxu0 %v7063_v39 }
 0x1d1   : > { %v4075_v13 = vpack.c.bf16 %v3521_v56, %v3521_v56  ;;  %v3588_v26 = vrot.slane %v3587_v40, 2  ;;  %v3395_v57 = vunpack.c.l.bf16 %v3295_v7  ;;  %v3405_v51 = vunpack.c.h.bf16 %v3295_v7  ;;  %v1946_v35 = vpop.f32.mrb[22].mxu0  ;;  %2762 = vmatprep.subr.bf16.mxu0 %v7071_v17  ;;  %v7084_v7 = vld [vmem:[#allocation2 + $0x570] ss:$40 sps:$4 sm:$0xff]  }
 0x1d2   : > { %v7347_v27 = vpop.eup %7346  ;;  %v4076_v21 = vpack.c.bf16 %v3528_v4, %v3528_v4  ;;  %v3595_v59 = vrot.slane %v3594_v25, 2  ;;  %v3396_v36 = vunpack.c.l.bf16 %v3296_v50  ;;  %v3406_v43 = vunpack.c.h.bf16 %v3296_v50  ;;  %v1948_v10 = vpop.f32.mrb[23].mxu0 }
 0x1d3   : > { %v7349_v16 = vpop.eup %7348  ;;  %v3589_v47 = vadd.f32 %v3588_v26, %v3587_v40  ;;  %v3655_v2 = vadd.f32 %v3405_v51, %v3395_v57  ;;  %v3145_v12 = vmul.bf16 1056980736, %v7347_v27  ;;  %2682 = vmatmul.mubr.bf16.vlgmr.msra.gmra.mrb[96].mxu0 %v8006_v32  ;;  %v9625_v39 = vsub.s32 3, %v8131_v24  ;;  %v7101_v32 = vld [vmem:[#allocation2 + $0x5c4] ss:$40 sps:$4 sm:$0xff]  }
 0x1d4   : > { %v4407_v17 = vunpack.c.l.b16 %v4075_v13  ;;  %v3596_v6 = vadd.f32 %v3595_v59, %v3594_v25  ;;  %v3662_v54 = vadd.f32 %v3406_v43, %v3396_v36  ;;  %v3146_v56 = vmul.bf16 1056980736, %v7349_v16  ;;  %2763 = vmatpush1.bf16.msra.mxu0 %v7069_v19  ;;  %2691 = vmatprep.mubr.bf16.mxu0 %v8010_v34 }
 0x1d5   : > { %v8249_v31 = vrot.slane %v8147_v61, %v9625_v39  ;;  %v8252_v4 = vunpack.c.l.b16 %v4076_v21  ;;  %v3590_v40 = vrot.slane %v3589_v47, 1  ;;  %v3656_v50 = vrot.slane %v3655_v2, 4  ;;  %2764 = vmatprep.subr.bf16.mxu0 %v7086_v44 }
 0x1d6   : > { %v3225_v26 = vadd.bf16 1056980736, %v3145_v12  ;;  %v3597_v57 = vrot.slane %v3596_v6, 1  ;;  %v3663_v51 = vrot.slane %v3662_v54, 4  ;;  %v3226_v27 = vadd.bf16 1056980736, %v3146_v56 }
 0x1d7   : > { %9626 = vst [vmem:[#allocation22_spill] sm:$0xff] %v8252_v4  ;;  %v6362_v61 = vadd.f32 %v1942_v58, %v8157_v23  ;;  %v8255_v13 = vpop.f32.mrb[24].mxu0  ;;  %v3591_v25 = vadd.f32 %v3590_v40, %v3589_v47  ;;  %v3657_v59 = vadd.f32 %v3656_v50, %v3655_v2  ;;  %v6363_v34 = vadd.f32 %v1944_v5, %v8163_v3  ;;  %v7099_v58 = vld [vmem:[#allocation2 + $0x5c0] ss:$40 sps:$4 sm:$0xff]   ;;  %v7116_v5 = vld [vmem:[#allocation2 + $0x614] ss:$40 sps:$4 sm:$0xff]  }
 0x1d8   : > { %v3305_v19 = vmul.bf16 %v3225_v26, %v8213_v0  ;;  %v8259_v21 = vpop.f32.mrb[25].mxu0  ;;  %v8261_v36 = vadd.f32 %v3597_v57, %v3596_v6  ;;  %v3664_v43 = vadd.f32 %v3663_v51, %v3662_v54  ;;  %v3306_v44 = vmul.bf16 %v3226_v27, %v8217_v62  ;;  %2765 = vmatpush1.bf16.msra.mxu0 %v7084_v7  ;;  %v8271_v27 = vpop.f32.mrb[23].mxu1 }
 0x1d9   : > { %v6364_v16 = vadd.f32 %v1946_v35, %v8157_v23  ;;  %v8265_v12 = vpop.f32.mrb[26].mxu0  ;;  %v4085_v39 = vpack.c.bf16 %v3591_v25, %v3591_v25  ;;  %v3658_v47 = vrot.slane %v3657_v59, 2  ;;  %2766 = vmatprep.subr.bf16.mxu0 %v7101_v32  ;;  %v6365_v62 = vadd.f32 %v1948_v10, %v8163_v3  ;;  %v7128_v25 = vld [vmem:[#allocation5 + $0x104] ss:$8 sps:$4 sm:$0xff]   ;;  %v7114_v10 = vld [vmem:[#allocation2 + $0x610] ss:$40 sps:$4 sm:$0xff]  }
 0x1da   : > { %v3415_v2 = vunpack.c.l.bf16 %v3305_v19  ;;  %v3425_v56 = vunpack.c.h.bf16 %v3305_v19  ;;  %v8267_v0 = vpop.f32.mrb[27].mxu0  ;;  %v7351_v40 = vpop.eup %7350  ;;  %v3665_v6 = vrot.slane %v3664_v43, 2  ;;  %v3416_v54 = vunpack.c.l.bf16 %v3306_v44  ;;  %5425 = vmatprep.subr.bf16.mxu1 %v7128_v25 }
 0x1db   : > { %v3426_v50 = vunpack.c.h.bf16 %v3306_v44  ;;  %v7353_v35 = vpop.eup %7352  ;;  %v4417_v26 = vunpack.c.l.b16 %v4085_v39  ;;  %v3659_v57 = vadd.f32 %v3658_v47, %v3657_v59  ;;  %v3155_v51 = vmul.bf16 1056980736, %v7351_v40  ;;  %2692 = vmatmul.mubr.bf16.gmra.mrb[100].mxu0 %v8020_v45  ;;  %v8277_v45 = vpop.f32.mrb[24].mxu1 }
 0x1dc   : > { %v3725_v7 = vadd.f32 %v3425_v56, %v3415_v2  ;;  %v4086_v32 = vpack.c.bf16 %v8261_v36, %v8261_v36  ;;  %v3666_v19 = vadd.f32 %v3665_v6, %v3664_v43  ;;  %v3156_v4 = vmul.bf16 1056980736, %v7353_v35  ;;  %2701 = vmatprep.mubr.bf16.mxu0 %v8024_v14  ;;  %2767 = vmatpush1.bf16.msra.mxu0 %v7099_v58  ;;  %v8281_v6 = vpop.f32.mrb[25].mxu1 }
 0x1dd   : > { %v3732_v24 = vadd.f32 %v3426_v50, %v3416_v54  ;;  %v4488_v44 = vsel %vm4487_vm1, %v4417_v26, %v4407_v17  ;;  %v3660_v59 = vrot.slane %v3659_v57, 1  ;;  %v3235_v47 = vadd.bf16 1056980736, %v3155_v51  ;;  %2768 = vmatprep.subr.bf16.mxu0 %v7116_v5  ;;  %9627 = vst [vmem:[#allocation23_spill] sm:$0xff] %v8281_v6  ;;  %v8286_v35 = vpop.f32.mrb[26].mxu1 }
 0x1de   : > { %v3726_v39 = vrot.slane %v3725_v7, 4  ;;  %v3667_v2 = vrot.slane %v3666_v19, 1  ;;  %v3236_v40 = vadd.bf16 1056980736, %v3156_v4  ;;  %v8279_v36 = vpack.c.bf16 %v6364_v16, %v6362_v61  ;;  %v1962_v43 = vpop.f32.mrb[28].mxu0  ;;  %9628 = vst [vmem:[#allocation24_spill] sm:$0xff] %v8286_v35 }
 0x1df   : > { %v3733_v56 = vrot.slane %v3732_v24, 4  ;;  %v3661_v14 = vadd.f32 %v3660_v59, %v3659_v57  ;;  %v3315_v54 = vmul.bf16 %v3235_v47, %v8234_v46  ;;  %v8284_v17 = vpack.c.bf16 %v6365_v62, %v6363_v34  ;;  %v1964_v50 = vpop.f32.mrb[29].mxu0  ;;  %v7518_v47 = vld [vmem:[%s7835_s21 + $0x30] ss:$12 sps:$4 sm:$0xff]  }
 0x1e0   : > { %v3727_v58 = vadd.f32 %v3726_v39, %v3725_v7  ;;  %v3668_v5 = vadd.f32 %v3667_v2, %v3666_v19  ;;  %v3316_v51 = vmul.bf16 %v3236_v40, %v8238_v15  ;;  %v3005_v4 = vmul.bf16 1056980736, %v8279_v36  ;;  %v1966_v61 = vpop.f32.mrb[30].mxu0  ;;  %2769 = vmatpush1.bf16.msra.mxu0 %v7114_v10 }
 0x1e1   : > { %v3734_v26 = vadd.f32 %v3733_v56, %v3732_v24  ;;  %v4095_v16 = vpack.c.bf16 %v3661_v14, %v3661_v14  ;;  %v3435_v57 = vunpack.c.l.bf16 %v3315_v54  ;;  %v3445_v7 = vunpack.c.h.bf16 %v3315_v54  ;;  %v1968_v59 = vpop.f32.mrb[31].mxu0  ;;  %v7519_v14 = vld [vmem:[%s7835_s21 + $0x4c] ss:$12 sps:$4 sm:$0xff]   ;;  %v8295_v54 = vpop.f32.mrb[27].mxu1 }
 0x1e2   : > { %v3728_v25 = vrot.slane %v3727_v58, 2  ;;  %v8290_v46 = vunpack.c.l.b16 %v4086_v32  ;;  %v3436_v62 = vunpack.c.l.bf16 %v3316_v51  ;;  %v3446_v19 = vunpack.c.h.bf16 %v3316_v51  ;;  %v8300_v51 = vpop.f32.mrb[28].mxu1 }
 0x1e3   : > { %v3735_v34 = vrot.slane %v3734_v26, 2  ;;  %v4427_v24 = vunpack.c.l.b16 %v4095_v16  ;;  %v3795_v15 = vadd.f32 %v3445_v7, %v3435_v57  ;;  %7354 = vtanh.bf16 %v3005_v4  ;;  %2702 = vmatmul.mubr.bf16.gmra.mrb[104].mxu0 %v7518_v47 }
 0x1e4   : > { %v3729_v39 = vadd.f32 %v3728_v25, %v3727_v58  ;;  %v4096_v2 = vpack.c.bf16 %v3668_v5, %v3668_v5  ;;  %v3802_v56 = vadd.f32 %v3446_v19, %v3436_v62  ;;  %v3006_v40 = vmul.bf16 1056980736, %v8284_v17  ;;  %2711 = vmatprep.mubr.bf16.mxu0 %v7519_v14  ;;  %v8304_v25 = vpop.f32.mrb[29].mxu1 }
 0x1e5   : > { %v3736_v10 = vadd.f32 %v3735_v34, %v3734_v26  ;;  %v4490_v32 = vsel %vm4489_vm2, %v4427_v24, %v4488_v44  ;;  %v3796_v6 = vrot.slane %v3795_v15, 4  ;;  %v6366_v58 = vadd.f32 %v8255_v13, %v8157_v23  ;;  %9629 = vst [vmem:[#allocation25_spill] sm:$0xff] %v8304_v25  ;;  %v8310_v62 = vpop.f32.mrb[30].mxu1 }
 0x1e6   : > { %v3730_v35 = vrot.slane %v3729_v39, 1  ;;  %v3803_v16 = vrot.slane %v3802_v56, 4  ;;  %7356 = vtanh.bf16 %v3006_v40  ;;  %v6367_v5 = vadd.f32 %v8259_v21, %v8163_v3  ;;  %v2005_v26 = vpop.f32.mrb[32].mxu0  ;;  %9630 = vst [vmem:[#allocation26_spill] sm:$0xff] %v8310_v62  ;;  %v8322_v62 = vpop.f32.mrb[31].mxu1 }
 0x1e7   : > { %v3737_v4 = vrot.slane %v3736_v10, 1  ;;  %v3797_v7 = vadd.f32 %v3796_v6, %v3795_v15  ;;  %v6368_v44 = vadd.f32 %v8265_v12, %v8157_v23  ;;  %v6369_v34 = vadd.f32 %v8267_v0, %v8163_v3  ;;  %v2007_v13 = vpop.f32.mrb[33].mxu0 }
 0x1e8   : > { %v3731_v57 = vadd.f32 %v3730_v35, %v3729_v39  ;;  %v8312_v19 = vunpack.c.l.b16 %v4096_v2  ;;  %v3804_v47 = vadd.f32 %v3803_v16, %v3802_v56  ;;  %v6370_v21 = vadd.f32 %v1962_v43, %v8157_v23  ;;  %v2009_v40 = vpop.f32.mrb[34].mxu0 }
 0x1e9   : > { %v3738_v24 = vadd.f32 %v3737_v4, %v3736_v10  ;;  %v3798_v25 = vrot.slane %v3797_v7, 2  ;;  %v8315_v35 = vpack.c.bf16 %v6368_v44, %v6366_v58  ;;  %v8317_v6 = vpack.c.bf16 %v6369_v34, %v6367_v5  ;;  %v2011_v12 = vpop.f32.mrb[35].mxu0 }
 0x1ea   : > { %v4105_v14 = vpack.c.bf16 %v3731_v57, %v3731_v57  ;;  %v3805_v39 = vrot.slane %v3804_v47, 2  ;;  %v6371_v0 = vadd.f32 %v1964_v50, %v8163_v3  ;;  %v6372_v15 = vadd.f32 %v1966_v61, %v8157_v23  ;;  %v8336_v61 = vpop.f32.mrb[32].mxu1 }
 0x1eb   : > { %v6373_v2 = vadd.f32 %v1968_v59, %v8163_v3  ;;  %v3799_v56 = vadd.f32 %v3798_v25, %v3797_v7  ;;  %v3015_v43 = vmul.bf16 1056980736, %v8315_v35  ;;  %v3016_v4 = vmul.bf16 1056980736, %v8317_v6  ;;  %2712 = vmatmul.mubr.bf16.gmra.mrb[108].mxu0 %v8072_v18 }
 0x1ec   : > { %v4437_v10 = vunpack.c.l.b16 %v4105_v14  ;;  %v4106_v58 = vpack.c.bf16 %v3738_v24, %v3738_v24  ;;  %v3806_v16 = vadd.f32 %v3805_v39, %v3804_v47  ;;  %v8327_v5 = vpack.c.bf16 %v6372_v15, %v6370_v21  ;;  %2721 = vmatprep.mubr.bf16.mxu0 %v8076_v20  ;;  %v8342_v21 = vpop.f32.mrb[33].mxu1 }
 0x1ed   : > { %v8329_v57 = vpack.c.bf16 %v6373_v2, %v6371_v0  ;;  %v3800_v3 = vrot.slane %v3799_v56, 1  ;;  %7358 = vtanh.bf16 %v3015_v43  ;;  %v2006_v50 = vadd.f32 %v2005_v26, %v8224_v22  ;;  %v8348_v15 = vpop.f32.mrb[34].mxu1 }
 0x1ee   : > { %v8333_v23 = vsel %vm4491_vm3, %v4437_v10, %v4490_v32  ;;  %v7355_v59 = vpop.eup %7354  ;;  %v3807_v25 = vrot.slane %v3806_v16, 1  ;;  %7360 = vtanh.bf16 %v3016_v4  ;;  %v3025_v18 = vmul.bf16 1056980736, %v8327_v5  ;;  %v2015_v44 = vpop.f32.mrb[36].mxu0 }
 0x1ef   : > { %v3026_v7 = vmul.bf16 1056980736, %v8329_v57  ;;  %v3801_v34 = vadd.f32 %v3800_v3, %v3799_v56  ;;  %v3165_v24 = vmul.bf16 1056980736, %v7355_v59  ;;  %v2008_v20 = vadd.f32 %v2007_v13, %v8249_v31  ;;  %v2017_v47 = vpop.f32.mrb[37].mxu0 }
 0x1f0   : > { %v2010_v32 = vadd.f32 %v2009_v40, %v8224_v22  ;;  %v8344_v26 = vadd.f32 %v3807_v25, %v3806_v16  ;;  %7362 = vtanh.bf16 %v3025_v18  ;;  %v2119_v14 = vadd.f32 %v8087_v42, %v2006_v50  ;;  %v2019_v0 = vpop.f32.mrb[38].mxu0 }
 0x1f1   : > { %v2012_v39 = vadd.f32 %v2011_v12, %v8249_v31  ;;  %v7357_v2 = vpop.eup %7356  ;;  %v8350_v10 = vunpack.c.l.b16 %v4106_v58  ;;  %v3245_v56 = vadd.bf16 1056980736, %v3165_v24  ;;  %7364 = vtanh.bf16 %v3026_v7  ;;  %v2021_v40 = vpop.f32.mrb[39].mxu0 }
 0x1f2   : > { %v2121_v13 = vadd.f32 %v8089_v49, %v2008_v20  ;;  %v4115_v43 = vpack.c.bf16 %v3801_v34, %v3801_v34  ;;  %v3166_v4 = vmul.bf16 1056980736, %v7357_v2  ;;  %v2123_v16 = vadd.f32 %v8091_v52, %v2010_v32 }
 0x1f3   : > { %v2125_v3 = vadd.f32 %v8093_v53, %v2012_v39  ;;  %v3325_v12 = vmul.bf16 %v3245_v56, %v8279_v36  ;;  %v2016_v50 = vadd.f32 %v2015_v44, %v8224_v22  ;;  %v2018_v58 = vadd.f32 %v2017_v47, %v8249_v31  ;;  %2722 = vmatmul.mubr.bf16.gmra.mrb[112].mxu0 %v8080_v33  ;;  %v8369_v44 = vpop.f32.mrb[35].mxu1 }
 0x1f4   : > { %v3246_v59 = vadd.bf16 1056980736, %v3166_v4  ;;  %v8361_v49 = vpack.c.bf16 %v2123_v16, %v2119_v14  ;;  %v2020_v52 = vadd.f32 %v2019_v0, %v8224_v22  ;;  %2731 = vmatprep.mubr.bf16.mxu0 %v8084_v41  ;;  %v2022_v36 = vadd.f32 %v2021_v40, %v8249_v31  ;;  %v8378_v0 = vpop.f32.mrb[36].mxu1 }
 0x1f5   : > { %v8363_v25 = vpack.c.bf16 %v2125_v3, %v2121_v13  ;;  %v3455_v53 = vunpack.c.l.bf16 %v3325_v12  ;;  %v3465_v18 = vunpack.c.h.bf16 %v3325_v12  ;;  %v2129_v7 = vadd.f32 %v8097_v60, %v2016_v50  ;;  %9631 = vst [vmem:[#allocation27_spill] sm:$0xff] %v8378_v0  ;;  %v8382_v4 = vpop.f32.mrb[37].mxu1 }
 0x1f6   : > { %v3326_v34 = vmul.bf16 %v3246_v59, %v8284_v17  ;;  %v2957_v33 = vmul.bf16 1056980736, %v8361_v49  ;;  %v2131_v20 = vadd.f32 %v8099_v37, %v2018_v58  ;;  %v2025_v32 = vpop.f32.mrb[40].mxu0  ;;  %v2133_v41 = vadd.f32 %v8101_v63, %v2020_v52  ;;  %9632 = vst [vmem:[#allocation28_spill] sm:$0xff] %v8382_v4  ;;  %v8388_v12 = vpop.f32.mrb[38].mxu1 }
 0x1f7   : > { %v2958_v24 = vmul.bf16 1056980736, %v8363_v25  ;;  %v3865_v47 = vadd.f32 %v3465_v18, %v3455_v53  ;;  %v2135_v14 = vadd.f32 %v8103_v1, %v2022_v36  ;;  %v2026_v60 = vadd.f32 %v2025_v32, %v8224_v22  ;;  %v2027_v39 = vpop.f32.mrb[41].mxu0  ;;  %9633 = vst [vmem:[#allocation29_spill] sm:$0xff] %v8388_v12  ;;  %v8395_v52 = vpop.f32.mrb[39].mxu1 }
 0x1f8   : > { %v7359_v2 = vpop.eup %7358  ;;  %v8380_v56 = vunpack.c.l.b16 %v4115_v43  ;;  %v3456_v17 = vunpack.c.l.bf16 %v3326_v34  ;;  %v3466_v13 = vunpack.c.h.bf16 %v3326_v34  ;;  %7366 = vtanh.bf16 %v2957_v33  ;;  %v2029_v40 = vpop.f32.mrb[42].mxu0  ;;  %9634 = vst [vmem:[#allocation30_spill] sm:$0xff] %v8395_v52  ;;  %v7520_v33 = vld [vmem:[%s7835_s21 + $0x78] ss:$12 sps:$4 sm:$0xff]   ;;  %v7522_v12 = vld [vmem:[%s7835_s21 + $0x90] ss:$12 sps:$4 sm:$0xff]  }
 0x1f9   : > { %v7361_v37 = vpop.eup %7360  ;;  %v3866_v16 = vrot.slane %v3865_v47, 4  ;;  %v3175_v63 = vmul.bf16 1056980736, %v7359_v2  ;;  %7368 = vtanh.bf16 %v2958_v24  ;;  %v8384_v1 = vpack.c.bf16 %v2133_v41, %v2129_v7  ;;  %v8386_v3 = vpop.f32.mrb[43].mxu0  ;;  %v7521_v2 = vld [vmem:[%s7835_s21 + $0x94] ss:$12 sps:$4 sm:$0xff]  }
 0x1fa   : > { %v3872_v50 = vadd.f32 %v3466_v13, %v3456_v17  ;;  %v3176_v43 = vmul.bf16 1056980736, %v7361_v37  ;;  %v8390_v58 = vpack.c.bf16 %v2135_v14, %v2131_v20  ;;  %v8393_v59 = vadd.f32 %v2027_v39, %v8249_v31  ;;  %v8402_v24 = vpop.f32.mrb[40].mxu1 }
 0x1fb   : > { %v7363_v53 = vpop.eup %7362  ;;  %v3867_v18 = vadd.f32 %v3866_v16, %v3865_v47  ;;  %v3255_v36 = vadd.bf16 1056980736, %v3175_v63  ;;  %v2967_v7 = vmul.bf16 1056980736, %v8384_v1  ;;  %v8399_v34 = vadd.f32 %v8107_v28, %v2026_v60  ;;  %2732 = vmatmul.mubr.bf16.gmra.mrb[116].mxu0 %v7520_v33  ;;  %9635 = vst [vmem:[#allocation31_spill] sm:$0xff] %v8402_v24  ;;  %v8408_v47 = vpop.f32.mrb[41].mxu1 }
 0x1fc   : > { %v7365_v20 = vpop.eup %7364  ;;  %v3873_v32 = vrot.slane %v3872_v50, 4  ;;  %v3256_v41 = vadd.bf16 1056980736, %v3176_v43  ;;  %v3185_v14 = vmul.bf16 1056980736, %v7363_v53  ;;  %v8405_v39 = vadd.f32 %v2029_v40, %v8224_v22  ;;  %2741 = vmatprep.mubr.bf16.mxu0 %v7521_v2  ;;  %9636 = vst [vmem:[#allocation32_spill] sm:$0xff] %v8408_v47 }
 0x1fd   : > { %v3868_v17 = vrot.slane %v3867_v18, 2  ;;  %v3335_v13 = vmul.bf16 %v3255_v36, %v8315_v35  ;;  %v3186_v28 = vmul.bf16 1056980736, %v7365_v20  ;;  %7370 = vtanh.bf16 %v2967_v7  ;;  %v8411_v60 = vpop.f32.mrb[42].mxu1 }
 0x1fe   : > { %9637 = vst [vmem:[#allocation33_spill] sm:$0xff] %v8411_v60  ;;  %v3874_v37 = vadd.f32 %v3873_v32, %v3872_v50  ;;  %v3336_v16 = vmul.bf16 %v3256_v41, %v8317_v6  ;;  %v3265_v63 = vadd.bf16 1056980736, %v3185_v14  ;;  %v2968_v43 = vmul.bf16 1056980736, %v8390_v58  ;;  %v8415_v53 = vpop.f32.mrb[44].mxu0 }
 0x1ff   : > { %v3869_v40 = vadd.f32 %v3868_v17, %v3867_v18  ;;  %v3475_v33 = vunpack.c.l.bf16 %v3335_v13  ;;  %v3485_v2 = vunpack.c.h.bf16 %v3335_v13  ;;  %v3266_v42 = vadd.bf16 1056980736, %v3186_v28  ;;  %v8417_v47 = vpop.f32.mrb[45].mxu0  ;;  %v8419_v24 = vpop.f32.mrb[43].mxu1 }
 0x200   : > { %9638 = vst [vmem:[#allocation34_spill] sm:$0xff] %v8419_v24  ;;  %v3875_v35 = vrot.slane %v3874_v37, 2  ;;  %v3476_v36 = vunpack.c.l.bf16 %v3336_v16  ;;  %v3486_v7 = vunpack.c.h.bf16 %v3336_v16  ;;  %v3345_v50 = vmul.bf16 %v3265_v63, %v8327_v5  ;;  %v8422_v20 = vpop.f32.mrb[46].mxu0  ;;  %v8429_v24 = vpop.f32.mrb[44].mxu1 }
 0x201   : > { %v3870_v6 = vrot.slane %v3869_v40, 1  ;;  %v3935_v32 = vadd.f32 %v3485_v2, %v3475_v33  ;;  %v3346_v41 = vmul.bf16 %v3266_v42, %v8329_v57  ;;  %7372 = vtanh.bf16 %v2968_v43  ;;  %v8425_v18 = vpop.f32.mrb[47].mxu0  ;;  %9639 = vst [vmem:[#allocation35_spill] sm:$0xff] %v8429_v24  ;;  %v8432_v33 = vpop.f32.mrb[45].mxu1 }
 0x202   : > { %v8427_v14 = vadd.f32 %v3875_v35, %v3874_v37  ;;  %v3942_v17 = vadd.f32 %v3486_v7, %v3476_v36  ;;  %v3495_v13 = vunpack.c.l.bf16 %v3345_v50  ;;  %v3505_v28 = vunpack.c.h.bf16 %v3345_v50  ;;  %9640 = vst [vmem:[#allocation36_spill] sm:$0xff] %v8432_v33  ;;  %v7523_v35 = vld [vmem:[%s7835_s21 + $0xac] ss:$12 sps:$4 sm:$0xff]   ;;  %v8437_v36 = vpop.f32.mrb[46].mxu1 }
 0x203   : > { %v7367_v16 = vpop.eup %7366  ;;  %v3871_v5 = vadd.f32 %v3870_v6, %v3869_v40  ;;  %v3936_v63 = vrot.slane %v3935_v32, 4  ;;  %v3496_v60 = vunpack.c.l.bf16 %v3346_v41  ;;  %v3506_v52 = vunpack.c.h.bf16 %v3346_v41  ;;  %2742 = vmatmul.mubr.bf16.gmra.mrb[120].mxu0 %v7522_v12  ;;  %9641 = vst [vmem:[#allocation37_spill] sm:$0xff] %v8437_v36 }
 0x204   : > { %v7369_v57 = vpop.eup %7368  ;;  %v3943_v42 = vrot.slane %v3942_v17, 4  ;;  %v4005_v43 = vadd.f32 %v3505_v28, %v3495_v13  ;;  %v3117_v37 = vmul.bf16 1056980736, %v7367_v16  ;;  %v2032_v2 = vadd.f32 %v8386_v3, %v8249_v31  ;;  %2751 = vmatprep.mubr.bf16.mxu0 %v7523_v35 }
 0x205   : > { %v4125_v7 = vpack.c.bf16 %v3871_v5, %v3871_v5  ;;  %v3937_v40 = vadd.f32 %v3936_v63, %v3935_v32  ;;  %v4012_v50 = vadd.f32 %v3506_v52, %v3496_v60  ;;  %v3118_v6 = vmul.bf16 1056980736, %v7369_v57 }
 0x206   : > { %v3944_v41 = vadd.f32 %v3943_v42, %v3942_v17  ;;  %v4006_v24 = vrot.slane %v4005_v43, 4  ;;  %v3197_v12 = vadd.bf16 1056980736, %v3117_v37  ;;  %v2141_v33 = vadd.f32 %v8109_v30, %v8393_v59  ;;  %v8441_v4 = vpop.f32.mrb[48].mxu0 }
 0x207   : > { %v3938_v28 = vrot.slane %v3937_v40, 2  ;;  %v4013_v3 = vrot.slane %v4012_v50, 4  ;;  %v3198_v16 = vadd.bf16 1056980736, %v3118_v6  ;;  %v8444_v35 = vpop.f32.mrb[49].mxu0  ;;  %v2143_v60 = vadd.f32 %v8111_v29, %v8405_v39 }
 0x208   : > { %v7371_v36 = vpop.eup %7370  ;;  %v3945_v5 = vrot.slane %v3944_v41, 2  ;;  %v4007_v32 = vadd.f32 %v4006_v24, %v4005_v43  ;;  %v3277_v52 = vmul.bf16 %v3197_v12, %v8361_v49  ;;  %v8449_v17 = vpop.f32.mrb[50].mxu0  ;;  %v8451_v30 = vunpack.c.l.b16 %v4125_v7  ;;  %v7524_v39 = vld [vmem:[%s7835_s21 + $0xa8] ss:$12 sps:$4 sm:$0xff]  }
 0x209   : > { %v3939_v59 = vadd.f32 %v3938_v28, %v3937_v40  ;;  %v3278_v63 = vmul.bf16 %v3198_v16, %v8363_v25  ;;  %v3127_v57 = vmul.bf16 1056980736, %v7371_v36  ;;  %v8454_v42 = vpop.f32.mrb[51].mxu0  ;;  %v8456_v6 = vadd.f32 %v4013_v3, %v4012_v50 }
 0x20a   : > { %v4008_v37 = vrot.slane %v4007_v32, 2  ;;  %v3357_v24 = vunpack.c.l.bf16 %v3277_v52  ;;  %v3367_v43 = vunpack.c.h.bf16 %v3277_v52  ;;  %v8458_v12 = vadd.f32 %v3945_v5, %v3944_v41 }
 0x20b   : > { %v3940_v49 = vrot.slane %v3939_v59, 1  ;;  %v3358_v13 = vunpack.c.l.bf16 %v3278_v63  ;;  %v3368_v29 = vunpack.c.h.bf16 %v3278_v63  ;;  %2752 = vmatmul.mubr.bf16.gmra.mrb[124].mxu0 %v7524_v39  ;;  %v3207_v28 = vadd.bf16 1056980736, %v3127_v57 }
 0x20c   : > { %v7373_v7 = vpop.eup %7372  ;;  %v4009_v0 = vadd.f32 %v4008_v37, %v4007_v32  ;;  %v3529_v40 = vadd.f32 %v3367_v43, %v3357_v24  ;;  %v8462_v25 = vpack.c.bf16 %v2143_v60, %v8399_v34  ;;  %2794 = vmatprep.mubr.bf16.mxu0 %v9623_v55  ;;  %v2145_v16 = vadd.f32 %v8114_v38, %v2032_v2  ;;  %v8470_v32 = vpop.f32.mrb[47].mxu1 }
 0x20d   : > { %v3941_v36 = vadd.f32 %v3940_v49, %v3939_v59  ;;  %v3536_v50 = vadd.f32 %v3368_v29, %v3358_v13  ;;  %v3128_v3 = vmul.bf16 1056980736, %v7373_v7  ;;  %v3287_v52 = vmul.bf16 %v3207_v28, %v8384_v1  ;;  %9642 = vst [vmem:[#allocation38_spill] sm:$0xff] %v8470_v32  ;;  %v8476_v13 = vpop.f32.mrb[48].mxu1 }
 0x20e   : > { %v4010_v41 = vrot.slane %v4009_v0, 1  ;;  %v3530_v5 = vrot.slane %v3529_v40, 4  ;;  %v2977_v63 = vmul.bf16 1056980736, %v8462_v25  ;;  %v8468_v39 = vpop.f32.mrb[52].mxu0  ;;  %v8472_v37 = vpack.c.bf16 %v2145_v16, %v2141_v33  ;;  %9643 = vst [vmem:[#allocation39_spill] sm:$0xff] %v8476_v13 }
 0x20f   : > { %v4135_v57 = vpack.c.bf16 %v3941_v36, %v3941_v36  ;;  %v3537_v34 = vrot.slane %v3536_v50, 4  ;;  %v3208_v60 = vadd.bf16 1056980736, %v3128_v3  ;;  %v8474_v59 = vpop.f32.mrb[53].mxu0  ;;  %v3377_v24 = vunpack.c.l.bf16 %v3287_v52  ;;  %v8482_v49 = vpop.f32.mrb[49].mxu1  ;;  %v9659_v13 = vld [vmem:[#allocation16_spill] sm:$0xff] }
 0x210   : > { %v8478_v38 = vadd.f32 %v4010_v41, %v4009_v0  ;;  %v3531_v2 = vadd.f32 %v3530_v5, %v3529_v40  ;;  %v3387_v1 = vunpack.c.h.bf16 %v3287_v52  ;;  %v8480_v43 = vpop.f32.mrb[54].mxu0  ;;  %9644 = vst [vmem:[#allocation40_spill] sm:$0xff] %v8482_v49  ;;  %7374 = vtanh.bf16 %v2977_v63  ;;  %v8488_v36 = vpop.f32.mrb[50].mxu1 }
 0x211   : > { %v3538_v7 = vadd.f32 %v3537_v34, %v3536_v50  ;;  %v3288_v33 = vmul.bf16 %v3208_v60, %v8390_v58  ;;  %v8486_v28 = vpop.f32.mrb[55].mxu0  ;;  %9645 = vst [vmem:[#allocation41_spill] sm:$0xff] %v8488_v36  ;;  %v8490_v0 = vunpack.c.l.b16 %v4135_v57  ;;  %v2978_v16 = vmul.bf16 1056980736, %v8472_v37  ;;  %v8493_v41 = vpop.f32.mrb[51].mxu1 }
 0x212   : > { %v3532_v40 = vrot.slane %v3531_v2, 2  ;;  %v3599_v3 = vadd.f32 %v3387_v1, %v3377_v24  ;;  %9646 = vst [vmem:[#allocation42_spill] sm:$0xff] %v8493_v41  ;;  %v2036_v50 = vadd.f32 %v8415_v53, %v8224_v22  ;;  %v7525_v58 = vld [vmem:[%s7835_s21 + $0x8] ss:$12 sps:$4 sm:$0xff]   ;;  %v8499_v63 = vpop.f32.mrb[52].mxu1  ;;  %v4145_v57 = vpack.c.bf16 %v8478_v38, %v8478_v38 }
 0x213   : > { %v3539_v5 = vrot.slane %v3538_v7, 2  ;;  %v3378_v52 = vunpack.c.l.bf16 %v3288_v33  ;;  %v3388_v49 = vunpack.c.h.bf16 %v3288_v33  ;;  %6131 = vmatmul.mubr.msk.bf16.vlgmr.msra.gmra.mrb[96].mxu0 %vm1720_vm0, %v7525_v58  ;;  %9647 = vst [vmem:[#allocation43_spill] sm:$0xff] %v8499_v63  ;;  %7376 = vtanh.bf16 %v2978_v16  ;;  %v8504_v24 = vpop.f32.mrb[53].mxu1 }
 0x214   : > { %v3533_v34 = vadd.f32 %v3532_v40, %v3531_v2  ;;  %v3600_v60 = vrot.slane %v3599_v3, 4  ;;  %2804 = vmatprep.mubr.bf16.mxu0 %v9623_v55  ;;  %9648 = vst [vmem:[#allocation44_spill] sm:$0xff] %v8504_v24  ;;  %v2038_v53 = vadd.f32 %v8417_v47, %v8249_v31  ;;  %v2040_v58 = vadd.f32 %v8422_v20, %v8224_v22  ;;  %v8510_v29 = vpop.f32.mrb[54].mxu1 }
 0x215   : > { %v3540_v1 = vadd.f32 %v3539_v5, %v3538_v7  ;;  %v3606_v33 = vadd.f32 %v3388_v49, %v3378_v52  ;;  %9649 = vst [vmem:[#allocation45_spill] sm:$0xff] %v8510_v29  ;;  %v2149_v38 = vadd.f32 %v8120_v48, %v2036_v50  ;;  %v2042_v2 = vadd.f32 %v8425_v18, %v8249_v31  ;;  %v8517_v16 = vpop.f32.mrb[55].mxu1 }
 0x216   : > { %v3534_v63 = vrot.slane %v3533_v34, 1  ;;  %v3601_v41 = vadd.f32 %v3600_v60, %v3599_v3  ;;  %v8515_v40 = vpop.f32.mrb[56].mxu0  ;;  %9650 = vst [vmem:[#allocation46_spill] sm:$0xff] %v8517_v16  ;;  %v2151_v47 = vadd.f32 %v8122_v8, %v2038_v53  ;;  %v2153_v5 = vadd.f32 %v8124_v9, %v2040_v58  ;;  %v8523_v52 = vpop.f32.mrb[56].mxu1 }
 0x217   : > { %v3541_v49 = vrot.slane %v3540_v1, 1  ;;  %v3607_v7 = vrot.slane %v3606_v33, 4  ;;  %v8521_v20 = vpop.f32.mrb[57].mxu0  ;;  %9651 = vst [vmem:[#allocation47_spill] sm:$0xff] %v8523_v52  ;;  %v2155_v48 = vadd.f32 %v8126_v11, %v2042_v2  ;;  %v2046_v18 = vadd.f32 %v8441_v4, %v8224_v22  ;;  %v8530_v16 = vpop.f32.mrb[57].mxu1 }
 0x218   : > { %v3535_v3 = vadd.f32 %v3534_v63, %v3533_v34  ;;  %v3602_v60 = vrot.slane %v3601_v41, 2  ;;  %v8528_v50 = vpop.f32.mrb[58].mxu0  ;;  %9652 = vst [vmem:[#allocation48_spill] sm:$0xff] %v8530_v16  ;;  %v8532_v53 = vpack.c.bf16 %v2153_v5, %v2149_v38  ;;  %v2048_v9 = vadd.f32 %v8444_v35, %v8249_v31  ;;  %v8538_v63 = vpop.f32.mrb[58].mxu1 }
 0x219   : > { %v3542_v29 = vadd.f32 %v3541_v49, %v3540_v1  ;;  %v3608_v8 = vadd.f32 %v3607_v7, %v3606_v33  ;;  %v8536_v58 = vpop.f32.mrb[59].mxu0  ;;  %9653 = vst [vmem:[#allocation49_spill] sm:$0xff] %v8538_v63  ;;  %v8540_v2 = vpack.c.bf16 %v2155_v48, %v2151_v47  ;;  %v2050_v4 = vadd.f32 %v8449_v17, %v8224_v22  ;;  %v8544_v16 = vpop.f32.mrb[59].mxu1  ;;  %v9655_v49 = vld [vmem:[#allocation13_spill] sm:$0xff]  ;;  %v7526_v7 = vld [vmem:[%s7835_s21 + $0x20] ss:$12 sps:$4 sm:$0xff]  }
 0x21a   : > { %v4077_v11 = vpack.c.bf16 %v3535_v3, %v3535_v3  ;;  %v3603_v34 = vadd.f32 %v3602_v60, %v3601_v41  ;;  %9654 = vst [vmem:[#allocation50_spill] sm:$0xff] %v8544_v16  ;;  %v8546_v1 = vunpack.c.l.b16 %v4145_v57  ;;  %v2987_v38 = vmul.bf16 1056980736, %v8532_v53  ;;  %v8552_v5 = vpop.f32.mrb[60].mxu1  ;;  %v9658_v63 = vld [vmem:[#allocation15_spill] sm:$0xff] }
 0x21b   : > { %v3609_v33 = vrot.slane %v3608_v8, 2  ;;  %v2159_v35 = vadd.f32 %v9655_v49, %v2046_v18  ;;  %6132 = vmatmul.mubr.msk.bf16.gmra.mrb[100].mxu0 %vm1720_vm0, %v7526_v7  ;;  %9656 = vst [vmem:[#allocation13_spill] sm:$0xff] %v8552_v5  ;;  %v7375_v41 = vpop.eup %7374  ;;  %v4078_v47 = vpack.c.bf16 %v3542_v29, %v3542_v29  ;;  %v2988_v60 = vmul.bf16 1056980736, %v8540_v2  ;;  %v9657_v49 = vld [vmem:[#allocation14_spill] sm:$0xff] }
 0x21c   : > { %v3604_v3 = vrot.slane %v3603_v34, 1  ;;  %v2052_v17 = vadd.f32 %v8454_v42, %v8249_v31  ;;  %2814 = vmatprep.mubr.bf16.mxu0 %v9623_v55  ;;  %v4409_v57 = vunpack.c.l.b16 %v4077_v11  ;;  %v3137_v16 = vmul.bf16 1056980736, %v7375_v41 }
 0x21d   : > { %v3610_v48 = vadd.f32 %v3609_v33, %v3608_v8  ;;  %7378 = vtanh.bf16 %v2987_v38  ;;  %v2161_v7 = vadd.f32 %v9657_v49, %v2048_v9  ;;  %v2163_v5 = vadd.f32 %v9658_v63, %v2050_v4  ;;  %v9661_v49 = vld [vmem:[#allocation20_spill] sm:$0xff] }
 0x21e   : > { %v3605_v18 = vadd.f32 %v3604_v3, %v3603_v34  ;;  %7380 = vtanh.bf16 %v2988_v60  ;;  %v8560_v52 = vpop.f32.mrb[60].mxu0  ;;  %v7377_v29 = vpop.eup %7376  ;;  %v3217_v36 = vadd.bf16 1056980736, %v3137_v16  ;;  %v2165_v32 = vadd.f32 %v9659_v13, %v2052_v17 }
 0x21f   : > { %v3611_v24 = vrot.slane %v3610_v48, 1  ;;  %v2056_v42 = vadd.f32 %v8468_v39, %v8224_v22  ;;  %v8565_v11 = vpop.f32.mrb[61].mxu0  ;;  %v8567_v8 = vunpack.c.l.b16 %v4078_v47  ;;  %v3138_v33 = vmul.bf16 1056980736, %v7377_v29 }
 0x220   : > { %v4087_v34 = vpack.c.bf16 %v3605_v18, %v3605_v18  ;;  %v8569_v38 = vpack.c.bf16 %v2163_v5, %v2159_v35  ;;  %v8571_v9 = vpop.f32.mrb[62].mxu0  ;;  %v3297_v16 = vmul.bf16 %v3217_v36, %v8462_v25  ;;  %v8576_v13 = vpack.c.bf16 %v2165_v32, %v2161_v7  ;;  %v9660_v5 = vld [vmem:[#allocation19_spill] sm:$0xff]  ;;  %v7527_v32 = vld [vmem:[%s7835_s21 + $0x38] ss:$12 sps:$4 sm:$0xff]  }
 0x221   : > { %v8573_v63 = vadd.f32 %v3611_v24, %v3610_v48  ;;  %v2058_v39 = vadd.f32 %v8474_v59, %v8249_v31  ;;  %v8580_v4 = vpop.f32.mrb[63].mxu0  ;;  %v3218_v47 = vadd.bf16 1056980736, %v3138_v33  ;;  %v8584_v3 = vadd.f32 %v9660_v5, %v2056_v42  ;;  %v8609_v33 = vpop.f32.mrb[61].mxu1 }
 0x222   : > { %v4419_v41 = vunpack.c.l.b16 %v4087_v34  ;;  %v2997_v35 = vmul.bf16 1056980736, %v8569_v38  ;;  %v3397_v60 = vunpack.c.l.bf16 %v3297_v16  ;;  %v3407_v24 = vunpack.c.h.bf16 %v3297_v16 }
 0x223   : > { %v2998_v17 = vmul.bf16 1056980736, %v8576_v13  ;;  %v2060_v25 = vadd.f32 %v8480_v43, %v8224_v22  ;;  %6133 = vmatmul.mubr.msk.bf16.gmra.mrb[104].mxu0 %vm1720_vm0, %v7527_v32  ;;  %v3298_v48 = vmul.bf16 %v3218_v47, %v8472_v37  ;;  %v8600_v43 = vadd.f32 %v8486_v28, %v8249_v31 }
 0x224   : > { %v8592_v59 = vsel %vm4487_vm1, %v4419_v41, %v4409_v57  ;;  %7382 = vtanh.bf16 %v2997_v35  ;;  %2824 = vmatprep.mubr.bf16.mxu0 %v9623_v55  ;;  %v3669_v18 = vadd.f32 %v3407_v24, %v3397_v60  ;;  %v8603_v7 = vadd.f32 %v9661_v49, %v2058_v39  ;;  %v9665_v35 = vld [vmem:[#allocation22_spill] sm:$0xff]  ;;  %v8620_v60 = vpop.f32.mrb[62].mxu1 }
 0x225   : > { %7384 = vtanh.bf16 %v2998_v17  ;;  %v3398_v29 = vunpack.c.l.bf16 %v3298_v48  ;;  %v3408_v57 = vunpack.c.h.bf16 %v3298_v48  ;;  %v9662_v42 = vrot.slane %v8427_v14, 1  ;;  %9666 = vst [vmem:[#allocation14_spill] sm:$0xff] %v8620_v60 }
 0x226   : > { %v3947_v37 = vrot.slane %v8458_v12, 1  ;;  %v3670_v16 = vrot.slane %v3669_v18, 4  ;;  %v9663_v41 = vrot.slane %v8456_v6, 2  ;;  %v9664_v39 = vpack.c.bf16 %v8344_v26, %v8344_v26 }
 0x227   : > { %v3878_v34 = vadd.f32 %v9662_v42, %v8427_v14  ;;  %v4501_v5 = vsel %vm4487_vm1, %v8290_v46, %v9665_v35  ;;  %v3676_v24 = vadd.f32 %v3408_v57, %v3398_v29 }
 0x228   : > { %v4016_v28 = vadd.f32 %v9663_v41, %v8456_v6  ;;  %v4448_v47 = vunpack.c.l.b16 %v9664_v39  ;;  %v7379_v14 = vpop.eup %7378  ;;  %v3948_v17 = vadd.f32 %v3947_v37, %v8458_v12  ;;  %v4502_v48 = vsel %vm4489_vm2, %v8312_v19, %v4501_v5 }
 0x229   : > { %v4126_v32 = vpack.c.bf16 %v3878_v34, %v3878_v34  ;;  %v7381_v6 = vpop.eup %7380  ;;  %v3671_v49 = vadd.f32 %v3670_v16, %v3669_v18  ;;  %v3147_v42 = vmul.bf16 1056980736, %v7379_v14  ;;  %v4503_v41 = vsel %vm4491_vm3, %v8350_v10, %v4502_v48  ;;  %v7528_v34 = vld [vmem:[%s7835_s21 + $0x50] ss:$12 sps:$4 sm:$0xff]  }
 0x22a   : > { %v4017_v26 = vrot.slane %v4016_v28, 1  ;;  %v3677_v39 = vrot.slane %v3676_v24, 4  ;;  %v3148_v46 = vmul.bf16 1056980736, %v7381_v6  ;;  %v4136_v35 = vpack.c.bf16 %v3948_v17, %v3948_v17  ;;  %v9667_v17 = vld [vmem:[#allocation21_spill] sm:$0xff] }
 0x22b   : > { %v4458_v36 = vunpack.c.l.b16 %v4126_v32  ;;  %v3672_v60 = vrot.slane %v3671_v49, 2  ;;  %v3227_v29 = vadd.bf16 1056980736, %v3147_v42  ;;  %v4504_v12 = vsel %vm4493_vm4, %v4448_v47, %v4503_v41  ;;  %6134 = vmatmul.mubr.msk.bf16.gmra.mrb[108].mxu0 %vm1720_vm0, %v7528_v34 }
 0x22c   : > { %v4018_v57 = vadd.f32 %v4017_v26, %v4016_v28  ;;  %v3678_v19 = vadd.f32 %v3677_v39, %v3676_v24  ;;  %v3228_v37 = vadd.bf16 1056980736, %v3148_v46  ;;  %v4468_v18 = vunpack.c.l.b16 %v4136_v35  ;;  %2834 = vmatprep.mubr.bf16.mxu0 %v9623_v55 }
 0x22d   : > { %v4505_v16 = vsel %vm4495_vm5, %v4458_v36, %v4504_v12  ;;  %v3673_v10 = vadd.f32 %v3672_v60, %v3671_v49  ;;  %v3307_v5 = vmul.bf16 %v3227_v29, %v8532_v53  ;;  %v2173_v32 = vadd.f32 %v9667_v17, %v2060_v25 }
 0x22e   : > { %v4146_v14 = vpack.c.bf16 %v4018_v57, %v4018_v57  ;;  %v3679_v48 = vrot.slane %v3678_v19, 2  ;;  %v3308_v28 = vmul.bf16 %v3228_v37, %v8540_v2  ;;  %v4506_v47 = vsel %vm4497_vm6, %v4468_v18, %v4505_v16 }
 0x22f   : > { %v4494_v24 = vsel %vm4493_vm4, %v8380_v56, %v8333_v23  ;;  %v7383_v6 = vpop.eup %7382  ;;  %v3674_v42 = vrot.slane %v3673_v10, 1  ;;  %v3417_v36 = vunpack.c.l.bf16 %v3307_v5  ;;  %v3427_v26 = vunpack.c.h.bf16 %v3307_v5 }
 0x230   : > { %v4478_v41 = vunpack.c.l.b16 %v4146_v14  ;;  %v7385_v60 = vpop.eup %7384  ;;  %v3680_v49 = vadd.f32 %v3679_v48, %v3678_v19  ;;  %v3418_v53 = vunpack.c.l.bf16 %v3308_v28  ;;  %v3428_v39 = vunpack.c.h.bf16 %v3308_v28  ;;  %v7529_v19 = vld [vmem:[%s7835_s21 + $0x68] ss:$12 sps:$4 sm:$0xff]  }
 0x231   : > { %v3157_v25 = vmul.bf16 1056980736, %v7383_v6  ;;  %v3675_v46 = vadd.f32 %v3674_v42, %v3673_v10  ;;  %v3739_v35 = vadd.f32 %v3427_v26, %v3417_v36  ;;  %v3158_v2 = vmul.bf16 1056980736, %v7385_v60 }
 0x232   : > { %v4507_v29 = vsel %vm4499_vm7, %v4478_v41, %v4506_v47  ;;  %v3681_v57 = vrot.slane %v3680_v49, 1  ;;  %v3746_v12 = vadd.f32 %v3428_v39, %v3418_v53  ;;  %v8641_v16 = vpack.c.bf16 %v2173_v32, %v8584_v3 }
 0x233   : > { %v3237_v34 = vadd.bf16 1056980736, %v3157_v25  ;;  %v4565_v23 = vpack.c.b16 %v4507_v29, %v4507_v29  ;;  %v4097_v56 = vpack.c.bf16 %v3675_v46, %v3675_v46  ;;  %v3740_v37 = vrot.slane %v3739_v35, 4  ;;  %6135 = vmatmul.mubr.msk.bf16.gmra.mrb[112].mxu0 %vm1720_vm0, %v7529_v19  ;;  %v7126_v46 = vld [vmem:[#allocation5 + $0x100] ss:$8 sps:$4 sm:$0xff]  }
 0x234   : > { %v3238_v18 = vadd.bf16 1056980736, %v3158_v2  ;;  %v3682_v5 = vadd.f32 %v3681_v57, %v3680_v49  ;;  %v3747_v14 = vrot.slane %v3746_v12, 4  ;;  %v4496_v17 = vsel %vm4495_vm5, %v8451_v30, %v4494_v24  ;;  %2844 = vmatprep.mubr.bf16.mxu0 %v9623_v55 }
 0x235   : > { %v3317_v10 = vmul.bf16 %v3237_v34, %v8569_v38  ;;  %5416 = vmatprep.mubr.bf16.mxu1 %v4565_v23  ;;  %v9668_v48 = vpack.c.bf16 %v8573_v63, %v8573_v63  ;;  %v3741_v3 = vadd.f32 %v3740_v37, %v3739_v35  ;;  %v3007_v47 = vmul.bf16 1056980736, %v8641_v16 }
 0x236   : > { %v3318_v32 = vmul.bf16 %v3238_v18, %v8576_v13  ;;  %v8656_v6 = vunpack.c.l.b16 %v4097_v56  ;;  %v3748_v42 = vadd.f32 %v3747_v14, %v3746_v12  ;;  %v4098_v24 = vpack.c.bf16 %v3682_v5, %v3682_v5  ;;  %v7131_v12 = vld [vmem:[#allocation5 + $0x114] ss:$8 sps:$4 sm:$0xff]   ;;  %v7129_v5 = vld [vmem:[#allocation5 + $0x110] ss:$8 sps:$4 sm:$0xff]  }
 0x237   : > { %v8652_v28 = vunpack.c.l.b16 %v9668_v48  ;;  %v3437_v38 = vunpack.c.l.bf16 %v3317_v10  ;;  %v3447_v36 = vunpack.c.h.bf16 %v3317_v10  ;;  %v3742_v26 = vrot.slane %v3741_v3, 2 }
 0x238   : > { %v3438_v41 = vunpack.c.l.bf16 %v3318_v32  ;;  %v3448_v30 = vunpack.c.h.bf16 %v3318_v32  ;;  %7386 = vtanh.bf16 %v3007_v47  ;;  %v3749_v60 = vrot.slane %v3748_v42, 2  ;;  %v7134_v32 = vld [vmem:[#allocation5 + $0x124] ss:$8 sps:$4 sm:$0xff]  }
 0x239   : > { %v3809_v49 = vadd.f32 %v3447_v36, %v3437_v38  ;;  %v4498_v63 = vsel %vm4497_vm6, %v8490_v0, %v4496_v17  ;;  %v3743_v53 = vadd.f32 %v3742_v26, %v3741_v3  ;;  %v2175_v25 = vadd.f32 %v8271_v27, %v8600_v43  ;;  %v9669_v17 = vld [vmem:[#allocation23_spill] sm:$0xff]  ;;  %v9670_v3 = vld [vmem:[#allocation24_spill] sm:$0xff] }
 0x23a   : > { %v3816_v13 = vadd.f32 %v3448_v30, %v3438_v41  ;;  %v4500_v39 = vsel %vm4499_vm7, %v8546_v1, %v4498_v63  ;;  %v3750_v35 = vadd.f32 %v3749_v60, %v3748_v42  ;;  %v2066_v57 = vadd.f32 %v8515_v40, %v8224_v22  ;;  %v7530_v1 = vld [vmem:[%s7835_s21 + $0x80] ss:$12 sps:$4 sm:$0xff]  }
 0x23b   : > { %v3810_v2 = vrot.slane %v3809_v49, 4  ;;  %v4564_v29 = vpack.c.b16 %v4500_v39, %v4500_v39  ;;  %v3744_v34 = vrot.slane %v3743_v53, 1  ;;  %v8667_v0 = vpack.c.bf16 %v2175_v25, %v8603_v7  ;;  %6136 = vmatmul.mubr.msk.bf16.gmra.mrb[116].mxu0 %vm1720_vm0, %v7530_v1  ;;  %v7137_v39 = vld [vmem:[#allocation5 + $0x134] ss:$8 sps:$4 sm:$0xff]  }
 0x23c   : > { %v3817_v23 = vrot.slane %v3816_v13, 4  ;;  %v2068_v56 = vadd.f32 %v8521_v20, %v8249_v31  ;;  %v3751_v27 = vrot.slane %v3750_v35, 1  ;;  %v2070_v37 = vadd.f32 %v8528_v50, %v8224_v22  ;;  %2854 = vmatprep.mubr.bf16.mxu0 %v9623_v55 }
 0x23d   : > { %v3811_v43 = vadd.f32 %v3810_v2, %v3809_v49  ;;  %5417 = vmatmul.mubr.bf16.vlgmr.msra.gmra.mrb[64].mxu1 %v4564_v29  ;;  %v2179_v40 = vadd.f32 %v8277_v45, %v2066_v57  ;;  %v3745_v18 = vadd.f32 %v3744_v34, %v3743_v53  ;;  %v3008_v7 = vmul.bf16 1056980736, %v8667_v0  ;;  %v7132_v49 = vld [vmem:[#allocation5 + $0x120] ss:$8 sps:$4 sm:$0xff]   ;;  %v7531_v29 = vld [vmem:[%s7835_s21 + $0x98] ss:$12 sps:$4 sm:$0xff]  }
 0x23e   : > { %v3818_v19 = vadd.f32 %v3817_v23, %v3816_v13  ;;  %5426 = vmatpush1.bf16.msra.mxu1 %v7126_v46  ;;  %v2072_v20 = vadd.f32 %v8536_v58, %v8249_v31  ;;  %v3752_v14 = vadd.f32 %v3751_v27, %v3750_v35  ;;  %v2181_v48 = vadd.f32 %v9669_v17, %v2068_v56  ;;  %v9671_v34 = vld [vmem:[#allocation25_spill] sm:$0xff]  ;;  %v9672_v56 = vld [vmem:[#allocation26_spill] sm:$0xff] }
 0x23f   : > { %v3812_v10 = vrot.slane %v3811_v43, 2  ;;  %5427 = vmatprep.subr.bf16.mxu1 %v7131_v12  ;;  %v2183_v50 = vadd.f32 %v9670_v3, %v2070_v37  ;;  %v4107_v45 = vpack.c.bf16 %v3745_v18, %v3745_v18  ;;  %7388 = vtanh.bf16 %v3008_v7  ;;  %v7140_v37 = vld [vmem:[#allocation5 + $0x144] ss:$8 sps:$4 sm:$0xff]  }
 0x240   : > { %v3819_v47 = vrot.slane %v3818_v19, 2  ;;  %v2185_v42 = vadd.f32 %v8295_v54, %v2072_v20  ;;  %v8683_v38 = vunpack.c.l.b16 %v4098_v24  ;;  %v2076_v58 = vadd.f32 %v8560_v52, %v8224_v22  ;;  %v8731_v20 = vld [vmem:[%s9587_s2] sm:$0xff] }
 0x241   : > { %v3813_v36 = vadd.f32 %v3812_v10, %v3811_v43  ;;  %v8685_v26 = vpack.c.bf16 %v2183_v50, %v2179_v40  ;;  %v4108_v41 = vpack.c.bf16 %v3752_v14, %v3752_v14  ;;  %v2078_v63 = vadd.f32 %v8565_v11, %v8249_v31  ;;  %v8702_v11 = vpop.f32.mrb[63].mxu1  ;;  %v9673_v40 = vld [vmem:[#allocation12_spill] sm:$0xff] }
 0x242   : > { %v3820_v30 = vadd.f32 %v3819_v47, %v3818_v19  ;;  %5428 = vmatpush1.bf16.msra.mxu1 %v7129_v5  ;;  %v8689_v60 = vpack.c.bf16 %v2185_v42, %v2181_v48  ;;  %v8693_v54 = vunpack.c.l.b16 %v4107_v45  ;;  %v2080_v52 = vadd.f32 %v8571_v9, %v8224_v22  ;;  %v7138_v48 = vld [vmem:[#allocation5 + $0x140] ss:$8 sps:$4 sm:$0xff]  }
 0x243   : > { %v7387_v53 = vpop.eup %7386  ;;  %v3814_v24 = vrot.slane %v3813_v36, 1  ;;  %v3017_v13 = vmul.bf16 1056980736, %v8685_v26  ;;  %5429 = vmatprep.subr.bf16.mxu1 %v7134_v32  ;;  %v2189_v2 = vadd.f32 %v8300_v51, %v2076_v58  ;;  %6137 = vmatmul.mubr.msk.bf16.gmra.mrb[120].mxu0 %vm1720_vm0, %v7531_v29  ;;  %v2082_v12 = vadd.f32 %v8580_v4, %v8249_v31  ;;  %v7135_v51 = vld [vmem:[#allocation5 + $0x130] ss:$8 sps:$4 sm:$0xff]   ;;  %v9678_v29 = vld [vmem:[#allocation31_spill] sm:$0xff] }
 0x244   : > { %v3821_v25 = vrot.slane %v3820_v30, 1  ;;  %v3167_v46 = vmul.bf16 1056980736, %v7387_v53  ;;  %v3018_v35 = vmul.bf16 1056980736, %v8689_v60  ;;  %v2191_v23 = vadd.f32 %v9671_v34, %v2078_v63  ;;  %2864 = vmatprep.mubr.bf16.mxu0 %v9623_v55 }
 0x245   : > { %v3815_v57 = vadd.f32 %v3814_v24, %v3813_v36  ;;  %7390 = vtanh.bf16 %v3017_v13  ;;  %v2193_v1 = vadd.f32 %v9672_v56, %v2080_v52  ;;  %v2195_v43 = vadd.f32 %v8322_v62, %v2082_v12  ;;  %v7143_v32 = vld [vmem:[#allocation5 + $0x154] ss:$8 sps:$4 sm:$0xff]   ;;  %v7141_v13 = vld [vmem:[#allocation5 + $0x150] ss:$8 sps:$4 sm:$0xff]  }
 0x246   : > { %v8708_v22 = vadd.f32 %v3821_v25, %v3820_v30  ;;  %v3247_v9 = vadd.bf16 1056980736, %v3167_v46  ;;  %7392 = vtanh.bf16 %v3018_v35  ;;  %5430 = vmatpush1.bf16.msra.mxu1 %v7132_v49  ;;  %v576_v18 = vsub.s32 6, %v9673_v40  ;;  %v7533_v30 = vld [vmem:[%s7835_s21 + $0xb0] ss:$12 sps:$4 sm:$0xff]   ;;  %v9677_v35 = vld [vmem:[#allocation30_spill] sm:$0xff] }
 0x247   : > { %v4117_v27 = vpack.c.bf16 %v3815_v57, %v3815_v57  ;;  %5431 = vmatprep.subr.bf16.mxu1 %v7137_v39  ;;  %v580_v31 = vsub.s32 7, %v9673_v40  ;;  %v8714_v4 = vunpack.c.l.b16 %v4108_v41  ;;  %v8717_v19 = vpack.c.bf16 %v2193_v1, %v2189_v2  ;;  %v7146_v25 = vld [vmem:[#allocation5 + $0x164] ss:$8 sps:$4 sm:$0xff]   ;;  %v9679_v12 = vld [vmem:[#allocation32_spill] sm:$0xff]  ;;  %s6317_s21 = sshll.u32 %s7731_s28, 7  ;;  %s7669_s28 = smov [#allocation7]  }
 0x248   : > { %v3327_v55 = vmul.bf16 %v3247_v9, %v8641_v16  ;;  %v8722_v7 = vsel %vm4487_vm1, %v8652_v28, %v8567_v8  ;;  %v4118_v5 = vpack.c.bf16 %v8708_v22, %v8708_v22  ;;  %v8726_v62 = vpack.c.bf16 %v2195_v43, %v2191_v23  ;;  %s9543_s9 = scalar_lea.hbm %s9592_s7, %s6317_s21  ;;  %s7594_s14 = sshll.u32 %s7669_s28, 4  ;;  %s7595_s14 = int_to_ptr.vmem [resolvable:$false] %s7594_s14 }
 0x249   : > { %v8734_v14 = vrot.slane %v8731_v20, %v576_v18  ;;  %v8737_v16 = vrot.slane %v8731_v20, %v580_v31  ;;  %v8739_v10 = vunpack.c.l.b16 %v4117_v27  ;;  %v3027_v17 = vmul.bf16 1056980736, %v8717_v19  ;;  %v9680_v31 = vld [vmem:[#allocation33_spill] sm:$0xff]  ;;  %s7596_s17 = scalar_lea.vmem %s7595_s14, 256  ;;  %p7597_p4 = scmp.lt.s32.totalorder %s9545_s23, %s7595_s14 }
 0x24a   : > { %v3457_v8 = vunpack.c.l.bf16 %v3327_v55  ;;  %v3467_v28 = vunpack.c.h.bf16 %v3327_v55  ;;  %5432 = vmatpush1.bf16.msra.mxu1 %v7135_v51  ;;  %v7389_v3 = vpop.eup %7388  ;;  %v3028_v50 = vmul.bf16 1056980736, %v8726_v62  ;;  %p7598_p7 = scmp.lt.s32.totalorder %s7596_s17, %s7590_s10 }
 0x24b   : > { %5433 = vmatprep.subr.bf16.mxu1 %v7140_v37  ;;  %v6470_v45 = vadd.f32 %v8336_v61, %v8734_v14  ;;  %v6471_v47 = vadd.f32 %v8342_v21, %v8737_v16  ;;  %v6472_v42 = vadd.f32 %v8348_v15, %v8734_v14  ;;  %v3168_v58 = vmul.bf16 1056980736, %v7389_v3  ;;  %6138 = vmatmul.mubr.msk.bf16.gmra.mrb[124].mxu0 %vm1720_vm0, %v7533_v30  ;;  %v9674_v61 = vld [vmem:[#allocation27_spill] sm:$0xff]  ;;  %v9675_v21 = vld [vmem:[#allocation28_spill] sm:$0xff] }
 0x24c   : > { %v3879_v36 = vadd.f32 %v3467_v28, %v3457_v8  ;;  %7394 = vtanh.bf16 %v3027_v17  ;;  %v6473_v41 = vadd.f32 %v8369_v44, %v8737_v16  ;;  %v6474_v63 = vadd.f32 %v9674_v61, %v8734_v14  ;;  %v9676_v44 = vld [vmem:[#allocation29_spill] sm:$0xff]  ;;  %v7144_v37 = vld [vmem:[#allocation5 + $0x160] ss:$8 sps:$4 sm:$0xff]   ;;  %p7599_p8 = por %p7598_p7, %p7597_p4 }
 0x24d   : > { %7396 = vtanh.bf16 %v3028_v50  ;;  %v8753_v49 = vpack.c.bf16 %v6472_v42, %v6470_v45  ;;  %v6475_v53 = vadd.f32 %v9675_v21, %v8737_v16  ;;  %v3248_v15 = vadd.bf16 1056980736, %v3168_v58  ;;  %v7149_v3 = vld [vmem:[#allocation5 + $0x174] ss:$8 sps:$4 sm:$0xff]  }
 0x24e   : > { %v3880_v24 = vrot.slane %v3879_v36, 4  ;;  %5434 = vmatpush1.bf16.msra.mxu1 %v7138_v48  ;;  %v8759_v52 = vpack.c.bf16 %v6473_v41, %v6471_v47  ;;  %v6476_v39 = vadd.f32 %v9676_v44, %v8734_v14  ;;  %v6477_v2 = vadd.f32 %v9677_v35, %v8737_v16  ;;  %v9681_v41 = vld [vmem:[#allocation34_spill] sm:$0xff]  ;;  %p7600_p11 = pnand %p7599_p8, %p7593_p3 }
 0x24f   : > { %5435 = vmatprep.subr.bf16.mxu1 %v7143_v32  ;;  %v2961_v46 = vmul.bf16 1056980736, %v8753_v49  ;;  %v6478_v57 = vadd.f32 %v9678_v29, %v8734_v14  ;;  %v6479_v34 = vadd.f32 %v9679_v12, %v8737_v16  ;;  %v3328_v51 = vmul.bf16 %v3248_v15, %v8667_v0  ;;  %v7150_v12 = vld [vmem:[#allocation5 + $0x180] ss:$8 sps:$4 sm:$0xff]  }
 0x250   : > { %v7391_v23 = vpop.eup %7390  ;;  %v3881_v9 = vadd.f32 %v3880_v24, %v3879_v36  ;;  %v2962_v56 = vmul.bf16 1056980736, %v8759_v52  ;;  %v8772_v1 = vpack.c.bf16 %v6476_v39, %v6474_v63  ;;  %v8774_v18 = vpack.c.bf16 %v6477_v2, %v6475_v53  ;;  %v7147_v24 = vld [vmem:[#allocation5 + $0x170] ss:$8 sps:$4 sm:$0xff]  }
 0x251   : > { %v7393_v27 = vpop.eup %7392  ;;  %v3177_v43 = vmul.bf16 1056980736, %v7391_v23  ;;  %7398 = vtanh.bf16 %v2961_v46  ;;  %v6480_v55 = vadd.f32 %v9680_v31, %v8734_v14  ;;  %v3458_v28 = vunpack.c.l.bf16 %v3328_v51  ;;  %v9682_v31 = vld [vmem:[#allocation35_spill] sm:$0xff] }
 0x252   : > { %v3882_v8 = vrot.slane %v3881_v9, 2  ;;  %v3468_v17 = vunpack.c.h.bf16 %v3328_v51  ;;  %v3178_v48 = vmul.bf16 1056980736, %v7393_v27  ;;  %5436 = vmatpush1.bf16.msra.mxu1 %v7141_v13  ;;  %7400 = vtanh.bf16 %v2962_v56  ;;  %v7155_v56 = vld [vmem:[#allocation5 + $0x194] ss:$8 sps:$4 sm:$0xff]  }
 0x253   : > { %v3257_v0 = vadd.bf16 1056980736, %v3177_v43  ;;  %5437 = vmatprep.subr.bf16.mxu1 %v7146_v25  ;;  %v2971_v50 = vmul.bf16 1056980736, %v8772_v1  ;;  %v2972_v32 = vmul.bf16 1056980736, %v8774_v18  ;;  %v8780_v36 = vpack.c.bf16 %v6480_v55, %v6478_v57 }
 0x254   : > { %v3883_v45 = vadd.f32 %v3882_v8, %v3881_v9  ;;  %v3886_v47 = vadd.f32 %v3468_v17, %v3458_v28  ;;  %v3258_v42 = vadd.bf16 1056980736, %v3178_v48  ;;  %v6481_v30 = vadd.f32 %v9681_v41, %v8737_v16  ;;  %v9683_v48 = vld [vmem:[#allocation36_spill] sm:$0xff] }
 0x255   : > { %v3337_v58 = vmul.bf16 %v3257_v0, %v8685_v26  ;;  %7402 = vtanh.bf16 %v2971_v50  ;;  %v8788_v61 = vunpack.c.l.b16 %v4118_v5  ;;  %v7152_v26 = vld [vmem:[#allocation5 + $0x184] ss:$8 sps:$4 sm:$0xff]   ;;  %v2981_v39 = vmul.bf16 1056980736, %v8780_v36 }
 0x256   : > { %v3884_v63 = vrot.slane %v3883_v45, 1  ;;  %v3887_v21 = vrot.slane %v3886_v47, 4  ;;  %v3338_v53 = vmul.bf16 %v3258_v42, %v8689_v60  ;;  %5438 = vmatpush1.bf16.msra.mxu1 %v7144_v37  ;;  %7404 = vtanh.bf16 %v2972_v32 }
 0x257   : > { %v7395_v15 = vpop.eup %7394  ;;  %v3477_v13 = vunpack.c.l.bf16 %v3337_v58  ;;  %v3487_v44 = vunpack.c.h.bf16 %v3337_v58  ;;  %5439 = vmatprep.subr.bf16.mxu1 %v7149_v3  ;;  %v8792_v25 = vpack.c.bf16 %v6481_v30, %v6479_v34  ;;  %7406 = vtanh.bf16 %v2981_v39  ;;  %v7153_v30 = vld [vmem:[#allocation5 + $0x190] ss:$8 sps:$4 sm:$0xff]  }
 0x258   : > { %v7397_v46 = vpop.eup %7396  ;;  %v3885_v22 = vadd.f32 %v3884_v63, %v3883_v45  ;;  %v3888_v5 = vadd.f32 %v3887_v21, %v3886_v47  ;;  %v3478_v35 = vunpack.c.l.bf16 %v3338_v53  ;;  %v3488_v2 = vunpack.c.h.bf16 %v3338_v53  ;;  %v9684_v63 = vld [vmem:[#allocation37_spill] sm:$0xff] }
 0x259   : > { %v3949_v29 = vadd.f32 %v3487_v44, %v3477_v13  ;;  %v3187_v57 = vmul.bf16 1056980736, %v7395_v15  ;;  %v3188_v60 = vmul.bf16 1056980736, %v7397_v46  ;;  %v2982_v27 = vmul.bf16 1056980736, %v8792_v25 }
 0x25a   : > { %v4127_v23 = vpack.c.bf16 %v3885_v22, %v3885_v22  ;;  %v3889_v9 = vrot.slane %v3888_v5, 2  ;;  %v3956_v51 = vadd.f32 %v3488_v2, %v3478_v35  ;;  %5440 = vmatpush1.bf16.msra.mxu1 %v7147_v24  ;;  %v6482_v55 = vadd.f32 %v9682_v31, %v8734_v14 }
 0x25b   : > { %v3950_v43 = vrot.slane %v3949_v29, 4  ;;  %v3267_v34 = vadd.bf16 1056980736, %v3187_v57  ;;  %v3268_v37 = vadd.bf16 1056980736, %v3188_v60  ;;  %5441 = vmatprep.subr.bf16.mxu1 %v7152_v26  ;;  %7408 = vtanh.bf16 %v2982_v27 }
 0x25c   : > { %v7399_v8 = vpop.eup %7398  ;;  %v8797_v28 = vadd.f32 %v3889_v9, %v3888_v5  ;;  %v3957_v17 = vrot.slane %v3956_v51, 4  ;;  %v8801_v3 = vadd.f32 %v9683_v48, %v8737_v16  ;;  %v8805_v42 = vunpack.c.l.b16 %v4127_v23  ;;  %v7156_v23 = vld [vmem:[#allocation5 + $0x1a0] ss:$8 sps:$4 sm:$0xff]   ;;  %v7161_v9 = vld [vmem:[#allocation5 + $0x1b4] ss:$8 sps:$4 sm:$0xff]  }
 0x25d   : > { %v3951_v0 = vadd.f32 %v3950_v43, %v3949_v29  ;;  %v3347_v50 = vmul.bf16 %v3267_v34, %v8717_v19  ;;  %v3348_v32 = vmul.bf16 %v3268_v37, %v8726_v62  ;;  %v3121_v45 = vmul.bf16 1056980736, %v7399_v8  ;;  %v7401_v47 = vpop.eup %7400  ;;  %v7158_v19 = vld [vmem:[#allocation5 + $0x1a4] ss:$8 sps:$4 sm:$0xff]  }
 0x25e   : > { %v3891_v58 = vrot.slane %v8797_v28, 1  ;;  %v3958_v41 = vadd.f32 %v3957_v17, %v3956_v51  ;;  %5442 = vmatpush1.bf16.msra.mxu1 %v7150_v12  ;;  %v6484_v21 = vadd.f32 %v9684_v63, %v8734_v14  ;;  %v3122_v46 = vmul.bf16 1056980736, %v7401_v47  ;;  %v9685_v51 = vld [vmem:[#allocation38_spill] sm:$0xff] }
 0x25f   : > { %v3952_v53 = vrot.slane %v3951_v0, 2  ;;  %v3497_v24 = vunpack.c.l.bf16 %v3347_v50  ;;  %v3507_v15 = vunpack.c.h.bf16 %v3347_v50  ;;  %v3498_v13 = vunpack.c.l.bf16 %v3348_v32  ;;  %5443 = vmatprep.subr.bf16.mxu1 %v7155_v56 }
 0x260   : > { %v7403_v44 = vpop.eup %7402  ;;  %v3959_v62 = vrot.slane %v3958_v41, 2  ;;  %v3508_v26 = vunpack.c.h.bf16 %v3348_v32  ;;  %v3201_v39 = vadd.bf16 1056980736, %v3121_v45  ;;  %v8810_v29 = vpack.c.bf16 %v6484_v21, %v6482_v55  ;;  %v7159_v21 = vld [vmem:[#allocation5 + $0x1b0] ss:$8 sps:$4 sm:$0xff]  }
 0x261   : > { %v7405_v22 = vpop.eup %7404  ;;  %v3953_v5 = vadd.f32 %v3952_v53, %v3951_v0  ;;  %v4019_v35 = vadd.f32 %v3507_v15, %v3497_v24  ;;  %v3131_v2 = vmul.bf16 1056980736, %v7403_v44  ;;  %v3202_v12 = vadd.bf16 1056980736, %v3122_v46 }
 0x262   : > { %v4026_v57 = vadd.f32 %v3508_v26, %v3498_v13  ;;  %v3281_v60 = vmul.bf16 %v3201_v39, %v8753_v49  ;;  %5444 = vmatpush1.bf16.msra.mxu1 %v7153_v30  ;;  %v6485_v56 = vadd.f32 %v9685_v51, %v8737_v16  ;;  %v3132_v37 = vmul.bf16 1056980736, %v7405_v22  ;;  %v7407_v31 = vpop.eup %7406 }
 0x263   : > { %v3954_v27 = vrot.slane %v3953_v5, 1  ;;  %v4020_v43 = vrot.slane %v4019_v35, 4  ;;  %5445 = vmatprep.subr.bf16.mxu1 %v7158_v19  ;;  %v3211_v34 = vadd.bf16 1056980736, %v3131_v2  ;;  %v3282_v48 = vmul.bf16 %v3202_v12, %v8759_v52  ;;  %v7164_v52 = vld [vmem:[#allocation5 + $0x1c4] ss:$8 sps:$4 sm:$0xff]  }
 0x264   : > { %v4027_v8 = vrot.slane %v4026_v57, 4  ;;  %v3361_v17 = vunpack.c.l.bf16 %v3281_v60  ;;  %v3371_v55 = vunpack.c.h.bf16 %v3281_v60  ;;  %v8816_v0 = vadd.f32 %v3959_v62, %v3958_v41 }
 0x265   : > { %v4021_v49 = vadd.f32 %v4020_v43, %v4019_v35  ;;  %v3291_v50 = vmul.bf16 %v3211_v34, %v8772_v1  ;;  %v3212_v32 = vadd.bf16 1056980736, %v3132_v37  ;;  %v3362_v30 = vunpack.c.l.bf16 %v3282_v48  ;;  %v7167_v37 = vld [vmem:[#allocation5 + $0x1d4] ss:$8 sps:$4 sm:$0xff]  }
 0x266   : > { %v8819_v45 = vadd.f32 %v4027_v8, %v4026_v57  ;;  %v3557_v47 = vadd.f32 %v3371_v55, %v3361_v17  ;;  %v3372_v63 = vunpack.c.h.bf16 %v3282_v48  ;;  %5446 = vmatpush1.bf16.msra.mxu1 %v7156_v23  ;;  %v7409_v53 = vpop.eup %7408  ;;  %v8822_v41 = vpop.f32.mrb[64].mxu0  ;;  %v8824_v44 = vadd.f32 %v3954_v27, %v3953_v5  ;;  %v7162_v57 = vld [vmem:[#allocation5 + $0x1c0] ss:$8 sps:$4 sm:$0xff]  }
 0x267   : > { %v4022_v24 = vrot.slane %v4021_v49, 2  ;;  %v3381_v15 = vunpack.c.l.bf16 %v3291_v50  ;;  %v3391_v13 = vunpack.c.h.bf16 %v3291_v50  ;;  %v3292_v19 = vmul.bf16 %v3212_v32, %v8774_v18  ;;  %5447 = vmatprep.subr.bf16.mxu1 %v7161_v9  ;;  %v8826_v39 = vpop.f32.mrb[65].mxu0 }
 0x268   : > { %v3558_v1 = vrot.slane %v3557_v47, 4  ;;  %v3564_v62 = vadd.f32 %v3372_v63, %v3362_v30  ;;  %v3141_v26 = vmul.bf16 1056980736, %v7407_v31  ;;  %v4029_v46 = vrot.slane %v8819_v45, 2  ;;  %v8829_v60 = vpop.f32.mrb[66].mxu0 }
 0x269   : > { %v3627_v22 = vadd.f32 %v3391_v13, %v3381_v15  ;;  %v3382_v35 = vunpack.c.l.bf16 %v3292_v19  ;;  %v3392_v2 = vunpack.c.h.bf16 %v3292_v19  ;;  %v3142_v9 = vmul.bf16 1056980736, %v7409_v53  ;;  %v8831_v5 = vpop.f32.mrb[67].mxu0 }
 0x26a   : > { %v3559_v18 = vadd.f32 %v3558_v1, %v3557_v47  ;;  %v3565_v12 = vrot.slane %v3564_v62, 4  ;;  %v3221_v23 = vadd.bf16 1056980736, %v3141_v26  ;;  %5448 = vmatpush1.bf16.msra.mxu1 %v7159_v21  ;;  %v8833_v51 = vadd.f32 %v4022_v24, %v4021_v49  ;;  %v7165_v21 = vld [vmem:[#allocation5 + $0x1d0] ss:$8 sps:$4 sm:$0xff]  }
 0x26b   : > { %v3628_v27 = vrot.slane %v3627_v22, 4  ;;  %v3634_v43 = vadd.f32 %v3392_v2, %v3382_v35  ;;  %5449 = vmatprep.subr.bf16.mxu1 %v7164_v52  ;;  %v2991_v34 = vmul.bf16 1056980736, %v8810_v29  ;;  %v3222_v55 = vadd.bf16 1056980736, %v3142_v9 }
 0x26c   : > { %v3560_v31 = vrot.slane %v3559_v18, 2  ;;  %v3566_v8 = vadd.f32 %v3565_v12, %v3564_v62  ;;  %v3301_v17 = vmul.bf16 %v3221_v23, %v8780_v36  ;;  %v8838_v32 = vpack.c.bf16 %v6485_v56, %v8801_v3  ;;  %v7170_v36 = vld [vmem:[#allocation5 + $0x1e4] ss:$8 sps:$4 sm:$0xff]   ;;  %v7168_v9 = vld [vmem:[#allocation5 + $0x1e0] ss:$8 sps:$4 sm:$0xff]  }
 0x26d   : > { %v3629_v48 = vadd.f32 %v3628_v27, %v3627_v22  ;;  %v3635_v50 = vrot.slane %v3634_v43, 4  ;;  %7410 = vtanh.bf16 %v2991_v34  ;;  %v3302_v15 = vmul.bf16 %v3222_v55, %v8792_v25  ;;  %v9686_v56 = vld [vmem:[#allocation39_spill] sm:$0xff] }
 0x26e   : > { %v3561_v47 = vadd.f32 %v3560_v31, %v3559_v18  ;;  %v3567_v49 = vrot.slane %v3566_v8, 2  ;;  %v3401_v30 = vunpack.c.l.bf16 %v3301_v17  ;;  %v3411_v63 = vunpack.c.h.bf16 %v3301_v17  ;;  %5450 = vmatpush1.bf16.msra.mxu1 %v7162_v57  ;;  %v8842_v19 = vpop.f32.mrb[68].mxu0  ;;  %v9687_v31 = vld [vmem:[#allocation40_spill] sm:$0xff] }
 0x26f   : > { %v3630_v53 = vrot.slane %v3629_v48, 2  ;;  %v3636_v24 = vadd.f32 %v3635_v50, %v3634_v43  ;;  %v2992_v13 = vmul.bf16 1056980736, %v8838_v32  ;;  %5451 = vmatprep.subr.bf16.mxu1 %v7167_v37  ;;  %v6486_v62 = vadd.f32 %v9686_v56, %v8734_v14  ;;  %v8846_v26 = vpop.f32.mrb[69].mxu0  ;;  %v7173_v17 = vld [vmem:[#allocation5 + $0x1f4] ss:$8 sps:$4 sm:$0xff]  }
 0x270   : > { %v3562_v52 = vrot.slane %v3561_v47, 1  ;;  %v3568_v1 = vadd.f32 %v3567_v49, %v3566_v8  ;;  %v3697_v3 = vadd.f32 %v3411_v63, %v3401_v30  ;;  %v3402_v2 = vunpack.c.l.bf16 %v3302_v15  ;;  %v8848_v18 = vpop.f32.mrb[70].mxu0 }
 0x271   : > { %v3631_v22 = vadd.f32 %v3630_v53, %v3629_v48  ;;  %v3637_v35 = vrot.slane %v3636_v24, 2  ;;  %v3412_v57 = vunpack.c.h.bf16 %v3302_v15  ;;  %7412 = vtanh.bf16 %v2992_v13  ;;  %v8850_v27 = vpop.f32.mrb[71].mxu0  ;;  %v9689_v53 = vld [vmem:[#allocation42_spill] sm:$0xff] }
 0x272   : > { %v3563_v25 = vadd.f32 %v3562_v52, %v3561_v47  ;;  %v3569_v12 = vrot.slane %v3568_v1, 1  ;;  %v3698_v23 = vrot.slane %v3697_v3, 4  ;;  %5452 = vmatpush1.bf16.msra.mxu1 %v7165_v21  ;;  %v6487_v8 = vadd.f32 %v9687_v31, %v8737_v16  ;;  %v9688_v47 = vld [vmem:[#allocation41_spill] sm:$0xff] }
 0x273   : > { %v3632_v43 = vrot.slane %v3631_v22, 1  ;;  %v3638_v34 = vadd.f32 %v3637_v35, %v3636_v24  ;;  %v3704_v37 = vadd.f32 %v3412_v57, %v3402_v2  ;;  %5453 = vmatprep.subr.bf16.mxu1 %v7170_v36  ;;  %v6488_v49 = vadd.f32 %v9688_v47, %v8734_v14  ;;  %v7171_v36 = vld [vmem:[#allocation5 + $0x1f0] ss:$8 sps:$4 sm:$0xff]  }
 0x274   : > { %v4081_v55 = vpack.c.bf16 %v3563_v25, %v3563_v25  ;;  %v3570_v48 = vadd.f32 %v3569_v12, %v3568_v1  ;;  %v3699_v50 = vadd.f32 %v3698_v23, %v3697_v3  ;;  %v6489_v15 = vadd.f32 %v9689_v53, %v8737_v16 }
 0x275   : > { %v3633_v30 = vadd.f32 %v3632_v43, %v3631_v22  ;;  %v3639_v63 = vrot.slane %v3638_v34, 1  ;;  %v3705_v21 = vrot.slane %v3704_v37, 4  ;;  %v8858_v56 = vpack.c.bf16 %v6488_v49, %v6486_v62  ;;  %v7176_v22 = vld [vmem:[#allocation5 + $0x204] ss:$8 sps:$4 sm:$0xff]   ;;  %v9691_v49 = vld [vmem:[#allocation44_spill] sm:$0xff] }
 0x276   : > { %v4413_v13 = vunpack.c.l.b16 %v4081_v55  ;;  %v4082_v24 = vpack.c.bf16 %v3570_v48, %v3570_v48  ;;  %v3700_v52 = vrot.slane %v3699_v50, 2  ;;  %5454 = vmatpush1.bf16.msra.mxu1 %v7168_v9  ;;  %v8860_v3 = vpack.c.bf16 %v6489_v15, %v6487_v8  ;;  %v8862_v57 = vpop.f32.mrb[72].mxu0  ;;  %v9690_v62 = vld [vmem:[#allocation43_spill] sm:$0xff] }
 0x277   : > { %v4091_v35 = vpack.c.bf16 %v3633_v30, %v3633_v30  ;;  %v3640_v2 = vadd.f32 %v3639_v63, %v3638_v34  ;;  %v3706_v1 = vadd.f32 %v3705_v21, %v3704_v37  ;;  %5455 = vmatprep.subr.bf16.mxu1 %v7173_v17  ;;  %v3001_v43 = vmul.bf16 1056980736, %v8858_v56  ;;  %v8868_v9 = vpop.f32.mrb[73].mxu0 }
 0x278   : > { %v7411_v25 = vpop.eup %7410  ;;  %v3701_v23 = vadd.f32 %v3700_v52, %v3699_v50  ;;  %v6490_v31 = vadd.f32 %v9690_v62, %v8734_v14  ;;  %v8870_v48 = vpop.f32.mrb[74].mxu0  ;;  %v3002_v47 = vmul.bf16 1056980736, %v8860_v3  ;;  %v6491_v50 = vadd.f32 %v9691_v49, %v8737_v16 }
 0x279   : > { %v4423_v55 = vunpack.c.l.b16 %v4091_v35  ;;  %v4092_v34 = vpack.c.bf16 %v3640_v2, %v3640_v2  ;;  %v3707_v37 = vrot.slane %v3706_v1, 2  ;;  %v3151_v8 = vmul.bf16 1056980736, %v7411_v25  ;;  %v8875_v30 = vpop.f32.mrb[75].mxu0  ;;  %v9694_v35 = vld [vmem:[#allocation45_spill] sm:$0xff]  ;;  %v9695_v25 = vld [vmem:[#allocation46_spill] sm:$0xff] }
 0x27a   : > { %v3702_v17 = vrot.slane %v3701_v23, 1  ;;  %7414 = vtanh.bf16 %v3001_v43  ;;  %5456 = vmatpush1.bf16.msra.mxu1 %v7171_v36  ;;  %v8877_v63 = vunpack.c.l.b16 %v4082_v24  ;;  %v6492_v2 = vadd.f32 %v9694_v35, %v8734_v14  ;;  %v9698_v35 = vld [vmem:[#allocation49_spill] sm:$0xff] }
 0x27b   : > { %v8880_v21 = vsel %vm4487_vm1, %v4423_v55, %v4413_v13  ;;  %v3708_v53 = vadd.f32 %v3707_v37, %v3706_v1  ;;  %v3231_v15 = vadd.bf16 1056980736, %v3151_v8  ;;  %5466 = vmatprep.subr.bf16.mxu1 %v7176_v22  ;;  %7416 = vtanh.bf16 %v3002_v47  ;;  %v9697_v13 = vld [vmem:[#allocation47_spill] sm:$0xff] }
 0x27c   : > { %9692 = vst [vmem:[#allocation15_spill] sm:$0xff] %v8877_v63  ;;  %9693 = vst [vmem:[#allocation16_spill] sm:$0xff] %v8880_v21  ;;  %v3703_v52 = vadd.f32 %v3702_v17, %v3701_v23  ;;  %v6493_v43 = vadd.f32 %v9695_v25, %v8737_v16  ;;  %v7413_v62 = vpop.eup %7412  ;;  %v8886_v36 = vunpack.c.l.b16 %v4092_v34  ;;  %v6494_v55 = vadd.f32 %v9697_v13, %v8734_v14 }
 0x27d   : > { %v3709_v49 = vrot.slane %v3708_v53, 1  ;;  %v3311_v24 = vmul.bf16 %v3231_v15, %v8810_v29  ;;  %v3152_v37 = vmul.bf16 1056980736, %v7413_v62  ;;  %v8891_v22 = vpack.c.bf16 %v6492_v2, %v6490_v31 }
 0x27e   : > { %9696 = vst [vmem:[#allocation19_spill] sm:$0xff] %v8886_v36  ;;  %v4101_v1 = vpack.c.bf16 %v3703_v52, %v3703_v52  ;;  %v8893_v23 = vpack.c.bf16 %v6493_v43, %v6491_v50  ;;  %v6496_v34 = vadd.f32 %v9698_v35, %v8734_v14  ;;  %v8899_v25 = vpop.f32.mrb[76].mxu0  ;;  %v9699_v52 = vld [vmem:[#allocation48_spill] sm:$0xff]  ;;  %v9701_v43 = vld [vmem:[#allocation50_spill] sm:$0xff] }
 0x27f   : > { %v8895_v8 = vadd.f32 %v3709_v49, %v3708_v53  ;;  %v3421_v17 = vunpack.c.l.bf16 %v3311_v24  ;;  %v3431_v47 = vunpack.c.h.bf16 %v3311_v24  ;;  %v3232_v12 = vadd.bf16 1056980736, %v3152_v37  ;;  %v8911_v49 = vpop.f32.mrb[77].mxu0 }
 0x280   : > { %v3011_v29 = vmul.bf16 1056980736, %v8891_v22  ;;  %v3012_v15 = vmul.bf16 1056980736, %v8893_v23  ;;  %v6495_v31 = vadd.f32 %v9699_v52, %v8737_v16  ;;  %v8905_v2 = vunpack.c.l.b16 %v4101_v1  ;;  %v8919_v1 = vpop.f32.mrb[78].mxu0 }
 0x281   : > { %v3767_v50 = vadd.f32 %v3431_v47, %v3421_v17  ;;  %v8907_v53 = vpack.c.bf16 %v6496_v34, %v6494_v55  ;;  %v6497_v62 = vadd.f32 %v9701_v43, %v8737_v16  ;;  %v4102_v24 = vpack.c.bf16 %v8895_v8, %v8895_v8  ;;  %v9702_v47 = vld [vmem:[#allocation13_spill] sm:$0xff]  ;;  %v8926_v34 = vpop.f32.mrb[79].mxu0 }
 0x282   : > { %9700 = vst [vmem:[#allocation20_spill] sm:$0xff] %v8905_v2  ;;  %v3312_v13 = vmul.bf16 %v3232_v12, %v8838_v32  ;;  %7418 = vtanh.bf16 %v3011_v29  ;;  %v3892_v37 = vadd.f32 %v3891_v58, %v8797_v28  ;;  %v8924_v35 = vadd.f32 %v9702_v47, %v8734_v14 }
 0x283   : > { %v3768_v17 = vrot.slane %v3767_v50, 4  ;;  %7420 = vtanh.bf16 %v3012_v15  ;;  %v3021_v55 = vmul.bf16 1056980736, %v8907_v53  ;;  %v8928_v32 = vpack.c.bf16 %v6497_v62, %v6495_v31 }
 0x284   : > { %v3422_v8 = vunpack.c.l.bf16 %v3312_v13  ;;  %v3432_v52 = vunpack.c.h.bf16 %v3312_v13  ;;  %v3961_v12 = vrot.slane %v8816_v0, 1  ;;  %v4030_v58 = vadd.f32 %v4029_v46, %v8819_v45 }
 0x285   : > { %v7415_v29 = vpop.eup %7414  ;;  %v3769_v28 = vadd.f32 %v3768_v17, %v3767_v50  ;;  %7422 = vtanh.bf16 %v3021_v55  ;;  %v4128_v15 = vpack.c.bf16 %v3892_v37, %v3892_v37  ;;  %v3022_v47 = vmul.bf16 1056980736, %v8928_v32 }
 0x286   : > { %v3774_v43 = vadd.f32 %v3432_v52, %v3422_v8  ;;  %v3161_v2 = vmul.bf16 1056980736, %v7415_v29  ;;  %v3962_v21 = vadd.f32 %v3961_v12, %v8816_v0  ;;  %v7417_v36 = vpop.eup %7416  ;;  %v4031_v31 = vrot.slane %v4030_v58, 1  ;;  %v8939_v17 = vpop.f32.mrb[80].mxu0 }
 0x287   : > { %v3770_v13 = vrot.slane %v3769_v28, 2  ;;  %v4460_v62 = vunpack.c.l.b16 %v4128_v15  ;;  %v4516_v50 = vsel %vm4489_vm2, %v8683_v38, %v8722_v7  ;;  %v3162_v45 = vmul.bf16 1056980736, %v7417_v36  ;;  %v8941_v46 = vpop.f32.mrb[81].mxu0 }
 0x288   : > { %v3775_v55 = vrot.slane %v3774_v43, 4  ;;  %v3241_v63 = vadd.bf16 1056980736, %v3161_v2  ;;  %7424 = vtanh.bf16 %v3022_v47  ;;  %9703 = vst [vmem:[#allocation22_spill] sm:$0xff] %v8941_v46  ;;  %v4032_v8 = vadd.f32 %v4031_v31, %v4030_v58  ;;  %v8945_v12 = vpop.f32.mrb[82].mxu0 }
 0x289   : > { %v3771_v37 = vadd.f32 %v3770_v13, %v3769_v28  ;;  %v4138_v52 = vpack.c.bf16 %v3962_v21, %v3962_v21  ;;  %v4517_v0 = vsel %vm4491_vm3, %v8714_v4, %v4516_v50  ;;  %v3242_v38 = vadd.bf16 1056980736, %v3162_v45  ;;  %v8950_v2 = vpop.f32.mrb[83].mxu0 }
 0x28a   : > { %v3776_v29 = vadd.f32 %v3775_v55, %v3774_v43  ;;  %v3321_v15 = vmul.bf16 %v3241_v63, %v8858_v56  ;;  %v4518_v7 = vsel %vm4493_vm4, %v8788_v61, %v4517_v0  ;;  %9704 = vst [vmem:[#allocation21_spill] sm:$0xff] %v8950_v2  ;;  %v4148_v47 = vpack.c.bf16 %v4032_v8, %v4032_v8 }
 0x28b   : > { %v3772_v36 = vrot.slane %v3771_v37, 1  ;;  %v4470_v46 = vunpack.c.l.b16 %v4138_v52  ;;  %v4519_v28 = vsel %vm4495_vm5, %v4460_v62, %v4518_v7  ;;  %v3322_v4 = vmul.bf16 %v3242_v38, %v8860_v3 }
 0x28c   : > { %v3777_v21 = vrot.slane %v3776_v29, 2  ;;  %v3441_v58 = vunpack.c.l.bf16 %v3321_v15  ;;  %v3451_v13 = vunpack.c.h.bf16 %v3321_v15  ;;  %v8954_v43 = vunpack.c.l.b16 %v4102_v24 }
 0x28d   : > { %v7419_v31 = vpop.eup %7418  ;;  %v3773_v56 = vadd.f32 %v3772_v36, %v3771_v37  ;;  %v4480_v63 = vunpack.c.l.b16 %v4148_v47  ;;  %v4520_v50 = vsel %vm4497_vm6, %v4470_v46, %v4519_v28  ;;  %v3442_v0 = vunpack.c.l.bf16 %v3322_v4 }
 0x28e   : > { %9705 = vst [vmem:[#allocation23_spill] sm:$0xff] %v8954_v43  ;;  %v7421_v61 = vpop.eup %7420  ;;  %v3778_v55 = vadd.f32 %v3777_v21, %v3776_v29  ;;  %v3837_v45 = vadd.f32 %v3451_v13, %v3441_v58  ;;  %v3452_v8 = vunpack.c.h.bf16 %v3322_v4  ;;  %v3171_v2 = vmul.bf16 1056980736, %v7419_v31  ;;  %v8958_v15 = vpop.f32.mrb[84].mxu0 }
 0x28f   : > { %v4111_v52 = vpack.c.bf16 %v3773_v56, %v3773_v56  ;;  %v3172_v62 = vmul.bf16 1056980736, %v7421_v61  ;;  %v4521_v7 = vsel %vm4499_vm7, %v4480_v63, %v4520_v50  ;;  %v8960_v36 = vpop.f32.mrb[85].mxu0  ;;  %v8964_v28 = vadd.f32 %v8609_v33, %v8737_v16 }
 0x290   : > { %v7423_v3 = vpop.eup %7422  ;;  %v3779_v38 = vrot.slane %v3778_v55, 1  ;;  %v3838_v24 = vrot.slane %v3837_v45, 4  ;;  %v3844_v43 = vadd.f32 %v3452_v8, %v3442_v0  ;;  %v4567_v37 = vpack.c.b16 %v4521_v7, %v4521_v7  ;;  %v8968_v31 = vpop.f32.mrb[86].mxu0 }
 0x291   : > { %v3251_v46 = vadd.bf16 1056980736, %v3171_v2  ;;  %v3252_v47 = vadd.bf16 1056980736, %v3172_v62  ;;  %v3181_v29 = vmul.bf16 1056980736, %v7423_v3  ;;  %v8966_v21 = vunpack.c.l.b16 %v4111_v52 }
 0x292   : > { %v3780_v58 = vadd.f32 %v3779_v38, %v3778_v55  ;;  %v3839_v13 = vadd.f32 %v3838_v24, %v3837_v45  ;;  %v3845_v4 = vrot.slane %v3844_v43, 4  ;;  %5457 = vmatprep.mubr.bf16.mxu1 %v4567_v37  ;;  %v9707_v61 = vrot.slane %v8833_v51, 1  ;;  %v8975_v33 = vpop.f32.mrb[87].mxu0 }
 0x293   : > { %9706 = vst [vmem:[#allocation24_spill] sm:$0xff] %v8966_v21  ;;  %v7425_v56 = vpop.eup %7424  ;;  %v3331_v63 = vmul.bf16 %v3251_v46, %v8891_v22  ;;  %v3332_v50 = vmul.bf16 %v3252_v47, %v8893_v23  ;;  %v3261_v2 = vadd.bf16 1056980736, %v3181_v29  ;;  %v4137_v23 = vpack.c.bf16 %v8824_v44, %v8824_v44 }
 0x294   : > { %v4025_v0 = vadd.f32 %v9707_v61, %v8833_v51  ;;  %v4112_v8 = vpack.c.bf16 %v3780_v58, %v3780_v58  ;;  %v3840_v52 = vrot.slane %v3839_v13, 2  ;;  %v3846_v55 = vadd.f32 %v3845_v4, %v3844_v43 }
 0x295   : > { %v3182_v45 = vmul.bf16 1056980736, %v7425_v56  ;;  %v3461_v62 = vunpack.c.l.bf16 %v3331_v63  ;;  %v3471_v7 = vunpack.c.h.bf16 %v3331_v63  ;;  %v3462_v3 = vunpack.c.l.bf16 %v3332_v50 }
 0x296   : > { %v3472_v38 = vunpack.c.h.bf16 %v3332_v50  ;;  %v3841_v24 = vadd.f32 %v3840_v52, %v3839_v13  ;;  %v3847_v37 = vrot.slane %v3846_v55, 2  ;;  %v3341_v22 = vmul.bf16 %v3261_v2, %v8907_v53  ;;  %v8980_v61 = vpop.f32.mrb[88].mxu0 }
 0x297   : > { %v3907_v46 = vadd.f32 %v3471_v7, %v3461_v62  ;;  %v3262_v51 = vadd.bf16 1056980736, %v3182_v45  ;;  %v4147_v29 = vpack.c.bf16 %v4025_v0, %v4025_v0  ;;  %v8982_v63 = vpop.f32.mrb[89].mxu0  ;;  %v8984_v50 = vunpack.c.l.b16 %v4112_v8 }
 0x298   : > { %v3914_v47 = vadd.f32 %v3472_v38, %v3462_v3  ;;  %v3842_v58 = vrot.slane %v3841_v24, 1  ;;  %v3848_v43 = vadd.f32 %v3847_v37, %v3846_v55  ;;  %v3481_v4 = vunpack.c.l.bf16 %v3341_v22  ;;  %9708 = vst [vmem:[#allocation25_spill] sm:$0xff] %v8982_v63  ;;  %v8987_v2 = vpop.f32.mrb[90].mxu0 }
 0x299   : > { %v3491_v56 = vunpack.c.h.bf16 %v3341_v22  ;;  %9709 = vst [vmem:[#allocation26_spill] sm:$0xff] %v8984_v50  ;;  %v3908_v13 = vrot.slane %v3907_v46, 4  ;;  %v3342_v53 = vmul.bf16 %v3262_v51, %v8928_v32  ;;  %v4469_v0 = vunpack.c.l.b16 %v4137_v23  ;;  %v8989_v7 = vpop.f32.mrb[91].mxu0 }
 0x29a   : > { %v3915_v52 = vrot.slane %v3914_v47, 4  ;;  %v3843_v44 = vadd.f32 %v3842_v58, %v3841_v24  ;;  %v3849_v62 = vrot.slane %v3848_v43, 1  ;;  %v4479_v8 = vunpack.c.l.b16 %v4147_v29 }
 0x29b   : > { %v3977_v45 = vadd.f32 %v3491_v56, %v3481_v4  ;;  %v3909_v3 = vadd.f32 %v3908_v13, %v3907_v46  ;;  %v3482_v38 = vunpack.c.l.bf16 %v3342_v53  ;;  %v3492_v37 = vunpack.c.h.bf16 %v3342_v53 }
 0x29c   : > { %v3916_v55 = vadd.f32 %v3915_v52, %v3914_v47  ;;  %v3850_v22 = vadd.f32 %v3849_v62, %v3848_v43  ;;  %v4509_v50 = vsel %vm4489_vm2, %v8656_v6, %v8592_v59  ;;  %v4121_v23 = vpack.c.bf16 %v3843_v44, %v3843_v44  ;;  %v9710_v52 = vld [vmem:[#allocation14_spill] sm:$0xff] }
 0x29d   : > { %v3978_v21 = vrot.slane %v3977_v45, 4  ;;  %v3910_v32 = vrot.slane %v3909_v3, 2  ;;  %v3984_v63 = vadd.f32 %v3492_v37, %v3482_v38  ;;  %v4510_v24 = vsel %vm4491_vm3, %v8693_v54, %v4509_v50  ;;  %v7179_v38 = vld [vmem:[#allocation5 + $0x214] ss:$8 sps:$4 sm:$0xff]  }
 0x29e   : > { %v3917_v51 = vrot.slane %v3916_v55, 2  ;;  %v4122_v58 = vpack.c.bf16 %v3850_v22, %v3850_v22  ;;  %v4511_v46 = vsel %vm4493_vm4, %v8739_v10, %v4510_v24  ;;  %v9000_v13 = vpop.f32.mrb[92].mxu0  ;;  %v6500_v54 = vadd.f32 %v9710_v52, %v8734_v14 }
 0x29f   : > { %v3979_v4 = vadd.f32 %v3978_v21, %v3977_v45  ;;  %v3911_v47 = vadd.f32 %v3910_v32, %v3909_v3  ;;  %v3985_v56 = vrot.slane %v3984_v63, 4  ;;  %v4512_v29 = vsel %vm4495_vm5, %v8805_v42, %v4511_v46  ;;  %v9007_v50 = vpop.f32.mrb[93].mxu0  ;;  %v7174_v45 = vld [vmem:[#allocation5 + $0x200] ss:$8 sps:$4 sm:$0xff]  }
 0x2a0   : > { %v3918_v43 = vadd.f32 %v3917_v51, %v3916_v55  ;;  %v4513_v6 = vsel %vm4497_vm6, %v4469_v0, %v4512_v29  ;;  %v6501_v21 = vadd.f32 %v8702_v11, %v8737_v16  ;;  %v9010_v42 = vpop.f32.mrb[94].mxu0  ;;  %v9013_v0 = vpack.c.bf16 %v6500_v54, %v8924_v35 }
 0x2a1   : > { %v3980_v59 = vrot.slane %v3979_v4, 2  ;;  %v3912_v10 = vrot.slane %v3911_v47, 1  ;;  %v3986_v44 = vadd.f32 %v3985_v56, %v3984_v63  ;;  %v4514_v62 = vsel %vm4499_vm7, %v4479_v8, %v4513_v6  ;;  %v9018_v11 = vpop.f32.mrb[95].mxu0 }
 0x2a2   : > { %v3919_v53 = vrot.slane %v3918_v43, 1  ;;  %v4566_v55 = vpack.c.b16 %v4514_v62, %v4514_v62  ;;  %v9016_v14 = vpack.c.bf16 %v6501_v21, %v8964_v28  ;;  %v568_v63 = vsub.s32 4, %v9673_v40 }
 0x2a3   : > { %v3981_v3 = vadd.f32 %v3980_v59, %v3979_v4  ;;  %v9020_v16 = vadd.f32 %v3912_v10, %v3911_v47  ;;  %v3987_v37 = vrot.slane %v3986_v44, 2  ;;  %v572_v22 = vsub.s32 5, %v9673_v40  ;;  %v7177_v40 = vld [vmem:[#allocation5 + $0x210] ss:$8 sps:$4 sm:$0xff]  }
 0x2a4   : > { %5458 = vmatmul.mubr.bf16.vlgmr.msra.gmra.mrb[64].mxu1 %v4566_v55  ;;  %v3031_v32 = vmul.bf16 1056980736, %v9013_v0  ;;  %v3032_v35 = vmul.bf16 1056980736, %v9016_v14  ;;  %v9026_v51 = vadd.f32 %v3919_v53, %v3918_v43  ;;  %v9028_v28 = vunpack.c.l.b16 %v4121_v23  ;;  %v7182_v43 = vld [vmem:[#allocation5 + $0x224] ss:$8 sps:$4 sm:$0xff]  }
 0x2a5   : > { %v3982_v8 = vrot.slane %v3981_v3, 1  ;;  %v4131_v24 = vpack.c.bf16 %v9020_v16, %v9020_v16  ;;  %v9033_v4 = vrot.slane %v8731_v20, %v568_v63  ;;  %v9036_v46 = vrot.slane %v8731_v20, %v572_v22  ;;  %5467 = vmatpush1.bf16.msra.mxu1 %v7174_v45 }
 0x2a6   : > { %v9040_v56 = vadd.f32 %v3987_v37, %v3986_v44  ;;  %7426 = vtanh.bf16 %v3031_v32  ;;  %5468 = vmatprep.subr.bf16.mxu1 %v7179_v38  ;;  %v4132_v23 = vpack.c.bf16 %v9026_v51, %v9026_v51  ;;  %v9048_v59 = vunpack.c.l.b16 %v4122_v58 }
 0x2a7   : > { %v9038_v47 = vadd.f32 %v3982_v8, %v3981_v3  ;;  %7428 = vtanh.bf16 %v3032_v35  ;;  %v6438_v29 = vadd.f32 %v8822_v41, %v9033_v4  ;;  %v6439_v20 = vadd.f32 %v8826_v39, %v9036_v46  ;;  %v7188_v8 = vld [vmem:[#allocation5 + $0x244] ss:$8 sps:$4 sm:$0xff]  }
 0x2a8   : > { %v6440_v6 = vadd.f32 %v8829_v60, %v9033_v4  ;;  %v6441_v52 = vadd.f32 %v8831_v5, %v9036_v46  ;;  %v6442_v54 = vadd.f32 %v8842_v19, %v9033_v4  ;;  %v6443_v21 = vadd.f32 %v8846_v26, %v9036_v46  ;;  %v7180_v5 = vld [vmem:[#allocation5 + $0x220] ss:$8 sps:$4 sm:$0xff]  }
 0x2a9   : > { %v6444_v41 = vadd.f32 %v8848_v18, %v9033_v4  ;;  %v6445_v39 = vadd.f32 %v8850_v27, %v9036_v46  ;;  %v6446_v58 = vadd.f32 %v8862_v57, %v9033_v4  ;;  %v6447_v60 = vadd.f32 %v8868_v9, %v9036_v46  ;;  %5469 = vmatpush1.bf16.msra.mxu1 %v7177_v40  ;;  %v7185_v27 = vld [vmem:[#allocation5 + $0x234] ss:$8 sps:$4 sm:$0xff]  }
 0x2aa   : > { %v9066_v10 = vpack.c.bf16 %v6440_v6, %v6438_v29  ;;  %v9068_v19 = vpack.c.bf16 %v6441_v52, %v6439_v20  ;;  %v6448_v26 = vadd.f32 %v8870_v48, %v9033_v4  ;;  %v6449_v18 = vadd.f32 %v8875_v30, %v9036_v46  ;;  %5470 = vmatprep.subr.bf16.mxu1 %v7182_v43  ;;  %v9712_v43 = vld [vmem:[#allocation21_spill] sm:$0xff] }
 0x2ab   : > { %v9074_v53 = vpack.c.bf16 %v6444_v41, %v6442_v54  ;;  %v9076_v57 = vpack.c.bf16 %v6445_v39, %v6443_v21  ;;  %v6450_v9 = vadd.f32 %v8899_v25, %v9033_v4  ;;  %v6451_v44 = vadd.f32 %v8911_v49, %v9036_v46  ;;  %v7183_v49 = vld [vmem:[#allocation5 + $0x230] ss:$8 sps:$4 sm:$0xff]   ;;  %v7186_v21 = vld [vmem:[#allocation5 + $0x240] ss:$8 sps:$4 sm:$0xff]  }
 0x2ac   : > { %v2959_v62 = vmul.bf16 1056980736, %v9066_v10  ;;  %v2960_v45 = vmul.bf16 1056980736, %v9068_v19  ;;  %v9084_v48 = vpack.c.bf16 %v6448_v26, %v6446_v58  ;;  %v9086_v3 = vpack.c.bf16 %v6449_v18, %v6447_v60 }
 0x2ad   : > { %v2969_v30 = vmul.bf16 1056980736, %v9074_v53  ;;  %v2970_v55 = vmul.bf16 1056980736, %v9076_v57  ;;  %v6452_v38 = vadd.f32 %v8919_v1, %v9033_v4  ;;  %v6453_v25 = vadd.f32 %v8926_v34, %v9036_v46  ;;  %5471 = vmatpush1.bf16.msra.mxu1 %v7180_v5  ;;  %v9711_v1 = vld [vmem:[#allocation22_spill] sm:$0xff] }
 0x2ae   : > { %7430 = vtanh.bf16 %v2959_v62  ;;  %v2979_v37 = vmul.bf16 1056980736, %v9084_v48  ;;  %v2980_v63 = vmul.bf16 1056980736, %v9086_v3  ;;  %v6454_v22 = vadd.f32 %v8939_v17, %v9033_v4  ;;  %5472 = vmatprep.subr.bf16.mxu1 %v7185_v27 }
 0x2af   : > { %7432 = vtanh.bf16 %v2960_v45  ;;  %v9098_v32 = vpack.c.bf16 %v6452_v38, %v6450_v9  ;;  %v9100_v35 = vpack.c.bf16 %v6453_v25, %v6451_v44  ;;  %v6455_v34 = vadd.f32 %v9711_v1, %v9036_v46  ;;  %v7189_v45 = vld [vmem:[#allocation5 + $0x250] ss:$8 sps:$4 sm:$0xff]   ;;  %v7192_v1 = vld [vmem:[#allocation5 + $0x260] ss:$8 sps:$4 sm:$0xff]  }
 0x2b0   : > { %7434 = vtanh.bf16 %v2969_v30  ;;  %v6456_v40 = vadd.f32 %v8945_v12, %v9033_v4  ;;  %v6457_v29 = vadd.f32 %v9712_v43, %v9036_v46  ;;  %v6458_v17 = vadd.f32 %v8958_v15, %v9033_v4  ;;  %v7191_v15 = vld [vmem:[#allocation5 + $0x254] ss:$8 sps:$4 sm:$0xff]  }
 0x2b1   : > { %v7427_v20 = vpop.eup %7426  ;;  %7436 = vtanh.bf16 %v2970_v55  ;;  %v2989_v6 = vmul.bf16 1056980736, %v9098_v32  ;;  %v2990_v52 = vmul.bf16 1056980736, %v9100_v35  ;;  %v6459_v54 = vadd.f32 %v8960_v36, %v9036_v46  ;;  %5473 = vmatpush1.bf16.msra.mxu1 %v7183_v49  ;;  %v7194_v55 = vld [vmem:[#allocation5 + $0x264] ss:$8 sps:$4 sm:$0xff]  }
 0x2b2   : > { %v7429_v41 = vpop.eup %7428  ;;  %v3191_v39 = vmul.bf16 1056980736, %v7427_v20  ;;  %7438 = vtanh.bf16 %v2979_v37  ;;  %v9114_v12 = vpack.c.bf16 %v6456_v40, %v6454_v22  ;;  %v9116_v58 = vpack.c.bf16 %v6457_v29, %v6455_v34  ;;  %5474 = vmatprep.subr.bf16.mxu1 %v7188_v8  ;;  %v9713_v8 = vld [vmem:[#allocation25_spill] sm:$0xff] }
 0x2b3   : > { %v3192_v60 = vmul.bf16 1056980736, %v7429_v41  ;;  %7440 = vtanh.bf16 %v2980_v63  ;;  %v6460_v5 = vadd.f32 %v8968_v31, %v9033_v4  ;;  %v6461_v26 = vadd.f32 %v8975_v33, %v9036_v46 }
 0x2b4   : > { %v3271_v36 = vadd.bf16 1056980736, %v3191_v39  ;;  %7442 = vtanh.bf16 %v2989_v6  ;;  %v2999_v18 = vmul.bf16 1056980736, %v9114_v12  ;;  %v3000_v27 = vmul.bf16 1056980736, %v9116_v58 }
 0x2b5   : > { %v3272_v9 = vadd.bf16 1056980736, %v3192_v60  ;;  %7444 = vtanh.bf16 %v2990_v52  ;;  %v9124_v44 = vpack.c.bf16 %v6460_v5, %v6458_v17  ;;  %v9126_v62 = vpack.c.bf16 %v6461_v26, %v6459_v54  ;;  %5475 = vmatpush1.bf16.msra.mxu1 %v7186_v21  ;;  %v7195_v54 = vld [vmem:[#allocation5 + $0x270] ss:$8 sps:$4 sm:$0xff]  }
 0x2b6   : > { %v9131_v31 = vunpack.c.l.b16 %v4131_v24  ;;  %v3351_v33 = vmul.bf16 %v3271_v36, %v9013_v0  ;;  %7446 = vtanh.bf16 %v2999_v18  ;;  %v6462_v30 = vadd.f32 %v8980_v61, %v9033_v4  ;;  %5476 = vmatprep.subr.bf16.mxu1 %v7191_v15 }
 0x2b7   : > { %v3352_v38 = vmul.bf16 %v3272_v9, %v9016_v14  ;;  %7448 = vtanh.bf16 %v3000_v27  ;;  %v3009_v25 = vmul.bf16 1056980736, %v9124_v44  ;;  %v3010_v49 = vmul.bf16 1056980736, %v9126_v62 }
 0x2b8   : > { %v3501_v37 = vunpack.c.l.bf16 %v3351_v33  ;;  %v3511_v63 = vunpack.c.h.bf16 %v3351_v33  ;;  %v6464_v16 = vadd.f32 %v8987_v2, %v9033_v4  ;;  %v6465_v0 = vadd.f32 %v8989_v7, %v9036_v46  ;;  %v7197_v7 = vld [vmem:[#allocation5 + $0x274] ss:$8 sps:$4 sm:$0xff]  }
 0x2b9   : > { %v7431_v24 = vpop.eup %7430  ;;  %v3502_v22 = vunpack.c.l.bf16 %v3352_v38  ;;  %v3512_v61 = vunpack.c.h.bf16 %v3352_v38  ;;  %7450 = vtanh.bf16 %v3009_v25  ;;  %v6463_v14 = vadd.f32 %v9713_v8, %v9036_v46  ;;  %5477 = vmatpush1.bf16.msra.mxu1 %v7189_v45 }
 0x2ba   : > { %v7433_v34 = vpop.eup %7432  ;;  %v4047_v40 = vadd.f32 %v3511_v63, %v3501_v37  ;;  %v3119_v43 = vmul.bf16 1056980736, %v7431_v24  ;;  %v9145_v29 = vpack.c.bf16 %v6464_v16, %v6462_v30  ;;  %v9149_v2 = vadd.f32 %v9000_v13, %v9033_v4  ;;  %5478 = vmatprep.subr.bf16.mxu1 %v7194_v55  ;;  %v7200_v55 = vld [vmem:[#allocation5 + $0x284] ss:$8 sps:$4 sm:$0xff]  }
 0x2bb   : > { %v7435_v17 = vpop.eup %7434  ;;  %v4054_v20 = vadd.f32 %v3512_v61, %v3502_v22  ;;  %v3120_v6 = vmul.bf16 1056980736, %v7433_v34  ;;  %7452 = vtanh.bf16 %v3010_v49  ;;  %v9151_v52 = vpack.c.bf16 %v6465_v0, %v6463_v14 }
 0x2bc   : > { %v7437_v21 = vpop.eup %7436  ;;  %v4048_v41 = vrot.slane %v4047_v40, 4  ;;  %v3199_v39 = vadd.bf16 1056980736, %v3119_v43  ;;  %v3129_v15 = vmul.bf16 1056980736, %v7435_v17  ;;  %v9155_v60 = vadd.f32 %v9007_v50, %v9036_v46 }
 0x2bd   : > { %v7439_v5 = vpop.eup %7438  ;;  %v4055_v13 = vrot.slane %v4054_v20, 4  ;;  %v3200_v26 = vadd.bf16 1056980736, %v3120_v6  ;;  %v3130_v36 = vmul.bf16 1056980736, %v7437_v21  ;;  %v9159_v18 = vadd.f32 %v9010_v42, %v9033_v4  ;;  %5479 = vmatpush1.bf16.msra.mxu1 %v7192_v1 }
 0x2be   : > { %v7441_v27 = vpop.eup %7440  ;;  %v4049_v9 = vadd.f32 %v4048_v41, %v4047_v40  ;;  %v3279_v45 = vmul.bf16 %v3199_v39, %v9066_v10  ;;  %v3209_v33 = vadd.bf16 1056980736, %v3129_v15  ;;  %v3139_v30 = vmul.bf16 1056980736, %v7439_v5  ;;  %5480 = vmatprep.subr.bf16.mxu1 %v7197_v7 }
 0x2bf   : > { %v7443_v38 = vpop.eup %7442  ;;  %v9162_v50 = vadd.f32 %v4055_v13, %v4054_v20  ;;  %v3280_v25 = vmul.bf16 %v3200_v26, %v9068_v19  ;;  %v3210_v49 = vadd.bf16 1056980736, %v3130_v36  ;;  %v3140_v37 = vmul.bf16 1056980736, %v7441_v27  ;;  %v7198_v19 = vld [vmem:[#allocation5 + $0x280] ss:$8 sps:$4 sm:$0xff]  }
 0x2c0   : > { %v7445_v63 = vpop.eup %7444  ;;  %v4050_v16 = vrot.slane %v4049_v9, 2  ;;  %v3359_v42 = vunpack.c.l.bf16 %v3279_v45  ;;  %v3369_v4 = vunpack.c.h.bf16 %v3279_v45  ;;  %v3289_v0 = vmul.bf16 %v3209_v33, %v9074_v53  ;;  %v7203_v53 = vld [vmem:[#allocation5 + $0x294] ss:$8 sps:$4 sm:$0xff]   ;;  %v7201_v13 = vld [vmem:[#allocation5 + $0x290] ss:$8 sps:$4 sm:$0xff]  }
 0x2c1   : > { %v9166_v24 = vpop.eup %7446  ;;  %v3360_v10 = vunpack.c.l.bf16 %v3280_v25  ;;  %v3370_v22 = vunpack.c.h.bf16 %v3280_v25  ;;  %v3290_v61 = vmul.bf16 %v3210_v49, %v9076_v57  ;;  %v9171_v8 = vadd.f32 %v9018_v11, %v9036_v46  ;;  %5481 = vmatpush1.bf16.msra.mxu1 %v7195_v54 }
 0x2c2   : > { %v9173_v14 = vpop.eup %7448  ;;  %v4057_v1 = vrot.slane %v9162_v50, 2  ;;  %v3543_v34 = vadd.f32 %v3369_v4, %v3359_v42  ;;  %v3379_v40 = vunpack.c.l.bf16 %v3289_v0  ;;  %v3389_v43 = vunpack.c.h.bf16 %v3289_v0  ;;  %5482 = vmatprep.subr.bf16.mxu1 %v7200_v55 }
 0x2c3   : > { %v3550_v7 = vadd.f32 %v3370_v22, %v3360_v10  ;;  %v3380_v17 = vunpack.c.l.bf16 %v3290_v61  ;;  %v3390_v20 = vunpack.c.h.bf16 %v3290_v61  ;;  %v3219_v6 = vadd.bf16 1056980736, %v3139_v30  ;;  %v7204_v22 = vld [vmem:[#allocation5 + $0x2a0] ss:$8 sps:$4 sm:$0xff]  }
 0x2c4   : > { %v9176_v57 = vpop.eup %7450  ;;  %v9178_v21 = vadd.f32 %v4050_v16, %v4049_v9  ;;  %v3544_v11 = vrot.slane %v3543_v34, 4  ;;  %v3613_v46 = vadd.f32 %v3389_v43, %v3379_v40  ;;  %v3220_v54 = vadd.bf16 1056980736, %v3140_v37  ;;  %v7206_v9 = vld [vmem:[#allocation5 + $0x2a4] ss:$8 sps:$4 sm:$0xff]  }
 0x2c5   : > { %v3551_v41 = vrot.slane %v3550_v7, 4  ;;  %v3620_v39 = vadd.f32 %v3390_v20, %v3380_v17  ;;  %v3299_v15 = vmul.bf16 %v3219_v6, %v9084_v48  ;;  %v3149_v5 = vmul.bf16 1056980736, %v7443_v38  ;;  %5483 = vmatpush1.bf16.msra.mxu1 %v7198_v19 }
 0x2c6   : > { %v9181_v26 = vpop.eup %7452  ;;  %v3545_v36 = vadd.f32 %v3544_v11, %v3543_v34  ;;  %v3614_v27 = vrot.slane %v3613_v46, 4  ;;  %v3300_v45 = vmul.bf16 %v3220_v54, %v9086_v3  ;;  %v3150_v33 = vmul.bf16 1056980736, %v7445_v63  ;;  %5484 = vmatprep.subr.bf16.mxu1 %v7203_v53  ;;  %v7209_v34 = vld [vmem:[#allocation5 + $0x2b4] ss:$8 sps:$4 sm:$0xff]  }
 0x2c7   : > { %v3552_v30 = vadd.f32 %v3551_v41, %v3550_v7  ;;  %v3621_v55 = vrot.slane %v3620_v39, 4  ;;  %v3399_v25 = vunpack.c.l.bf16 %v3299_v15  ;;  %v3409_v49 = vunpack.c.h.bf16 %v3299_v15  ;;  %v7207_v15 = vld [vmem:[#allocation5 + $0x2b0] ss:$8 sps:$4 sm:$0xff]  }
 0x2c8   : > { %v3546_v37 = vrot.slane %v3545_v36, 2  ;;  %v3615_v16 = vadd.f32 %v3614_v27, %v3613_v46  ;;  %v3400_v42 = vunpack.c.l.bf16 %v3300_v45  ;;  %v3410_v48 = vunpack.c.h.bf16 %v3300_v45  ;;  %v7212_v45 = vld [vmem:[#allocation5 + $0x2c4] ss:$8 sps:$4 sm:$0xff]  }
 0x2c9   : > { %v3553_v38 = vrot.slane %v3552_v30, 2  ;;  %v3622_v4 = vadd.f32 %v3621_v55, %v3620_v39  ;;  %v3683_v0 = vadd.f32 %v3409_v49, %v3399_v25  ;;  %v3229_v10 = vadd.bf16 1056980736, %v3149_v5  ;;  %5485 = vmatpush1.bf16.msra.mxu1 %v7201_v13 }
 0x2ca   : > { %v3547_v61 = vadd.f32 %v3546_v37, %v3545_v36  ;;  %v3616_v19 = vrot.slane %v3615_v16, 2  ;;  %v3690_v3 = vadd.f32 %v3410_v48, %v3400_v42  ;;  %v3230_v63 = vadd.bf16 1056980736, %v3150_v33  ;;  %5486 = vmatprep.subr.bf16.mxu1 %v7206_v9 }
 0x2cb   : > { %v3554_v40 = vadd.f32 %v3553_v38, %v3552_v30  ;;  %v3623_v43 = vrot.slane %v3622_v4, 2  ;;  %v3684_v53 = vrot.slane %v3683_v0, 4  ;;  %v3309_v7 = vmul.bf16 %v3229_v10, %v9098_v32  ;;  %v7210_v38 = vld [vmem:[#allocation5 + $0x2c0] ss:$8 sps:$4 sm:$0xff]  }
 0x2cc   : > { %v3548_v17 = vrot.slane %v3547_v61, 1  ;;  %v3617_v20 = vadd.f32 %v3616_v19, %v3615_v16  ;;  %v3691_v6 = vrot.slane %v3690_v3, 4  ;;  %v3310_v11 = vmul.bf16 %v3230_v63, %v9100_v35 }
 0x2cd   : > { %v3555_v46 = vrot.slane %v3554_v40, 1  ;;  %v3624_v54 = vadd.f32 %v3623_v43, %v3622_v4  ;;  %v3685_v41 = vadd.f32 %v3684_v53, %v3683_v0  ;;  %v3419_v39 = vunpack.c.l.bf16 %v3309_v7  ;;  %5487 = vmatpush1.bf16.msra.mxu1 %v7204_v22 }
 0x2ce   : > { %v3549_v5 = vadd.f32 %v3548_v17, %v3547_v61  ;;  %v3618_v13 = vrot.slane %v3617_v20, 1  ;;  %v3692_v36 = vadd.f32 %v3691_v6, %v3690_v3  ;;  %v3429_v27 = vunpack.c.h.bf16 %v3309_v7  ;;  %5488 = vmatprep.subr.bf16.mxu1 %v7209_v34  ;;  %v7215_v61 = vld [vmem:[#allocation5 + $0x2d4] ss:$8 sps:$4 sm:$0xff]  }
 0x2cf   : > { %v3556_v33 = vadd.f32 %v3555_v46, %v3554_v40  ;;  %v3625_v9 = vrot.slane %v3624_v54, 1  ;;  %v3686_v32 = vrot.slane %v3685_v41, 2  ;;  %v3420_v30 = vunpack.c.l.bf16 %v3310_v11  ;;  %v7213_v46 = vld [vmem:[#allocation5 + $0x2d0] ss:$8 sps:$4 sm:$0xff]  }
 0x2d0   : > { %v4079_v55 = vpack.c.bf16 %v3549_v5, %v3549_v5  ;;  %v3619_v25 = vadd.f32 %v3618_v13, %v3617_v20  ;;  %v3693_v49 = vrot.slane %v3692_v36, 2  ;;  %v3753_v35 = vadd.f32 %v3429_v27, %v3419_v39  ;;  %v7218_v5 = vld [vmem:[#allocation5 + $0x2e4] ss:$8 sps:$4 sm:$0xff]  }
 0x2d1   : > { %v4080_v37 = vpack.c.bf16 %v3556_v33, %v3556_v33  ;;  %v3626_v16 = vadd.f32 %v3625_v9, %v3624_v54  ;;  %v3687_v42 = vadd.f32 %v3686_v32, %v3685_v41  ;;  %v3430_v48 = vunpack.c.h.bf16 %v3310_v11  ;;  %5489 = vmatpush1.bf16.msra.mxu1 %v7207_v15 }
 0x2d2   : > { %v4411_v4 = vunpack.c.l.b16 %v4079_v55  ;;  %v4089_v0 = vpack.c.bf16 %v3619_v25, %v3619_v25  ;;  %v3694_v10 = vadd.f32 %v3693_v49, %v3692_v36  ;;  %v3754_v22 = vrot.slane %v3753_v35, 4  ;;  %5490 = vmatprep.subr.bf16.mxu1 %v7212_v45  ;;  %v7216_v49 = vld [vmem:[#allocation5 + $0x2e0] ss:$8 sps:$4 sm:$0xff]  }
 0x2d3   : > { %v9186_v19 = vunpack.c.l.b16 %v4080_v37  ;;  %v4090_v3 = vpack.c.bf16 %v3626_v16, %v3626_v16  ;;  %v3688_v63 = vrot.slane %v3687_v42, 1  ;;  %v3760_v34 = vadd.f32 %v3430_v48, %v3420_v30  ;;  %v7221_v48 = vld [vmem:[#allocation5 + $0x2f4] ss:$8 sps:$4 sm:$0xff]  }
 0x2d4   : > { %v4421_v40 = vunpack.c.l.b16 %v4089_v0  ;;  %v3695_v43 = vrot.slane %v3694_v10, 1  ;;  %v3755_v53 = vadd.f32 %v3754_v22, %v3753_v35  ;;  %v3159_v7 = vmul.bf16 1056980736, %v9166_v24 }
 0x2d5   : > { %v9189_v17 = vunpack.c.l.b16 %v4090_v3  ;;  %v3689_v20 = vadd.f32 %v3688_v63, %v3687_v42  ;;  %v3761_v6 = vrot.slane %v3760_v34, 4  ;;  %v3160_v11 = vmul.bf16 1056980736, %v9173_v14  ;;  %5491 = vmatpush1.bf16.msra.mxu1 %v7210_v38 }
 0x2d6   : > { %v9193_v54 = vsel %vm4487_vm1, %v4421_v40, %v4411_v4  ;;  %v3696_v41 = vadd.f32 %v3695_v43, %v3694_v10  ;;  %v3756_v39 = vrot.slane %v3755_v53, 2  ;;  %v3239_v15 = vadd.bf16 1056980736, %v3159_v7  ;;  %5492 = vmatprep.subr.bf16.mxu1 %v7215_v61  ;;  %v7224_v7 = vld [vmem:[#allocation5 + $0x304] ss:$8 sps:$4 sm:$0xff]  }
 0x2d7   : > { %v4099_v13 = vpack.c.bf16 %v3689_v20, %v3689_v20  ;;  %v3762_v36 = vadd.f32 %v3761_v6, %v3760_v34  ;;  %v3240_v27 = vadd.bf16 1056980736, %v3160_v11  ;;  %v3169_v24 = vmul.bf16 1056980736, %v9176_v57  ;;  %v7219_v34 = vld [vmem:[#allocation5 + $0x2f0] ss:$8 sps:$4 sm:$0xff]  }
 0x2d8   : > { %v4100_v45 = vpack.c.bf16 %v3696_v41, %v3696_v41  ;;  %v3757_v33 = vadd.f32 %v3756_v39, %v3755_v53  ;;  %v3319_v9 = vmul.bf16 %v3239_v15, %v9114_v12  ;;  %v3170_v14 = vmul.bf16 1056980736, %v9181_v26 }
 0x2d9   : > { %v4431_v32 = vunpack.c.l.b16 %v4099_v13  ;;  %v3763_v30 = vrot.slane %v3762_v36, 2  ;;  %v3320_v55 = vmul.bf16 %v3240_v27, %v9116_v58  ;;  %v3249_v25 = vadd.bf16 1056980736, %v3169_v24  ;;  %5493 = vmatpush1.bf16.msra.mxu1 %v7213_v46 }
 0x2da   : > { %v4432_v35 = vunpack.c.l.b16 %v4100_v45  ;;  %v3758_v37 = vrot.slane %v3757_v33, 1  ;;  %v3439_v16 = vunpack.c.l.bf16 %v3319_v9  ;;  %v3449_v42 = vunpack.c.h.bf16 %v3319_v9  ;;  %5494 = vmatprep.subr.bf16.mxu1 %v7218_v5 }
 0x2db   : > { %v3764_v57 = vadd.f32 %v3763_v30, %v3762_v36  ;;  %v3440_v38 = vunpack.c.l.bf16 %v3320_v55  ;;  %v3450_v4 = vunpack.c.h.bf16 %v3320_v55  ;;  %v3329_v12 = vmul.bf16 %v3249_v25, %v9124_v44 }
 0x2dc   : > { %v3759_v0 = vadd.f32 %v3758_v37, %v3757_v33  ;;  %v3823_v26 = vadd.f32 %v3449_v42, %v3439_v16  ;;  %v3250_v10 = vadd.bf16 1056980736, %v3170_v14  ;;  %v3019_v22 = vmul.bf16 1056980736, %v9145_v29 }
 0x2dd   : > { %v3765_v58 = vrot.slane %v3764_v57, 1  ;;  %v3830_v61 = vadd.f32 %v3450_v4, %v3440_v38  ;;  %v3459_v3 = vunpack.c.l.bf16 %v3329_v12  ;;  %v3469_v63 = vunpack.c.h.bf16 %v3329_v12  ;;  %5495 = vmatpush1.bf16.msra.mxu1 %v7216_v49 }
 0x2de   : > { %v4109_v40 = vpack.c.bf16 %v3759_v0, %v3759_v0  ;;  %v3824_v43 = vrot.slane %v3823_v26, 4  ;;  %v3330_v53 = vmul.bf16 %v3250_v10, %v9126_v62  ;;  %7454 = vtanh.bf16 %v3019_v22  ;;  %5496 = vmatprep.subr.bf16.mxu1 %v7221_v48 }
 0x2df   : > { %v3766_v20 = vadd.f32 %v3765_v58, %v3764_v57  ;;  %v3831_v44 = vrot.slane %v3830_v61, 4  ;;  %v3893_v6 = vadd.f32 %v3469_v63, %v3459_v3  ;;  %v3020_v11 = vmul.bf16 1056980736, %v9151_v52  ;;  %v9714_v58 = vld [vmem:[#allocation15_spill] sm:$0xff] }
 0x2e0   : > { %v4441_v46 = vunpack.c.l.b16 %v4109_v40  ;;  %v3825_v41 = vadd.f32 %v3824_v43, %v3823_v26  ;;  %v3460_v39 = vunpack.c.l.bf16 %v3330_v53  ;;  %v3470_v15 = vunpack.c.h.bf16 %v3330_v53 }
 0x2e1   : > { %v4110_v5 = vpack.c.bf16 %v3766_v20, %v3766_v20  ;;  %v3832_v13 = vadd.f32 %v3831_v44, %v3830_v61  ;;  %v3894_v36 = vrot.slane %v3893_v6, 4  ;;  %7456 = vtanh.bf16 %v3020_v11  ;;  %5497 = vmatpush1.bf16.msra.mxu1 %v7219_v34  ;;  %v9715_v61 = vld [vmem:[#allocation19_spill] sm:$0xff] }
 0x2e2   : > { %v3826_v27 = vrot.slane %v3825_v41, 2  ;;  %v3900_v24 = vadd.f32 %v3470_v15, %v3460_v39  ;;  %v9205_v62 = vpack.c.bf16 %v9159_v18, %v9149_v2  ;;  %v9209_v45 = vpack.c.bf16 %v9171_v8, %v9155_v60  ;;  %5507 = vmatprep.subr.bf16.mxu1 %v7224_v7  ;;  %v9716_v44 = vld [vmem:[#allocation23_spill] sm:$0xff] }
 0x2e3   : > { %v4442_v33 = vunpack.c.l.b16 %v4110_v5  ;;  %v3833_v9 = vrot.slane %v3832_v13, 2  ;;  %v3895_v14 = vadd.f32 %v3894_v36, %v3893_v6  ;;  %v4529_v30 = vsel %vm4487_vm1, %v9189_v17, %v9186_v19 }
 0x2e4   : > { %v3827_v55 = vadd.f32 %v3826_v27, %v3825_v41  ;;  %v3901_v25 = vrot.slane %v3900_v24, 4  ;;  %v3029_v49 = vmul.bf16 1056980736, %v9205_v62  ;;  %v3030_v37 = vmul.bf16 1056980736, %v9209_v45 }
 0x2e5   : > { %v3834_v2 = vadd.f32 %v3833_v9, %v3832_v13  ;;  %v3896_v18 = vrot.slane %v3895_v14, 2  ;;  %v4530_v16 = vsel %vm4489_vm2, %v4432_v35, %v4529_v30  ;;  %v4523_v60 = vsel %vm4489_vm2, %v4431_v32, %v9193_v54 }
 0x2e6   : > { %v3828_v8 = vrot.slane %v3827_v55, 1  ;;  %v3902_v42 = vadd.f32 %v3901_v25, %v3900_v24  ;;  %7458 = vtanh.bf16 %v3029_v49  ;;  %v4531_v48 = vsel %vm4491_vm3, %v4442_v33, %v4530_v16  ;;  %v9221_v38 = vpop.f32.mrb[96].mxu0 }
 0x2e7   : > { %v3835_v57 = vrot.slane %v3834_v2, 1  ;;  %v3897_v19 = vadd.f32 %v3896_v18, %v3895_v14  ;;  %7460 = vtanh.bf16 %v3030_v37  ;;  %v4524_v17 = vsel %vm4491_vm3, %v4441_v46, %v4523_v60  ;;  %v9227_v32 = vpop.f32.mrb[97].mxu0 }
 0x2e8   : > { %v3829_v4 = vadd.f32 %v3828_v8, %v3827_v55  ;;  %v3903_v12 = vrot.slane %v3902_v42, 2  ;;  %v3989_v0 = vrot.slane %v9040_v56, 1  ;;  %v4058_v54 = vadd.f32 %v4057_v1, %v9162_v50  ;;  %v9235_v63 = vpop.f32.mrb[98].mxu0 }
 0x2e9   : > { %v7455_v35 = vpop.eup %7454  ;;  %v3836_v26 = vadd.f32 %v3835_v57, %v3834_v2  ;;  %v3898_v10 = vrot.slane %v3897_v19, 1  ;;  %v4464_v22 = vunpack.c.l.b16 %v4132_v23  ;;  %v4543_v3 = vsel %vm4487_vm1, %v9715_v61, %v9714_v58  ;;  %v9238_v1 = vpop.f32.mrb[99].mxu0  ;;  %v9717_v2 = vld [vmem:[#allocation26_spill] sm:$0xff] }
 0x2ea   : > { %v4119_v34 = vpack.c.bf16 %v3829_v4, %v3829_v4  ;;  %v3904_v40 = vadd.f32 %v3903_v12, %v3902_v42  ;;  %v3179_v43 = vmul.bf16 1056980736, %v7455_v35  ;;  %v3990_v50 = vadd.f32 %v3989_v0, %v9040_v56 }
 0x2eb   : > { %v4120_v53 = vpack.c.bf16 %v3836_v26, %v3836_v26  ;;  %v3899_v7 = vadd.f32 %v3898_v10, %v3897_v19  ;;  %v4059_v20 = vrot.slane %v4058_v54, 1  ;;  %v4544_v51 = vsel %vm4489_vm2, %v9716_v44, %v4543_v3 }
 0x2ec   : > { %v7457_v23 = vpop.eup %7456  ;;  %v4451_v6 = vunpack.c.l.b16 %v4119_v34  ;;  %v3905_v11 = vrot.slane %v3904_v40, 1  ;;  %v3259_v46 = vadd.bf16 1056980736, %v3179_v43  ;;  %v4142_v41 = vpack.c.bf16 %v3990_v50, %v3990_v50  ;;  %v9718_v50 = vld [vmem:[#allocation17_spill] sm:$0xff] }
 0x2ed   : > { %v4129_v39 = vpack.c.bf16 %v3899_v7, %v3899_v7  ;;  %v3180_v15 = vmul.bf16 1056980736, %v7457_v23  ;;  %v4452_v5 = vunpack.c.l.b16 %v4120_v53  ;;  %v4060_v13 = vadd.f32 %v4059_v20, %v4058_v54  ;;  %v547_v54 = vld [vmem:[%s9587_s2 + $0x8] sm:$0x3] }
 0x2ee   : > { %v3339_v36 = vmul.bf16 %v3259_v46, %v9145_v29  ;;  %v3906_v56 = vadd.f32 %v3905_v11, %v3904_v40  ;;  %v4525_v27 = vsel %vm4493_vm4, %v4451_v6, %v4524_v17  ;;  %v4474_v24 = vunpack.c.l.b16 %v4142_v41  ;;  %v2806_v55 = vpop.f32.mrb[100].mxu0 }
 0x2ef   : > { %v4461_v33 = vunpack.c.l.b16 %v4129_v39  ;;  %v3260_v9 = vadd.bf16 1056980736, %v3180_v15  ;;  %v4532_v14 = vsel %vm4493_vm4, %v4452_v5, %v4531_v48  ;;  %v4152_v30 = vpack.c.bf16 %v4060_v13, %v4060_v13  ;;  %v2808_v16 = vpop.f32.mrb[101].mxu0 }
 0x2f0   : > { %v3479_v25 = vunpack.c.l.bf16 %v3339_v36  ;;  %v3489_v49 = vunpack.c.h.bf16 %v3339_v36  ;;  %v4130_v37 = vpack.c.bf16 %v3906_v56, %v3906_v56  ;;  %v4545_v18 = vsel %vm4491_vm3, %v9717_v2, %v4544_v51  ;;  %v2810_v48 = vpop.f32.mrb[102].mxu0  ;;  %v9719_v51 = vld [vmem:[#allocation18_spill] sm:$0xff] }
 0x2f1   : > { %v7459_v60 = vpop.eup %7458  ;;  %v3340_v29 = vmul.bf16 %v3260_v9, %v9151_v52  ;;  %v9249_v8 = vsel %vm4495_vm5, %v4461_v33, %v4525_v27  ;;  %v4484_v42 = vunpack.c.l.b16 %v4152_v30  ;;  %v4546_v57 = vsel %vm4493_vm4, %v9048_v59, %v4545_v18  ;;  %v2812_v35 = vpop.f32.mrb[103].mxu0 }
 0x2f2   : > { %v7461_v19 = vpop.eup %7460  ;;  %v3963_v17 = vadd.f32 %v3489_v49, %v3479_v25  ;;  %v3189_v4 = vmul.bf16 1056980736, %v7459_v60  ;;  %v4462_v12 = vunpack.c.l.b16 %v4130_v37  ;;  %v4547_v0 = vsel %vm4495_vm5, %v4464_v22, %v4546_v57 }
 0x2f3   : > { %v3480_v52 = vunpack.c.l.bf16 %v3340_v29  ;;  %v3490_v26 = vunpack.c.h.bf16 %v3340_v29  ;;  %v3190_v10 = vmul.bf16 1056980736, %v7461_v19  ;;  %v4548_v58 = vsel %vm4497_vm6, %v4474_v24, %v4547_v0 }
 0x2f4   : > { %v3964_v61 = vrot.slane %v3963_v17, 4  ;;  %v3269_v3 = vadd.bf16 1056980736, %v3189_v4  ;;  %v9259_v59 = vsel %vm4495_vm5, %v4462_v12, %v4532_v14  ;;  %v9262_v34 = vsel %vm4499_vm7, %v4484_v42, %v4548_v58 }
 0x2f5   : > { %v4052_v22 = vrot.slane %v9178_v21, 1  ;;  %v3970_v40 = vadd.f32 %v3490_v26, %v3480_v52  ;;  %v3270_v43 = vadd.bf16 1056980736, %v3190_v10  ;;  %v9266_v53 = vrot.slane %v547_v54, %v9718_v50 }
 0x2f6   : > { %v3965_v7 = vadd.f32 %v3964_v61, %v3963_v17  ;;  %v3349_v20 = vmul.bf16 %v3269_v3, %v9205_v62  ;;  %v4571_v44 = vpack.c.b16 %v9262_v34, %v9262_v34  ;;  %v9272_v23 = vrot.slane %v547_v54, %v9719_v51  ;;  %v2816_v39 = vpop.f32.mrb[104].mxu0 }
 0x2f7   : > { %v3971_v6 = vrot.slane %v3970_v40, 4  ;;  %v3350_v11 = vmul.bf16 %v3270_v43, %v9209_v45  ;;  %v6502_v46 = vadd.f32 %v9221_v38, %v9266_v53  ;;  %v6504_v41 = vadd.f32 %v9235_v63, %v9266_v53  ;;  %v2818_v36 = vpop.f32.mrb[105].mxu0 }
 0x2f8   : > { %v3966_v15 = vrot.slane %v3965_v7, 2  ;;  %v3499_v5 = vunpack.c.l.bf16 %v3349_v20  ;;  %v3509_v13 = vunpack.c.h.bf16 %v3349_v20  ;;  %v6503_v62 = vadd.f32 %v9227_v32, %v9272_v23  ;;  %v2820_v45 = vpop.f32.mrb[106].mxu0 }
 0x2f9   : > { %v3972_v56 = vadd.f32 %v3971_v6, %v3970_v40  ;;  %v3500_v27 = vunpack.c.l.bf16 %v3350_v11  ;;  %v3510_v24 = vunpack.c.h.bf16 %v3350_v11  ;;  %v9281_v33 = vpack.c.bf16 %v6504_v41, %v6502_v46  ;;  %v2822_v30 = vpop.f32.mrb[107].mxu0 }
 0x2fa   : > { %v3967_v9 = vadd.f32 %v3966_v15, %v3965_v7  ;;  %v4033_v14 = vadd.f32 %v3509_v13, %v3499_v5  ;;  %v6505_v38 = vadd.f32 %v9238_v1, %v9272_v23  ;;  %v6506_v63 = vadd.f32 %v2806_v55, %v9266_v53 }
 0x2fb   : > { %v3973_v25 = vrot.slane %v3972_v56, 2  ;;  %v4040_v49 = vadd.f32 %v3510_v24, %v3500_v27  ;;  %v2963_v37 = vmul.bf16 1056980736, %v9281_v33  ;;  %v6507_v32 = vadd.f32 %v2808_v16, %v9272_v23 }
 0x2fc   : > { %v3968_v2 = vrot.slane %v3967_v9, 1  ;;  %v4034_v18 = vrot.slane %v4033_v14, 4  ;;  %v9288_v60 = vpack.c.bf16 %v6505_v38, %v6503_v62  ;;  %v6508_v29 = vadd.f32 %v2810_v48, %v9266_v53 }
 0x2fd   : > { %v3974_v42 = vadd.f32 %v3973_v25, %v3972_v56  ;;  %v4041_v57 = vrot.slane %v4040_v49, 4  ;;  %7462 = vtanh.bf16 %v2963_v37  ;;  %v6509_v1 = vadd.f32 %v2812_v35, %v9272_v23 }
 0x2fe   : > { %v3969_v19 = vadd.f32 %v3968_v2, %v3967_v9  ;;  %v4035_v55 = vadd.f32 %v4034_v18, %v4033_v14  ;;  %v2964_v17 = vmul.bf16 1056980736, %v9288_v60  ;;  %v9293_v4 = vpack.c.bf16 %v6508_v29, %v6506_v63  ;;  %v2826_v52 = vpop.f32.mrb[108].mxu0 }
 0x2ff   : > { %v4042_v12 = vadd.f32 %v4041_v57, %v4040_v49  ;;  %v3975_v0 = vrot.slane %v3974_v42, 1  ;;  %v9295_v16 = vpack.c.bf16 %v6509_v1, %v6507_v32  ;;  %v6510_v54 = vadd.f32 %v2816_v39, %v9266_v53  ;;  %v2828_v58 = vpop.f32.mrb[109].mxu0 }
 0x300   : > { %v4036_v26 = vrot.slane %v4035_v55, 2  ;;  %v4139_v48 = vpack.c.bf16 %v3969_v19, %v3969_v19  ;;  %7464 = vtanh.bf16 %v2964_v17  ;;  %v2973_v10 = vmul.bf16 1056980736, %v9293_v4  ;;  %v2830_v43 = vpop.f32.mrb[110].mxu0 }
 0x301   : > { %v4043_v35 = vrot.slane %v4042_v12, 2  ;;  %v3976_v61 = vadd.f32 %v3975_v0, %v3974_v42  ;;  %v2974_v3 = vmul.bf16 1056980736, %v9295_v16  ;;  %v6511_v40 = vadd.f32 %v2818_v36, %v9272_v23  ;;  %v2832_v11 = vpop.f32.mrb[111].mxu0 }
 0x302   : > { %v4037_v7 = vadd.f32 %v4036_v26, %v4035_v55  ;;  %v4471_v20 = vunpack.c.l.b16 %v4139_v48  ;;  %7466 = vtanh.bf16 %v2973_v10  ;;  %v6512_v6 = vadd.f32 %v2820_v45, %v9266_v53 }
 0x303   : > { %v4044_v46 = vadd.f32 %v4043_v35, %v4042_v12  ;;  %v4140_v41 = vpack.c.bf16 %v3976_v61, %v3976_v61  ;;  %7468 = vtanh.bf16 %v2974_v3  ;;  %v6513_v39 = vadd.f32 %v2822_v30, %v9272_v23 }
 0x304   : > { %v4038_v15 = vrot.slane %v4037_v7, 1  ;;  %v4527_v5 = vsel %vm4497_vm6, %v4471_v20, %v9249_v8  ;;  %v9305_v13 = vpack.c.bf16 %v6512_v6, %v6510_v54  ;;  %v6514_v62 = vadd.f32 %v2826_v52, %v9266_v53  ;;  %v7222_v20 = vld [vmem:[#allocation5 + $0x300] ss:$8 sps:$4 sm:$0xff]  }
 0x305   : > { %v4045_v36 = vrot.slane %v4044_v46, 1  ;;  %v4472_v56 = vunpack.c.l.b16 %v4140_v41  ;;  %v9308_v27 = vpack.c.bf16 %v6513_v39, %v6511_v40  ;;  %v6515_v24 = vadd.f32 %v2828_v58, %v9272_v23  ;;  %v7227_v41 = vld [vmem:[#allocation5 + $0x314] ss:$8 sps:$4 sm:$0xff]  }
 0x306   : > { %v4039_v45 = vadd.f32 %v4038_v15, %v4037_v7  ;;  %v2983_v9 = vmul.bf16 1056980736, %v9305_v13  ;;  %v6516_v14 = vadd.f32 %v2830_v43, %v9266_v53  ;;  %v6517_v38 = vadd.f32 %v2832_v11, %v9272_v23  ;;  %v2836_v25 = vpop.f32.mrb[112].mxu0 }
 0x307   : > { %v4046_v63 = vadd.f32 %v4045_v36, %v4044_v46  ;;  %v4534_v8 = vsel %vm4497_vm6, %v4472_v56, %v9259_v59  ;;  %v2984_v30 = vmul.bf16 1056980736, %v9308_v27  ;;  %v9320_v49 = vadd.f32 %v4052_v22, %v9178_v21  ;;  %v2838_v29 = vpop.f32.mrb[113].mxu0 }
 0x308   : > { %v7463_v37 = vpop.eup %7462  ;;  %v4149_v32 = vpack.c.bf16 %v4039_v45, %v4039_v45  ;;  %7470 = vtanh.bf16 %v2983_v9  ;;  %v9322_v2 = vpack.c.bf16 %v6516_v14, %v6514_v62  ;;  %v9324_v18 = vpack.c.bf16 %v6517_v38, %v6515_v24  ;;  %v2840_v59 = vpop.f32.mrb[114].mxu0 }
 0x309   : > { %v4150_v42 = vpack.c.bf16 %v4046_v63, %v4046_v63  ;;  %v3123_v57 = vmul.bf16 1056980736, %v7463_v37  ;;  %7472 = vtanh.bf16 %v2984_v30  ;;  %v4141_v1 = vpack.c.bf16 %v9038_v47, %v9038_v47  ;;  %v2842_v17 = vpop.f32.mrb[115].mxu0 }
 0x30a   : > { %v4481_v19 = vunpack.c.l.b16 %v4149_v32  ;;  %v2993_v55 = vmul.bf16 1056980736, %v9322_v2  ;;  %v2994_v21 = vmul.bf16 1056980736, %v9324_v18  ;;  %v6518_v22 = vadd.f32 %v2836_v25, %v9266_v53 }
 0x30b   : > { %v7465_v12 = vpop.eup %7464  ;;  %v4482_v0 = vunpack.c.l.b16 %v4150_v42  ;;  %v3203_v54 = vadd.bf16 1056980736, %v3123_v57  ;;  %v6520_v52 = vadd.f32 %v2840_v59, %v9266_v53  ;;  %v6521_v26 = vadd.f32 %v2842_v17, %v9272_v23  ;;  %v7230_v59 = vld [vmem:[#allocation5 + $0x324] ss:$8 sps:$4 sm:$0xff]  }
 0x30c   : > { %v4528_v48 = vsel %vm4499_vm7, %v4481_v19, %v4527_v5  ;;  %v3124_v10 = vmul.bf16 1056980736, %v7465_v12  ;;  %7474 = vtanh.bf16 %v2993_v55  ;;  %v6519_v58 = vadd.f32 %v2838_v29, %v9272_v23 }
 0x30d   : > { %v7467_v35 = vpop.eup %7466  ;;  %v4535_v61 = vsel %vm4499_vm7, %v4482_v0, %v4534_v8  ;;  %v4568_v3 = vpack.c.b16 %v4528_v48, %v4528_v48  ;;  %v3283_v40 = vmul.bf16 %v3203_v54, %v9281_v33  ;;  %7476 = vtanh.bf16 %v2994_v21 }
 0x30e   : > { %v7469_v43 = vpop.eup %7468  ;;  %v4569_v7 = vpack.c.b16 %v4535_v61, %v4535_v61  ;;  %v3204_v6 = vadd.bf16 1056980736, %v3124_v10  ;;  %v3133_v11 = vmul.bf16 1056980736, %v7467_v35  ;;  %v9337_v46 = vpack.c.bf16 %v6520_v52, %v6518_v22  ;;  %v2846_v36 = vpop.f32.mrb[116].mxu0 }
 0x30f   : > { %v3363_v39 = vunpack.c.l.bf16 %v3283_v40  ;;  %v3373_v15 = vunpack.c.h.bf16 %v3283_v40  ;;  %v3134_v5 = vmul.bf16 1056980736, %v7469_v43  ;;  %v9339_v62 = vpack.c.bf16 %v6521_v26, %v6519_v58  ;;  %v2848_v45 = vpop.f32.mrb[117].mxu0  ;;  %v7228_v26 = vld [vmem:[#allocation5 + $0x320] ss:$8 sps:$4 sm:$0xff]  }
 0x310   : > { %5498 = vmatprep.mubr.bf16.mxu1 %v4569_v7  ;;  %v3284_v56 = vmul.bf16 %v3204_v6, %v9288_v60  ;;  %v3213_v24 = vadd.bf16 1056980736, %v3133_v11  ;;  %v3003_v33 = vmul.bf16 1056980736, %v9337_v46  ;;  %v4151_v9 = vpack.c.bf16 %v9320_v49, %v9320_v49  ;;  %v2850_v30 = vpop.f32.mrb[118].mxu0 }
 0x311   : > { %5499 = vmatmul.mubr.bf16.vlgmr.msra.gmra.mrb[64].mxu1 %v4568_v3  ;;  %v3571_v14 = vadd.f32 %v3373_v15, %v3363_v39  ;;  %v3214_v38 = vadd.bf16 1056980736, %v3134_v5  ;;  %v3004_v63 = vmul.bf16 1056980736, %v9339_v62  ;;  %v6522_v8 = vadd.f32 %v2846_v36, %v9266_v53  ;;  %v7225_v60 = vld [vmem:[#allocation5 + $0x310] ss:$8 sps:$4 sm:$0xff]  }
 0x312   : > { %5508 = vmatpush1.bf16.msra.mxu1 %v7222_v20  ;;  %5539 = vmatprep.mubr.bf16.mxu1 %v4571_v44  ;;  %v3364_v25 = vunpack.c.l.bf16 %v3284_v56  ;;  %v3374_v37 = vunpack.c.h.bf16 %v3284_v56  ;;  %v3293_v32 = vmul.bf16 %v3213_v24, %v9293_v4  ;;  %v9352_v29 = vadd.f32 %v2848_v45, %v9272_v23  ;;  %v9354_v42 = vpop.f32.mrb[119].mxu0  ;;  %v7233_v61 = vld [vmem:[#allocation5 + $0x334] ss:$8 sps:$4 sm:$0xff]   ;;  %v7231_v45 = vld [vmem:[#allocation5 + $0x330] ss:$8 sps:$4 sm:$0xff]  }
 0x313   : > { %v7471_v57 = vpop.eup %7470  ;;  %5509 = vmatprep.subr.bf16.mxu1 %v7227_v41  ;;  %v3572_v19 = vrot.slane %v3571_v14, 4  ;;  %v3294_v55 = vmul.bf16 %v3214_v38, %v9295_v16  ;;  %7478 = vtanh.bf16 %v3003_v33  ;;  %v6524_v34 = vadd.f32 %v2850_v30, %v9266_v53 }
 0x314   : > { %v7473_v44 = vpop.eup %7472  ;;  %v3578_v21 = vadd.f32 %v3374_v37, %v3364_v25  ;;  %v3383_v22 = vunpack.c.l.bf16 %v3293_v32  ;;  %v3393_v17 = vunpack.c.h.bf16 %v3293_v32  ;;  %v3143_v12 = vmul.bf16 1056980736, %v7471_v57 }
 0x315   : > { %v3573_v4 = vadd.f32 %v3572_v19, %v3571_v14  ;;  %v3384_v0 = vunpack.c.l.bf16 %v3294_v55  ;;  %v3394_v54 = vunpack.c.h.bf16 %v3294_v55  ;;  %v3144_v52 = vmul.bf16 1056980736, %v7473_v44 }
 0x316   : > { %5510 = vmatpush1.bf16.msra.mxu1 %v7225_v60  ;;  %v3579_v48 = vrot.slane %v3578_v21, 4  ;;  %v3641_v10 = vadd.f32 %v3393_v17, %v3383_v22  ;;  %v3223_v58 = vadd.bf16 1056980736, %v3143_v12  ;;  %v9358_v35 = vpack.c.bf16 %v6524_v34, %v6522_v8  ;;  %v9360_v7 = vpop.f32.mrb[120].mxu0  ;;  %v7234_v17 = vld [vmem:[#allocation5 + $0x340] ss:$8 sps:$4 sm:$0xff]  }
 0x317   : > { %v7475_v16 = vpop.eup %7474  ;;  %5511 = vmatprep.subr.bf16.mxu1 %v7230_v59  ;;  %v3574_v3 = vrot.slane %v3573_v4, 2  ;;  %v3648_v40 = vadd.f32 %v3394_v54, %v3384_v0  ;;  %v3224_v43 = vadd.bf16 1056980736, %v3144_v52  ;;  %7480 = vtanh.bf16 %v3004_v63  ;;  %v9363_v15 = vpop.f32.mrb[121].mxu0  ;;  %v7239_v52 = vld [vmem:[#allocation5 + $0x354] ss:$8 sps:$4 sm:$0xff]  }
 0x318   : > { %v7477_v20 = vpop.eup %7476  ;;  %v3580_v6 = vadd.f32 %v3579_v48, %v3578_v21  ;;  %v3642_v11 = vrot.slane %v3641_v10, 4  ;;  %v3303_v41 = vmul.bf16 %v3223_v58, %v9305_v13  ;;  %v3153_v39 = vmul.bf16 1056980736, %v7475_v16  ;;  %v9366_v33 = vpop.f32.mrb[122].mxu0  ;;  %v7236_v13 = vld [vmem:[#allocation5 + $0x344] ss:$8 sps:$4 sm:$0xff]  }
 0x319   : > { %v3575_v5 = vadd.f32 %v3574_v3, %v3573_v4  ;;  %v3649_v36 = vrot.slane %v3648_v40, 4  ;;  %v3304_v56 = vmul.bf16 %v3224_v43, %v9308_v27  ;;  %v3154_v24 = vmul.bf16 1056980736, %v7477_v20  ;;  %v9368_v30 = vpop.f32.mrb[123].mxu0 }
 0x31a   : > { %5512 = vmatpush1.bf16.msra.mxu1 %v7228_v26  ;;  %v3581_v14 = vrot.slane %v3580_v6, 2  ;;  %v3643_v38 = vadd.f32 %v3642_v11, %v3641_v10  ;;  %v3403_v63 = vunpack.c.l.bf16 %v3303_v41  ;;  %v3413_v8 = vunpack.c.h.bf16 %v3303_v41 }
 0x31b   : > { %5513 = vmatprep.subr.bf16.mxu1 %v7233_v61  ;;  %v3576_v60 = vrot.slane %v3575_v5, 1  ;;  %v3650_v25 = vadd.f32 %v3649_v36, %v3648_v40  ;;  %v3404_v37 = vunpack.c.l.bf16 %v3304_v56  ;;  %v3414_v32 = vunpack.c.h.bf16 %v3304_v56 }
 0x31c   : > { %v3582_v57 = vadd.f32 %v3581_v14, %v3580_v6  ;;  %v3644_v59 = vrot.slane %v3643_v38, 2  ;;  %v3711_v27 = vadd.f32 %v3413_v8, %v3403_v63  ;;  %v3233_v19 = vadd.bf16 1056980736, %v3153_v39 }
 0x31d   : > { %v3577_v55 = vadd.f32 %v3576_v60, %v3575_v5  ;;  %v3651_v34 = vrot.slane %v3650_v25, 2  ;;  %v3718_v44 = vadd.f32 %v3414_v32, %v3404_v37  ;;  %v3234_v21 = vadd.bf16 1056980736, %v3154_v24 }
 0x31e   : > { %v7479_v22 = vpop.eup %7478  ;;  %5514 = vmatpush1.bf16.msra.mxu1 %v7231_v45  ;;  %v3583_v12 = vrot.slane %v3582_v57, 1  ;;  %v3645_v4 = vadd.f32 %v3644_v59, %v3643_v38  ;;  %v3712_v0 = vrot.slane %v3711_v27, 4  ;;  %v3313_v54 = vmul.bf16 %v3233_v19, %v9322_v2  ;;  %v9372_v16 = vpop.f32.mrb[124].mxu0  ;;  %v7242_v38 = vld [vmem:[#allocation5 + $0x364] ss:$8 sps:$4 sm:$0xff]  }
 0x31f   : > { %5515 = vmatprep.subr.bf16.mxu1 %v7236_v13  ;;  %v4083_v26 = vpack.c.bf16 %v3577_v55, %v3577_v55  ;;  %v3652_v48 = vadd.f32 %v3651_v34, %v3650_v25  ;;  %v3719_v10 = vrot.slane %v3718_v44, 4  ;;  %v3314_v58 = vmul.bf16 %v3234_v21, %v9324_v18  ;;  %v9374_v20 = vpop.f32.mrb[125].mxu0  ;;  %v7237_v18 = vld [vmem:[#allocation5 + $0x350] ss:$8 sps:$4 sm:$0xff]   ;;  %v7240_v59 = vld [vmem:[#allocation5 + $0x360] ss:$8 sps:$4 sm:$0xff]  }
 0x320   : > { %v3584_v61 = vadd.f32 %v3583_v12, %v3582_v57  ;;  %v3646_v3 = vrot.slane %v3645_v4, 1  ;;  %v3713_v40 = vadd.f32 %v3712_v0, %v3711_v27  ;;  %v3423_v43 = vunpack.c.l.bf16 %v3313_v54  ;;  %v9380_v39 = vpop.f32.mrb[126].mxu0  ;;  %v7245_v12 = vld [vmem:[#allocation5 + $0x374] ss:$8 sps:$4 sm:$0xff]  }
 0x321   : > { %v3653_v6 = vrot.slane %v3652_v48, 1  ;;  %v3720_v11 = vadd.f32 %v3719_v10, %v3718_v44  ;;  %v3433_v41 = vunpack.c.h.bf16 %v3313_v54  ;;  %v9378_v2 = vadd.f32 %v9354_v42, %v9272_v23  ;;  %v9382_v14 = vpop.f32.mrb[127].mxu0 }
 0x322   : > { %v7481_v5 = vpop.eup %7480  ;;  %5516 = vmatpush1.bf16.msra.mxu1 %v7234_v17  ;;  %v4084_v36 = vpack.c.bf16 %v3584_v61, %v3584_v61  ;;  %v3647_v56 = vadd.f32 %v3646_v3, %v3645_v4  ;;  %v3714_v24 = vrot.slane %v3713_v40, 2  ;;  %v3424_v45 = vunpack.c.l.bf16 %v3314_v58 }
 0x323   : > { %5517 = vmatprep.subr.bf16.mxu1 %v7239_v52  ;;  %v3654_v63 = vadd.f32 %v3653_v6, %v3652_v48  ;;  %v3721_v8 = vrot.slane %v3720_v11, 2  ;;  %v3781_v13 = vadd.f32 %v3433_v41, %v3423_v43  ;;  %v3434_v60 = vunpack.c.h.bf16 %v3314_v58  ;;  %v7243_v43 = vld [vmem:[#allocation5 + $0x370] ss:$8 sps:$4 sm:$0xff]  }
 0x324   : > { %v4415_v25 = vunpack.c.l.b16 %v4083_v26  ;;  %v4093_v42 = vpack.c.bf16 %v3647_v56, %v3647_v56  ;;  %v3715_v37 = vadd.f32 %v3714_v24, %v3713_v40  ;;  %v3163_v32 = vmul.bf16 1056980736, %v7479_v22 }
 0x325   : > { %v9384_v57 = vunpack.c.l.b16 %v4084_v36  ;;  %v3722_v27 = vadd.f32 %v3721_v8, %v3720_v11  ;;  %v3782_v19 = vrot.slane %v3781_v13, 4  ;;  %v3788_v55 = vadd.f32 %v3434_v60, %v3424_v45 }
 0x326   : > { %5518 = vmatpush1.bf16.msra.mxu1 %v7237_v18  ;;  %v4425_v34 = vunpack.c.l.b16 %v4093_v42  ;;  %v3716_v44 = vrot.slane %v3715_v37, 1  ;;  %v3243_v21 = vadd.bf16 1056980736, %v3163_v32  ;;  %v3164_v17 = vmul.bf16 1056980736, %v7481_v5 }
 0x327   : > { %5519 = vmatprep.subr.bf16.mxu1 %v7242_v38  ;;  %v4094_v4 = vpack.c.bf16 %v3654_v63, %v3654_v63  ;;  %v3723_v0 = vrot.slane %v3722_v27, 1  ;;  %v3783_v54 = vadd.f32 %v3782_v19, %v3781_v13  ;;  %v3789_v52 = vrot.slane %v3788_v55, 4  ;;  %v7248_v18 = vld [vmem:[#allocation5 + $0x384] ss:$8 sps:$4 sm:$0xff]  }
 0x328   : > { %v9387_v26 = vsel %vm4487_vm1, %v4425_v34, %v4415_v25  ;;  %v3717_v22 = vadd.f32 %v3716_v44, %v3715_v37  ;;  %v3323_v48 = vmul.bf16 %v3243_v21, %v9337_v46  ;;  %v3244_v10 = vadd.bf16 1056980736, %v3164_v17  ;;  %v9720_v44 = vld [vmem:[#allocation16_spill] sm:$0xff] }
 0x329   : > { %v3724_v58 = vadd.f32 %v3723_v0, %v3722_v27  ;;  %v3784_v61 = vrot.slane %v3783_v54, 2  ;;  %v3790_v3 = vadd.f32 %v3789_v52, %v3788_v55  ;;  %v3013_v40 = vmul.bf16 1056980736, %v9358_v35  ;;  %v7251_v27 = vld [vmem:[#allocation5 + $0x394] ss:$8 sps:$4 sm:$0xff]  }
 0x32a   : > { %5520 = vmatpush1.bf16.msra.mxu1 %v7240_v59  ;;  %v4103_v6 = vpack.c.bf16 %v3717_v22, %v3717_v22  ;;  %v3443_v11 = vunpack.c.l.bf16 %v3323_v48  ;;  %v3453_v41 = vunpack.c.h.bf16 %v3323_v48  ;;  %v3324_v5 = vmul.bf16 %v3244_v10, %v9339_v62  ;;  %v7246_v62 = vld [vmem:[#allocation5 + $0x380] ss:$8 sps:$4 sm:$0xff]   ;;  %v9721_v21 = vld [vmem:[#allocation20_spill] sm:$0xff] }
 0x32b   : > { %5521 = vmatprep.subr.bf16.mxu1 %v7245_v12  ;;  %v4104_v36 = vpack.c.bf16 %v3724_v58, %v3724_v58  ;;  %v3785_v56 = vadd.f32 %v3784_v61, %v3783_v54  ;;  %v3791_v24 = vrot.slane %v3790_v3, 2  ;;  %7482 = vtanh.bf16 %v3013_v40  ;;  %v7249_v52 = vld [vmem:[#allocation5 + $0x390] ss:$8 sps:$4 sm:$0xff]  }
 0x32c   : > { %v9392_v46 = vunpack.c.l.b16 %v4094_v4  ;;  %v3851_v45 = vadd.f32 %v3453_v41, %v3443_v11  ;;  %v3444_v38 = vunpack.c.l.bf16 %v3324_v5  ;;  %v3454_v63 = vunpack.c.h.bf16 %v3324_v5  ;;  %v9722_v4 = vld [vmem:[#allocation24_spill] sm:$0xff] }
 0x32d   : > { %v9394_v8 = vunpack.c.l.b16 %v4103_v6  ;;  %v3786_v13 = vrot.slane %v3785_v56, 1  ;;  %v3792_v60 = vadd.f32 %v3791_v24, %v3790_v3  ;;  %v9398_v25 = vpack.c.bf16 %v9378_v2, %v9352_v29 }
 0x32e   : > { %5522 = vmatpush1.bf16.msra.mxu1 %v7243_v43  ;;  %v9400_v42 = vunpack.c.l.b16 %v4104_v36  ;;  %v3852_v37 = vrot.slane %v3851_v45, 4  ;;  %v3858_v32 = vadd.f32 %v3454_v63, %v3444_v38  ;;  %v4473_v59 = vunpack.c.l.b16 %v4141_v1 }
 0x32f   : > { %5523 = vmatprep.subr.bf16.mxu1 %v7248_v18  ;;  %v3787_v19 = vadd.f32 %v3786_v13, %v3785_v56  ;;  %v3793_v55 = vrot.slane %v3792_v60, 1  ;;  %v3014_v34 = vmul.bf16 1056980736, %v9398_v25  ;;  %v4537_v29 = vsel %vm4489_vm2, %v9721_v21, %v9720_v44 }
 0x330   : > { %v3853_v2 = vadd.f32 %v3852_v37, %v3851_v45  ;;  %v3859_v17 = vrot.slane %v3858_v32, 4  ;;  %v4483_v12 = vunpack.c.l.b16 %v4151_v9  ;;  %v4538_v47 = vsel %vm4491_vm3, %v9722_v4, %v4537_v29  ;;  %v7254_v9 = vld [vmem:[#allocation5 + $0x3a4] ss:$8 sps:$4 sm:$0xff]   ;;  %v7257_v45 = vld [vmem:[#allocation5 + $0x3b4] ss:$8 sps:$4 sm:$0xff]  }
 0x331   : > { %v4113_v1 = vpack.c.bf16 %v3787_v19, %v3787_v19  ;;  %v3794_v0 = vadd.f32 %v3793_v55, %v3792_v60  ;;  %7484 = vtanh.bf16 %v3014_v34  ;;  %v4539_v54 = vsel %vm4493_vm4, %v9028_v28, %v4538_v47  ;;  %v7263_v47 = vld [vmem:[#allocation5 + $0x3d4] ss:$8 sps:$4 sm:$0xff]  }
 0x332   : > { %5524 = vmatpush1.bf16.msra.mxu1 %v7246_v62  ;;  %v3854_v22 = vrot.slane %v3853_v2, 2  ;;  %v3860_v48 = vadd.f32 %v3859_v17, %v3858_v32  ;;  %v4540_v10 = vsel %vm4495_vm5, %v9131_v31, %v4539_v54  ;;  %v6526_v49 = vadd.f32 %v9360_v7, %v9266_v53 }
 0x333   : > { %5525 = vmatprep.subr.bf16.mxu1 %v7251_v27  ;;  %v4114_v58 = vpack.c.bf16 %v3794_v0, %v3794_v0  ;;  %v4541_v61 = vsel %vm4497_vm6, %v4473_v59, %v4540_v10  ;;  %v6527_v3 = vadd.f32 %v9363_v15, %v9272_v23  ;;  %v6528_v28 = vadd.f32 %v9366_v33, %v9266_v53  ;;  %v7252_v15 = vld [vmem:[#allocation5 + $0x3a0] ss:$8 sps:$4 sm:$0xff]   ;;  %v7255_v27 = vld [vmem:[#allocation5 + $0x3b0] ss:$8 sps:$4 sm:$0xff]  }
 0x334   : > { %v3855_v40 = vadd.f32 %v3854_v22, %v3853_v2  ;;  %v3861_v43 = vrot.slane %v3860_v48, 2  ;;  %v9426_v6 = vsel %vm4499_vm7, %v4483_v12, %v4541_v61  ;;  %v6529_v31 = vadd.f32 %v9368_v30, %v9272_v23  ;;  %v7258_v12 = vld [vmem:[#allocation5 + $0x3c0] ss:$8 sps:$4 sm:$0xff]   ;;  %v7261_v22 = vld [vmem:[#allocation5 + $0x3d0] ss:$8 sps:$4 sm:$0xff]  }
 0x335   : > { %v4445_v7 = vunpack.c.l.b16 %v4113_v1  ;;  %v4446_v11 = vunpack.c.l.b16 %v4114_v58  ;;  %v9430_v41 = vpack.c.bf16 %v6528_v28, %v6526_v49  ;;  %v6530_v5 = vadd.f32 %v9372_v16, %v9266_v53 }
 0x336   : > { %v7483_v18 = vpop.eup %7482  ;;  %5526 = vmatpush1.bf16.msra.mxu1 %v7249_v52  ;;  %v3856_v36 = vrot.slane %v3855_v40, 1  ;;  %v3862_v33 = vadd.f32 %v3861_v43, %v3860_v48  ;;  %v9434_v56 = vpack.c.bf16 %v6529_v31, %v6527_v3  ;;  %v6531_v24 = vadd.f32 %v9374_v20, %v9272_v23  ;;  %v7266_v48 = vld [vmem:[#allocation5 + $0x3e4] ss:$8 sps:$4 sm:$0xff]   ;;  %v7264_v43 = vld [vmem:[#allocation5 + $0x3e0] ss:$8 sps:$4 sm:$0xff]  }
 0x337   : > { %5527 = vmatprep.subr.bf16.mxu1 %v7254_v9  ;;  %v3173_v30 = vmul.bf16 1056980736, %v7483_v18  ;;  %v3023_v38 = vmul.bf16 1056980736, %v9430_v41  ;;  %v6532_v63 = vadd.f32 %v9380_v39, %v9266_v53  ;;  %v6533_v16 = vadd.f32 %v9382_v14, %v9272_v23  ;;  %v7260_v14 = vld [vmem:[#allocation5 + $0x3c4] ss:$8 sps:$4 sm:$0xff]  }
 0x338   : > { %v3857_v13 = vadd.f32 %v3856_v36, %v3855_v40  ;;  %v3863_v60 = vrot.slane %v3862_v33, 1  ;;  %v3024_v62 = vmul.bf16 1056980736, %v9434_v56  ;;  %v4557_v37 = vsel %vm4487_vm1, %v9392_v46, %v9384_v57 }
 0x339   : > { %v3253_v20 = vadd.bf16 1056980736, %v3173_v30  ;;  %7486 = vtanh.bf16 %v3023_v38  ;;  %v9447_v32 = vpack.c.bf16 %v6532_v63, %v6530_v5  ;;  %v9449_v59 = vpack.c.bf16 %v6533_v16, %v6531_v24  ;;  %v7267_v38 = vld [vmem:[#allocation5 + $0x3f0] ss:$8 sps:$4 sm:$0xff]  }
 0x33a   : > { %5528 = vmatpush1.bf16.msra.mxu1 %v7252_v15  ;;  %v4123_v53 = vpack.c.bf16 %v3857_v13, %v3857_v13  ;;  %v3864_v39 = vadd.f32 %v3863_v60, %v3862_v33  ;;  %7488 = vtanh.bf16 %v3024_v62  ;;  %v4558_v23 = vsel %vm4489_vm2, %v9400_v42, %v4557_v37  ;;  %v7272_v62 = vld [vmem:[#allocation5 + $0x404] ss:$8 sps:$4 sm:$0xff]  }
 0x33b   : > { %5529 = vmatprep.subr.bf16.mxu1 %v7257_v45  ;;  %v3333_v19 = vmul.bf16 %v3253_v20, %v9358_v35  ;;  %v3033_v57 = vmul.bf16 1056980736, %v9447_v32  ;;  %v3034_v46 = vmul.bf16 1056980736, %v9449_v59  ;;  %v4559_v55 = vsel %vm4491_vm3, %v4446_v11, %v4558_v23 }
 0x33c   : > { %v7485_v34 = vpop.eup %7484  ;;  %v4455_v44 = vunpack.c.l.b16 %v4123_v53  ;;  %v4124_v21 = vpack.c.bf16 %v3864_v39, %v3864_v39  ;;  %v4551_v29 = vsel %vm4489_vm2, %v9394_v8, %v9387_v26 }
 0x33d   : > { %v3463_v2 = vunpack.c.l.bf16 %v3333_v19  ;;  %v3473_v17 = vunpack.c.h.bf16 %v3333_v19  ;;  %v3174_v42 = vmul.bf16 1056980736, %v7485_v34  ;;  %7490 = vtanh.bf16 %v3033_v57 }
 0x33e   : > { %5530 = vmatpush1.bf16.msra.mxu1 %v7255_v27  ;;  %7492 = vtanh.bf16 %v3034_v46  ;;  %v4456_v35 = vunpack.c.l.b16 %v4124_v21  ;;  %v4552_v4 = vsel %vm4491_vm3, %v4445_v7, %v4551_v29  ;;  %v7269_v7 = vld [vmem:[#allocation5 + $0x3f4] ss:$8 sps:$4 sm:$0xff]   ;;  %v4570_v21 = vpack.c.b16 %v9426_v6, %v9426_v6 }
 0x33f   : > { %5531 = vmatprep.subr.bf16.mxu1 %v7260_v14  ;;  %v3921_v1 = vadd.f32 %v3473_v17, %v3463_v2  ;;  %v3254_v0 = vadd.bf16 1056980736, %v3174_v42  ;;  %v9462_v54 = vsel %vm4493_vm4, %v4455_v44, %v4552_v4  ;;  %v7275_v29 = vld [vmem:[#allocation5 + $0x414] ss:$8 sps:$4 sm:$0xff]  }
 0x340   : > { %v9465_v52 = vsel %vm4493_vm4, %v4456_v35, %v4559_v55 }
 0x341   : > { %v3922_v26 = vrot.slane %v3921_v1, 4  ;;  %v3334_v8 = vmul.bf16 %v3254_v0, %v9398_v25 }
 0x342   : > { %5532 = vmatpush1.bf16.msra.mxu1 %v7258_v12 }
 0x343   : > { %5533 = vmatprep.subr.bf16.mxu1 %v7263_v47  ;;  %v3923_v10 = vadd.f32 %v3922_v26, %v3921_v1  ;;  %v3464_v49 = vunpack.c.l.bf16 %v3334_v8  ;;  %v3474_v9 = vunpack.c.h.bf16 %v3334_v8  ;;  %v7278_v8 = vld [vmem:[#allocation5 + $0x424] ss:$8 sps:$4 sm:$0xff]  }
 0x344   : > { %v7487_v58 = vpop.eup %7486 }
 0x345   : > { %v7489_v61 = vpop.eup %7488  ;;  %v3924_v3 = vrot.slane %v3923_v10, 2  ;;  %v3928_v28 = vadd.f32 %v3474_v9, %v3464_v49  ;;  %v3183_v40 = vmul.bf16 1056980736, %v7487_v58 }
 0x346   : > { %5534 = vmatpush1.bf16.msra.mxu1 %v7261_v22  ;;  %v3184_v31 = vmul.bf16 1056980736, %v7489_v61 }
 0x347   : > { %5535 = vmatprep.subr.bf16.mxu1 %v7266_v48  ;;  %v3925_v11 = vadd.f32 %v3924_v3, %v3923_v10  ;;  %v3929_v5 = vrot.slane %v3928_v28, 4  ;;  %v3263_v25 = vadd.bf16 1056980736, %v3183_v40 }
 0x348   : > { %v7491_v18 = vpop.eup %7490  ;;  %v3264_v15 = vadd.bf16 1056980736, %v3184_v31 }
 0x349   : > { %v7493_v36 = vpop.eup %7492  ;;  %v3926_v33 = vrot.slane %v3925_v11, 1  ;;  %v3930_v24 = vadd.f32 %v3929_v5, %v3928_v28  ;;  %v3343_v45 = vmul.bf16 %v3263_v25, %v9430_v41  ;;  %v3193_v30 = vmul.bf16 1056980736, %v7491_v18  ;;  %v7270_v41 = vld [vmem:[#allocation5 + $0x400] ss:$8 sps:$4 sm:$0xff]  }
 0x34a   : > { %5536 = vmatpush1.bf16.msra.mxu1 %v7264_v43  ;;  %v3344_v63 = vmul.bf16 %v3264_v15, %v9434_v56  ;;  %v3194_v16 = vmul.bf16 1056980736, %v7493_v36  ;;  %v7276_v28 = vld [vmem:[#allocation5 + $0x420] ss:$8 sps:$4 sm:$0xff]   ;;  %v7279_v15 = vld [vmem:[#allocation5 + $0x430] ss:$8 sps:$4 sm:$0xff]  }
 0x34b   : > { %5537 = vmatprep.subr.bf16.mxu1 %v7269_v7  ;;  %v3927_v13 = vadd.f32 %v3926_v33, %v3925_v11  ;;  %v3931_v60 = vrot.slane %v3930_v24, 2  ;;  %v3483_v37 = vunpack.c.l.bf16 %v3343_v45  ;;  %v3493_v20 = vunpack.c.h.bf16 %v3343_v45 }
 0x34c   : > { %v3484_v27 = vunpack.c.l.bf16 %v3344_v63  ;;  %v3494_v53 = vunpack.c.h.bf16 %v3344_v63  ;;  %v3273_v39 = vadd.bf16 1056980736, %v3193_v30  ;;  %v3274_v23 = vadd.bf16 1056980736, %v3194_v16 }
 0x34d   : > { %v4133_v14 = vpack.c.bf16 %v3927_v13, %v3927_v13  ;;  %v3932_v19 = vadd.f32 %v3931_v60, %v3930_v24  ;;  %v3991_v57 = vadd.f32 %v3493_v20, %v3483_v37  ;;  %v7284_v24 = vld [vmem:[#allocation5 + $0x444] ss:$8 sps:$4 sm:$0xff]   ;;  %v7282_v60 = vld [vmem:[#allocation5 + $0x440] ss:$8 sps:$4 sm:$0xff]   ;;  %v7287_v37 = vld [vmem:[#allocation5 + $0x454] ss:$8 sps:$4 sm:$0xff]  }
 0x34e   : > { %5538 = vmatpush1.bf16.msra.mxu1 %v7267_v38  ;;  %v3998_v46 = vadd.f32 %v3494_v53, %v3484_v27  ;;  %v3353_v55 = vmul.bf16 %v3273_v39, %v9447_v32  ;;  %v3354_v56 = vmul.bf16 %v3274_v23, %v9449_v59  ;;  %v7273_v59 = vld [vmem:[#allocation5 + $0x410] ss:$8 sps:$4 sm:$0xff]  }
 0x34f   : > { %v4465_v34 = vunpack.c.l.b16 %v4133_v14  ;;  %v3933_v44 = vrot.slane %v3932_v19, 1  ;;  %5548 = vmatprep.subr.bf16.mxu1 %v7272_v62  ;;  %v3992_v2 = vrot.slane %v3991_v57, 4  ;;  %v7285_v14 = vld [vmem:[#allocation5 + $0x450] ss:$8 sps:$4 sm:$0xff]  }
 0x350   : > { %v3999_v17 = vrot.slane %v3998_v46, 4  ;;  %v3503_v42 = vunpack.c.l.bf16 %v3353_v55  ;;  %v3513_v12 = vunpack.c.h.bf16 %v3353_v55  ;;  %v3504_v35 = vunpack.c.l.bf16 %v3354_v56 }
 0x351   : > { %5540 = vmatmul.mubr.bf16.vlgmr.msra.gmra.mrb[64].mxu1 %v4570_v21  ;;  %v3993_v4 = vadd.f32 %v3992_v2, %v3991_v57  ;;  %v3514_v47 = vunpack.c.h.bf16 %v3354_v56  ;;  %v3934_v1 = vadd.f32 %v3933_v44, %v3932_v19  ;;  %v4554_v32 = vsel %vm4495_vm5, %v4465_v34, %v9462_v54  ;;  %v7281_v54 = vld [vmem:[#allocation5 + $0x434] ss:$8 sps:$4 sm:$0xff]   ;;  %v7290_v57 = vld [vmem:[#allocation5 + $0x464] ss:$8 sps:$4 sm:$0xff]   ;;  %v7288_v56 = vld [vmem:[#allocation5 + $0x460] ss:$8 sps:$4 sm:$0xff]  }
 0x352   : > { %5549 = vmatpush1.bf16.msra.mxu1 %v7270_v41  ;;  %v4000_v0 = vadd.f32 %v3999_v17, %v3998_v46  ;;  %v4061_v26 = vadd.f32 %v3513_v12, %v3503_v42  ;;  %v7293_v44 = vld [vmem:[#allocation5 + $0x474] ss:$8 sps:$4 sm:$0xff]   ;;  %v7291_v21 = vld [vmem:[#allocation5 + $0x470] ss:$8 sps:$4 sm:$0xff]   ;;  %v7294_v2 = vld [vmem:[#allocation5 + $0x480] ss:$8 sps:$4 sm:$0xff]  }
 0x353   : > { %5550 = vmatprep.subr.bf16.mxu1 %v7275_v29  ;;  %v3994_v6 = vrot.slane %v3993_v4, 2  ;;  %v4068_v22 = vadd.f32 %v3514_v47, %v3504_v35  ;;  %v4134_v48 = vpack.c.bf16 %v3934_v1, %v3934_v1  ;;  %v7296_v29 = vld [vmem:[#allocation5 + $0x484] ss:$8 sps:$4 sm:$0xff]   ;;  %v7299_v17 = vld [vmem:[#allocation5 + $0x494] ss:$8 sps:$4 sm:$0xff]  }
 0x354   : > { %v4001_v10 = vrot.slane %v4000_v0, 2  ;;  %v4062_v49 = vrot.slane %v4061_v26, 4  ;;  %v7297_v42 = vld [vmem:[#allocation5 + $0x490] ss:$8 sps:$4 sm:$0xff]   ;;  %v7302_v12 = vld [vmem:[#allocation5 + $0x4a4] ss:$8 sps:$4 sm:$0xff]  }
 0x355   : > { %v3995_v9 = vadd.f32 %v3994_v6, %v3993_v4  ;;  %v4069_v58 = vrot.slane %v4068_v22, 4  ;;  %v4466_v61 = vunpack.c.l.b16 %v4134_v48  ;;  %v7300_v35 = vld [vmem:[#allocation5 + $0x4a0] ss:$8 sps:$4 sm:$0xff]   ;;  %v7305_v4 = vld [vmem:[#allocation5 + $0x4b4] ss:$8 sps:$4 sm:$0xff]  }
 0x356   : > { %5551 = vmatpush1.bf16.msra.mxu1 %v7273_v59  ;;  %v4002_v3 = vadd.f32 %v4001_v10, %v4000_v0  ;;  %v4063_v40 = vadd.f32 %v4062_v49, %v4061_v26  ;;  %v7303_v47 = vld [vmem:[#allocation5 + $0x4b0] ss:$8 sps:$4 sm:$0xff]   ;;  %v7308_v1 = vld [vmem:[#allocation5 + $0x4c4] ss:$8 sps:$4 sm:$0xff]   ;;  %v7311_v59 = vld [vmem:[#allocation5 + $0x4d4] ss:$8 sps:$4 sm:$0xff]  }
 0x357   : > { %v3996_v43 = vrot.slane %v3995_v9, 1  ;;  %5552 = vmatprep.subr.bf16.mxu1 %v7278_v8  ;;  %v4070_v31 = vadd.f32 %v4069_v58, %v4068_v22  ;;  %v4561_v7 = vsel %vm4495_vm5, %v4466_v61, %v9465_v52  ;;  %v7309_v0 = vld [vmem:[#allocation5 + $0x4d0] ss:$8 sps:$4 sm:$0xff]   ;;  %v7314_v26 = vld [vmem:[#allocation5 + $0x4e4] ss:$8 sps:$4 sm:$0xff]  }
 0x358   : > { %v4064_v11 = vrot.slane %v4063_v40, 2  ;;  %v4003_v5 = vrot.slane %v4002_v3, 1  ;;  %v7312_v6 = vld [vmem:[#allocation5 + $0x4e0] ss:$8 sps:$4 sm:$0xff]   ;;  %v7317_v8 = vld [vmem:[#allocation5 + $0x4f4] ss:$8 sps:$4 sm:$0xff]  }
 0x359   : > { %v3997_v25 = vadd.f32 %v3996_v43, %v3995_v9  ;;  %v4071_v18 = vrot.slane %v4070_v31, 2  ;;  %v7315_v22 = vld [vmem:[#allocation5 + $0x4f0] ss:$8 sps:$4 sm:$0xff]   ;;  %v7318_v48 = vld [vmem:[%s9590_s5 + $0x40] sm:$0xff]   ;;  %v7320_v9 = vld [vmem:[%s9590_s5 + $0x48] sm:$0xff]  }
 0x35a   : > { %5553 = vmatpush1.bf16.msra.mxu1 %v7276_v28  ;;  %v4065_v36 = vadd.f32 %v4064_v11, %v4063_v40  ;;  %v4004_v33 = vadd.f32 %v4003_v5, %v4002_v3  ;;  %v7319_v10 = vld [vmem:[%s9590_s5] sm:$0xff]   ;;  %v7321_v58 = vld [vmem:[%s9590_s5 + $0x8] sm:$0xff]   ;;  %v7322_v61 = vld [vmem:[%s9590_s5 + $0x50] sm:$0xff]  }
 0x35b   : > { %5554 = vmatprep.subr.bf16.mxu1 %v7281_v54  ;;  %v4072_v45 = vadd.f32 %v4071_v18, %v4070_v31  ;;  %v4143_v30 = vpack.c.bf16 %v3997_v25, %v3997_v25  ;;  %v7323_v3 = vld [vmem:[%s9590_s5 + $0x10] sm:$0xff]   ;;  %v7324_v28 = vld [vmem:[%s9590_s5 + $0x58] sm:$0xff]   ;;  %v7326_v43 = vld [vmem:[%s9590_s5 + $0x60] sm:$0xff]  }
 0x35c   : > { %v4066_v38 = vrot.slane %v4065_v36, 1  ;;  %v4144_v63 = vpack.c.bf16 %v4004_v33, %v4004_v33  ;;  %v7325_v40 = vld [vmem:[%s9590_s5 + $0x18] sm:$0xff]   ;;  %v7327_v54 = vld [vmem:[%s9590_s5 + $0x20] sm:$0xff]   ;;  %v7328_v31 = vld [vmem:[%s9590_s5 + $0x68] sm:$0xff]  }
 0x35d   : > { %v4073_v16 = vrot.slane %v4072_v45, 1  ;;  %v4475_v13 = vunpack.c.l.b16 %v4143_v30  ;;  %v7330_v11 = vld [vmem:[%s9590_s5 + $0x70] sm:$0xff]   ;;  %v7332_v25 = vld [vmem:[%s9590_s5 + $0x78] sm:$0xff]  }
 0x35e   : > { %5555 = vmatpush1.bf16.msra.mxu1 %v7279_v15  ;;  %v4476_v62 = vunpack.c.l.b16 %v4144_v63  ;;  %v4067_v52 = vadd.f32 %v4066_v38, %v4065_v36  ;;  %v7331_v5 = vld [vmem:[%s9590_s5 + $0x30] sm:$0xff]   ;;  %v7333_v18 = vld [vmem:[%s9590_s5 + $0x38] sm:$0xff]   ;;  %v4315_v15 = vld [vmem:[%s9589_s4] sm:$0x3] }
 0x35f   : > { %5556 = vmatprep.subr.bf16.mxu1 %v7284_v24  ;;  %v4074_v20 = vadd.f32 %v4073_v16, %v4072_v45  ;;  %v4555_v27 = vsel %vm4497_vm6, %v4475_v13, %v4554_v32  ;;  %v7306_v32 = vld [vmem:[#allocation5 + $0x4c0] ss:$8 sps:$4 sm:$0xff]   ;;  %v4320_v36 = vrot.slane %v4315_v15, %v9718_v50  ;;  %v4324_v33 = vrot.slane %v4315_v15, %v9719_v51 }
 0x360   : > { %v4562_v53 = vsel %vm4497_vm6, %v4476_v62, %v4561_v7  ;;  %v4153_v39 = vpack.c.bf16 %v4067_v52, %v4067_v52  ;;  %v7329_v7 = vld [vmem:[%s9590_s5 + $0x28] sm:$0xff]   ;;  %v6299_v50 = vld [vmem:[%s9591_s6] ss:$0 sm:$0xff] }
 0x361   : > { %v4154_v23 = vpack.c.bf16 %v4074_v20, %v4074_v20 }
 0x362   : > { %5557 = vmatpush1.bf16.msra.mxu1 %v7282_v60  ;;  %v4485_v19 = vunpack.c.l.b16 %v4153_v39 }
 0x363   : > { %5558 = vmatprep.subr.bf16.mxu1 %v7287_v37  ;;  %v4486_v41 = vunpack.c.l.b16 %v4154_v23 }
 0x364   : > { %v4556_v46 = vsel %vm4499_vm7, %v4485_v19, %v4555_v27 }
 0x365   : > { %v4563_v55 = vsel %vm4499_vm7, %v4486_v41, %v4562_v53  ;;  %v4572_v49 = vpack.c.b16 %v4556_v46, %v4556_v46 }
 0x366   : > { %5559 = vmatpush1.bf16.msra.mxu1 %v7285_v14  ;;  %v4573_v34 = vpack.c.b16 %v4563_v55, %v4563_v55 }
 0x367   : > { %5560 = vmatprep.subr.bf16.mxu1 %v7290_v57 }
 0x368   : > { %5580 = vmatprep.mubr.bf16.mxu1 %v4573_v34 }
 0x36a   : > { %5561 = vmatpush1.bf16.msra.mxu1 %v7288_v56 }
 0x36b   : > { %5562 = vmatprep.subr.bf16.mxu1 %v7293_v44 }
 0x36e   : > { %5563 = vmatpush1.bf16.msra.mxu1 %v7291_v21 }
 0x36f   : > { %5564 = vmatprep.subr.bf16.mxu1 %v7296_v29 }
 0x372   : > { %5565 = vmatpush1.bf16.msra.mxu1 %v7294_v2 }
 0x373   : > { %5566 = vmatprep.subr.bf16.mxu1 %v7299_v17 }
 0x376   : > { %5567 = vmatpush1.bf16.msra.mxu1 %v7297_v42 }
 0x377   : > { %5568 = vmatprep.subr.bf16.mxu1 %v7302_v12 }
 0x37a   : > { %5569 = vmatpush1.bf16.msra.mxu1 %v7300_v35 }
 0x37b   : > { %5570 = vmatprep.subr.bf16.mxu1 %v7305_v4 }
 0x37e   : > { %5571 = vmatpush1.bf16.msra.mxu1 %v7303_v47 }
 0x37f   : > { %5572 = vmatprep.subr.bf16.mxu1 %v7308_v1 }
 0x382   : > { %5573 = vmatpush1.bf16.msra.mxu1 %v7306_v32 }
 0x383   : > { %5574 = vmatprep.subr.bf16.mxu1 %v7311_v59 }
 0x386   : > { %5575 = vmatpush1.bf16.msra.mxu1 %v7309_v0 }
 0x387   : > { %5576 = vmatprep.subr.bf16.mxu1 %v7314_v26 }
 0x38a   : > { %5577 = vmatpush1.bf16.msra.mxu1 %v7312_v6 }
 0x38b   : > { %5578 = vmatprep.subr.bf16.mxu1 %v7317_v8 }
 0x38e   : > { %5579 = vmatpush1.bf16.msra.mxu1 %v7315_v22 }
 0x38f   : > { %6320 = vmatprep.subr.bf16.mxu1 %v7318_v48 }
 0x391   : > { %5581 = vmatmul.mubr.bf16.vlgmr.msra.gmra.mrb[64].mxu1 %v4572_v49 }
 0x392   : > { %6321 = vmatpush3.bf16.msra.mxu1 %v7319_v10 }
 0x393   : > { %6322 = vmatprep.subr.bf16.mxu1 %v7320_v9 }
 0x396   : > { %6323 = vmatpush3.bf16.msra.mxu1 %v7321_v58 }
 0x397   : > { %6324 = vmatprep.subr.bf16.mxu1 %v7322_v61 }
 0x39a   : > { %6325 = vmatpush3.bf16.msra.mxu1 %v7323_v3 }
 0x39b   : > { %6326 = vmatprep.subr.bf16.mxu1 %v7324_v28 }
 0x39e   : > { %6327 = vmatpush3.bf16.msra.mxu1 %v7325_v40 }
 0x39f   : > { %6328 = vmatprep.subr.bf16.mxu1 %v7326_v43 }
 0x3a2   : > { %6329 = vmatpush3.bf16.msra.mxu1 %v7327_v54 }
 0x3a3   : > { %6330 = vmatprep.subr.bf16.mxu1 %v7328_v31 }
 0x3a6   : > { %6331 = vmatpush3.bf16.msra.mxu1 %v7329_v7 }
 0x3a7   : > { %6332 = vmatprep.subr.bf16.mxu1 %v7330_v11 }
 0x3aa   : > { %6333 = vmatpush3.bf16.msra.mxu1 %v7331_v5 }
 0x3ab   : > { %6334 = vmatprep.subr.bf16.mxu1 %v7332_v25 }
 0x3ae   : > { %6335 = vmatpush3.bf16.msra.mxu1 %v7333_v18 }
 0x464   : > { %v5582_v24 = vpop.f32.mrb[64].mxu1 }
 0x465   : > { %v6534_v45 = vadd.f32 %v5582_v24, %v4320_v36  ;;  %v5584_v30 = vpop.f32.mrb[65].mxu1 }
 0x466   : > { %v6535_v38 = vadd.f32 %v5584_v30, %v4324_v33  ;;  %v5586_v63 = vpop.f32.mrb[66].mxu1 }
 0x467   : > { %v5589_v16 = vmax.f32 %v6534_v45, 0.0  ;;  %v5587_v13 = vpop.f32.mrb[67].mxu1 }
 0x468   : > { %v5590_v60 = vmax.f32 %v6535_v38, 0.0 }
 0x469   : > { %v5591_v52 = vpack.c.bf16 %v5589_v16, %v5589_v16 }
 0x46a   : > { %v5592_v62 = vpack.c.bf16 %v5590_v60, %v5590_v60 }
 0x46c   : > { %5760 = vmatprep.mubr.bf16.mxu1 %v5592_v62 }
 0x46d   : > { %5761 = vmatmul.mubr.bf16.vlgmr.msra.gmra.mrb[68].mxu1 %v5591_v52 }
 0x540   : > { %v6336_v37 = vpop.f32.mrb[68].mxu1 }
 0x541   : > { %v6337_v51 = vpop.f32.mrb[69].mxu1 }
 0x542   : > { %v6338_v20 = vadd.f32 %v6337_v51, %v6336_v37  ;;  %v6339_v27 = vpop.f32.mrb[70].mxu1 }
 0x543   : > { %v6340_v53 = vpop.f32.mrb[71].mxu1 }
 0x544   : > { %v5763_v39 = vadd.f32 %v6338_v20, %v6299_v50 }
 0x546   : > { %5768 = vst [vmem:[%s304_s22] sm:$0xff] %v5763_v39 }
 0x547   : > { %7603 = shalt.err (!%p7600_p11)
}
 0x548   : > { %s7604_s19 = scalar_lea.hbm %s9543_s9, 128  ;;  %s7608_s18 = scalar_lea.hbm %s9592_s7, 256 }
 0x549   : > { %p7605_p13 = scmp.ne.s32.totalorder %s9543_s9, %s7604_s19  ;;  %p7609_p6 = scmp.lt.u32.totalorder %s9543_s9, %s9592_s7 }
 0x54a   : > { %p7610_p9 = scmp.lt.u32.totalorder %s7608_s18, %s7604_s19  ;;  %p7612_p10 = scmp.lt.u32.totalorder %s7604_s19, %s9543_s9 }
 0x54b   : > { %p7606_p0 = pnand %p7605_p13, %p9723_p1 }
 0x54c   : > { %p7611_p12 = por %p7610_p9, %p7609_p6 }
 0x54d   : > { %p7607_p5 = pneg %p7606_p0 }
 0x54e   : > { %p7613_p2 = por %p7612_p10, %p7611_p12 }
 0x550   : > { %p7614_p3 = pnand %p7613_p2, %p7607_p5 }
 0x552   : > { %7617 = shalt.err (!%p7614_p3)
}
 0x553   : > { %6689 = dma.vmem_to_hbm [thread:$0]  (%p9723_p1), %s9545_s23, 128, %s9543_s9, %s5770_s15  }
 0x554 PF: > { %p6706_p4 = scmp.ge.s32.totalorder %s7660_s27, 2  ;;  %s5795_s22 = sand.u32 1, %s7648_s24  }
 0x555   : > { %p9724_p7 = scmp.ne.s32.totalorder %s9606_s12, 0  ;;  %s5796_s29 = scalar_lea.sflag [#allocation4], %s5795_s22 }
 0x557   : > { %p6699_p8 = pnand %p6706_p4, %p9724_p7 }
 0x559   : > { %7643 = dma.done.wait (!%p6699_p8), %s5796_s29, 128  }
 0x55a   : > { %7645 = vsyncadd (!%p6699_p8), %s5796_s29, 4294967168  ;;  %s9725_s8 = sld [smem:[#allocation11_spill]]  ;;  %p19_p11 = scmp.ge.s32.totalorder %s7735_s30, 4  }
 0x55b   : > { %s9726_s24 = smov %s7652_s25  ;;  %s9727_s25 = smov %s7656_s26 }
 0x55c   : > { %s9729_s27 = smov %s7735_s30  ;;  %21 = sbr.rel (!%p19_p11) target bundleno = 5 (0x5), region = 92 }
 0x560   : > { %s9728_s26 = smov %s9725_s8 }
 0x563   :  { %5801 = vsyncpa [#allocation3], 1 }
 0x564   :  { %5803 = vsyncpa [#allocation3 + $0x1], 1 }
 0x565   :  { %5804 = vsyncpa [#allocation6], 1 }
 0x566   :  { %5805 = vsyncpa [#allocation4], 1 }
 0x567   :  { %5807 = vsyncpa [#allocation4 + $0x1], 1 }

</bundles_post_ra>
